<compile_context>
chip_gen: v5e
topology: v5e:2x2
jax: 0.10.0
libtpu: 0.0.40
codegen_flags: <defaults>
</compile_context>

<pallas_src>
import jax
import jax.numpy as jnp
from jax.experimental import pallas as pl
from jax.experimental.pallas import tpu as pltpu

H = 7
W = 7
HW = H * W                   # 49 spatial positions
CIN = 1824
CIN_PAD = 1920               # pad K so tiles are 128-aligned (1920 = 3 * 640)
K_TILE = 640
CMID = 192
COUT = 48
EPS = 1e-5
PAD_ROWS = 72                # flat zero-padded activation buffer (needs >= 65 rows)


def fused_kernel(x_ref, w1_ref, gamma_ref, beta_ref, w2_ref, out_ref,
                 acc_ref, ypad_ref):
    k = pl.program_id(0)

    # ---- Conv2d 1x1 as a K-tiled MXU matmul (bf16 in, f32 accumulate) ----
    @pl.when(k == 0)
    def _init():
        acc_ref[...] = jnp.zeros_like(acc_ref)

    acc_ref[...] += jnp.dot(x_ref[...], w1_ref[...],
                            preferred_element_type=jnp.float32)

    # ---- epilogue on the last K tile: BN -> ReLU -> Conv2d 3x3 (pad=1) ----
    @pl.when(k == pl.num_programs(0) - 1)
    def _epilogue():
        y = acc_ref[...]                                     # [HW, CMID] f32

        # BatchNorm2d, training-mode batch statistics, folded into scale/shift.
        mean = jnp.mean(y, axis=0, keepdims=True)            # [1, CMID]
        var = jnp.mean(y * y, axis=0, keepdims=True) - mean * mean
        scale = gamma_ref[...] * jax.lax.rsqrt(var + EPS)
        shift = beta_ref[...] - mean * scale
        y = jnp.maximum(y * scale + shift, 0.0)              # ReLU

        # Flat (r = h*W + w) activation buffer, zero-padded with 8 rows on each
        # side so every shifted read of 49 rows stays in-bounds and rows that
        # fall outside the image height read zeros.
        ypad_ref[...] = jnp.zeros_like(ypad_ref)
        ypad_ref[8:8 + HW, :] = y

        # Column index w of each output row r (float floor-div; avoids int mod).
        r_idx = jax.lax.broadcasted_iota(jnp.int32, (HW, 1), 0).astype(jnp.float32)
        col = r_idx - W * jnp.floor(r_idx * (1.0 / W) + 1e-4)
        mask_l = col > 0.5            # w >= 1   (needed for dx == 0 taps)
        mask_r = col < (W - 1.5)      # w <= W-2 (needed for dx == 2 taps)

        # 3x3 conv, padding=1: 9 shifted [HW, CMID] @ [CMID, COUT] matmuls.
        acc2 = jnp.zeros((HW, COUT), jnp.float32)
        for dy in range(3):
            for dx in range(3):
                s = W * (dy - 1) + (dx - 1)
                slab = ypad_ref[8 + s:8 + s + HW, :].astype(jnp.bfloat16)
                if dx == 0:
                    slab = jnp.where(mask_l, slab, jnp.zeros_like(slab))
                elif dx == 2:
                    slab = jnp.where(mask_r, slab, jnp.zeros_like(slab))
                acc2 = acc2 + jnp.dot(slab, w2_ref[dy * 3 + dx],
                                      preferred_element_type=jnp.float32)
        out_ref[...] = acc2


def model_forward(x_nchw, w1, gamma, beta, w2):
    """x_nchw: [1, CIN, H, W] NCHW, w1: [CMID, CIN, 1, 1], w2: [COUT, CMID, 3, 3]."""
    # NCHW -> channels-last matrix [HW, CIN]; pad K to 1920, cast matmul operands
    # to bf16 (accumulation stays f32 inside the kernel).
    x_mat = jnp.transpose(x_nchw[0], (1, 2, 0)).reshape(HW, CIN)
    x_mat = jnp.pad(x_mat, ((0, 0), (0, CIN_PAD - CIN))).astype(jnp.bfloat16)

    w1_mat = jnp.transpose(w1[:, :, 0, 0], (1, 0))                     # [CIN, CMID]
    w1_mat = jnp.pad(w1_mat, ((0, CIN_PAD - CIN), (0, 0))).astype(jnp.bfloat16)

    w2_mat = jnp.transpose(w2, (2, 3, 1, 0)).reshape(9, CMID, COUT).astype(jnp.bfloat16)
    gamma2 = gamma.reshape(1, CMID).astype(jnp.float32)
    beta2 = beta.reshape(1, CMID).astype(jnp.float32)

    kt = CIN_PAD // K_TILE  # 3 K tiles -> w1/x DMA pipelines behind the matmul

    out_mat = pl.pallas_call(
        fused_kernel,
        out_shape=jax.ShapeDtypeStruct((HW, COUT), jnp.float32),
        grid=(kt,),
        in_specs=[
            pl.BlockSpec((HW, K_TILE), lambda k: (0, k)),       # x
            pl.BlockSpec((K_TILE, CMID), lambda k: (k, 0)),     # w1
            pl.BlockSpec((1, CMID), lambda k: (0, 0)),          # gamma
            pl.BlockSpec((1, CMID), lambda k: (0, 0)),          # beta
            pl.BlockSpec((9, CMID, COUT), lambda k: (0, 0, 0)), # w2
        ],
        out_specs=pl.BlockSpec((HW, COUT), lambda k: (0, 0)),
        scratch_shapes=[
            pltpu.VMEM((HW, CMID), jnp.float32),        # f32 accumulator
            pltpu.VMEM((PAD_ROWS, CMID), jnp.float32),  # zero-padded activation
        ],
        compiler_params=pltpu.CompilerParams(dimension_semantics=("arbitrary",)),
    )(x_mat, w1_mat, gamma2, beta2, w2_mat)

    # [HW, COUT] -> NCHW
    out_hwc = out_mat.reshape(H, W, COUT)
    return jnp.transpose(out_hwc, (2, 0, 1))[None]


def reference(x_nchw, w1, gamma, beta, w2):
    """Pure-JAX reference matching PyTorch forward semantics (training-mode BN)."""
    y = jax.lax.conv_general_dilated(
        x_nchw, w1, (1, 1), "VALID",
        dimension_numbers=("NCHW", "OIHW", "NCHW"),
        precision=jax.lax.Precision.HIGHEST)
    mean = jnp.mean(y, axis=(0, 2, 3), keepdims=True)
    var = jnp.mean((y - mean) ** 2, axis=(0, 2, 3), keepdims=True)
    y = (y - mean) / jnp.sqrt(var + EPS)
    y = y * gamma.reshape(1, -1, 1, 1) + beta.reshape(1, -1, 1, 1)
    y = jnp.maximum(y, 0.0)
    out = jax.lax.conv_general_dilated(
        y, w2, (1, 1), ((1, 1), (1, 1)),
        dimension_numbers=("NCHW", "OIHW", "NCHW"),
        precision=jax.lax.Precision.HIGHEST)
    return out


if __name__ == "__main__":
    key = jax.random.PRNGKey(0)
    k1, k2, k3, k4, k5 = jax.random.split(key, 5)

    # Input matches the module's expected shape [1, 1824, 7, 7] (channel counts
    # are fixed by the Conv2d weights).
    x = jax.random.normal(k1, (1, CIN, H, W), jnp.float32)

    # Deterministic synthetic parameters (shapes from the module's __init__).
    w1 = jax.random.normal(k2, (CMID, CIN, 1, 1), jnp.float32) * (1.0 / jnp.sqrt(CIN))
    gamma = 1.0 + 0.1 * jax.random.normal(k3, (CMID,), jnp.float32)
    beta = 0.1 * jax.random.normal(k4, (CMID,), jnp.float32)
    w2 = jax.random.normal(k5, (COUT, CMID, 3, 3), jnp.float32) * (1.0 / jnp.sqrt(CMID * 9))

    fwd = jax.jit(model_forward)
    out = jax.block_until_ready(fwd(x, w1, gamma, beta, w2))
    ref = jax.block_until_ready(reference(x, w1, gamma, beta, w2))

    assert out.shape == (1, COUT, H, W), out.shape
    max_err = float(jnp.max(jnp.abs(out - ref)))
    assert jnp.allclose(out, ref, atol=3e-2, rtol=3e-2), f"max abs err = {max_err}"
    print("KERNEL_OK")
</pallas_src>

<mosaic_0001>
module attributes {stable_mosaic.version = 11 : i64} {
  func.func @fused_kernel(%arg0: i32, %arg1: memref<49x640xbf16, #tpu.memory_space<vmem>>, %arg2: memref<640x192xbf16, #tpu.memory_space<vmem>>, %arg3: memref<1x192xf32, #tpu.memory_space<vmem>>, %arg4: memref<1x192xf32, #tpu.memory_space<vmem>>, %arg5: memref<9x192x48xbf16, #tpu.memory_space<vmem>>, %arg6: memref<49x48xf32, #tpu.memory_space<vmem>>, %arg7: memref<49x192xf32, #tpu.memory_space<vmem>>, %arg8: memref<72x192xf32, #tpu.memory_space<vmem>>) attributes {dimension_semantics = [#tpu.dimension_semantics<arbitrary>], iteration_bounds = array<i64: 3>, scalar_prefetch = 0 : i64, scratch_operands = 2 : i64, tpu.core_type = #tpu.core_type<tc>, window_params = [{transform_indices = @transform_0, window_bounds = array<i64: 49, 640>}, {transform_indices = @transform_1, window_bounds = array<i64: 640, 192>}, {pipeline_mode = #tpu.pipeline_mode<synchronous>, transform_indices = @transform_2, window_bounds = array<i64: 1, 192>}, {pipeline_mode = #tpu.pipeline_mode<synchronous>, transform_indices = @transform_3, window_bounds = array<i64: 1, 192>}, {pipeline_mode = #tpu.pipeline_mode<synchronous>, transform_indices = @transform_4, window_bounds = array<i64: 9, 192, 48>}, {pipeline_mode = #tpu.pipeline_mode<synchronous>, transform_indices = @transform_5, window_bounds = array<i64: 49, 48>}]} {
    %c0_i32 = arith.constant 0 : i32
    %0 = arith.cmpi eq, %arg0, %c0_i32 : i32
    %1 = arith.extui %0 : i1 to i32
    %c0_i32_0 = arith.constant 0 : i32
    %2 = arith.cmpi ne, %1, %c0_i32_0 : i32
    scf.if %2 {
      %cst_9 = arith.constant 0.000000e+00 : f32
      %12 = vector.broadcast %cst_9 : f32 to vector<49x192xf32>
      %c0_10 = arith.constant 0 : index
      %c0_11 = arith.constant 0 : index
      %13 = vector.load %arg7[%c0_10, %c0_11] : memref<49x192xf32, #tpu.memory_space<vmem>>, vector<49x192xf32>
      tpu.vector_store %arg7[%c0_10, %c0_11], %12 {strides = array<i32>} : memref<49x192xf32, #tpu.memory_space<vmem>>, vector<49x192xf32>,
    } else {
    }
    %c0 = arith.constant 0 : index
    %c0_1 = arith.constant 0 : index
    %3 = vector.load %arg7[%c0, %c0_1] : memref<49x192xf32, #tpu.memory_space<vmem>>, vector<49x192xf32>
    %c0_2 = arith.constant 0 : index
    %c0_3 = arith.constant 0 : index
    %4 = vector.load %arg1[%c0_2, %c0_3] : memref<49x640xbf16, #tpu.memory_space<vmem>>, vector<49x640xbf16>
    %c0_4 = arith.constant 0 : index
    %c0_5 = arith.constant 0 : index
    %5 = vector.load %arg2[%c0_4, %c0_5] : memref<640x192xbf16, #tpu.memory_space<vmem>>, vector<640x192xbf16>
    %cst = arith.constant dense<0.000000e+00> : vector<49x192xf32>
    %6 = tpu.matmul %4, %5, %cst {dimension_numbers = #tpu.dot_dimension_numbers<[1], [0], [0], [1], [0, 0, 1, 1], [], []>} : vector<49x640xbf16>, vector<640x192xbf16>, vector<49x192xf32> -> vector<49x192xf32>
    %7 = arith.addf %3, %6 : vector<49x192xf32>
    %c0_6 = arith.constant 0 : index
    %c0_7 = arith.constant 0 : index
    %8 = vector.load %arg7[%c0_6, %c0_7] : memref<49x192xf32, #tpu.memory_space<vmem>>, vector<49x192xf32>
    tpu.vector_store %arg7[%c0_6, %c0_7], %7 {strides = array<i32>} : memref<49x192xf32, #tpu.memory_space<vmem>>, vector<49x192xf32>,
    %c2_i32 = arith.constant 2 : i32
    %9 = arith.cmpi eq, %arg0, %c2_i32 : i32
    %10 = arith.extui %9 : i1 to i32
    %c0_i32_8 = arith.constant 0 : i32
    %11 = arith.cmpi ne, %10, %c0_i32_8 : i32
    scf.if %11 {
      %c0_9 = arith.constant 0 : index
      %c0_10 = arith.constant 0 : index
      %12 = vector.load %arg7[%c0_9, %c0_10] : memref<49x192xf32, #tpu.memory_space<vmem>>, vector<49x192xf32>
      %cst_11 = arith.constant dense<0.000000e+00> : vector<192xf32>
      %13 = vector.multi_reduction <add>, %12, %cst_11 [0] : vector<49x192xf32> to vector<192xf32>
      %14 = vector.shape_cast %13 : vector<192xf32> to vector<1x192xf32>
      %cst_12 = arith.constant 4.900000e+01 : f32
      %15 = vector.broadcast %cst_12 : f32 to vector<1x192xf32>
      %16 = arith.divf %14, %15 : vector<1x192xf32>
      %17 = arith.mulf %12, %12 : vector<49x192xf32>
      %cst_13 = arith.constant dense<0.000000e+00> : vector<192xf32>
      %18 = vector.multi_reduction <add>, %17, %cst_13 [0] : vector<49x192xf32> to vector<192xf32>
      %19 = vector.shape_cast %18 : vector<192xf32> to vector<1x192xf32>
      %cst_14 = arith.constant 4.900000e+01 : f32
      %20 = vector.broadcast %cst_14 : f32 to vector<1x192xf32>
      %21 = arith.divf %19, %20 : vector<1x192xf32>
      %22 = arith.mulf %16, %16 : vector<1x192xf32>
      %23 = arith.subf %21, %22 : vector<1x192xf32>
      %c0_15 = arith.constant 0 : index
      %c0_16 = arith.constant 0 : index
      %24 = vector.load %arg3[%c0_15, %c0_16] : memref<1x192xf32, #tpu.memory_space<vmem>>, vector<1x192xf32>
      %cst_17 = arith.constant 9.99999974E-6 : f32
      %25 = vector.broadcast %cst_17 : f32 to vector<1x192xf32>
      %26 = arith.addf %23, %25 : vector<1x192xf32>
      %27 = math.rsqrt %26 : vector<1x192xf32>
      %28 = arith.mulf %24, %27 : vector<1x192xf32>
      %c0_18 = arith.constant 0 : index
      %c0_19 = arith.constant 0 : index
      %29 = vector.load %arg4[%c0_18, %c0_19] : memref<1x192xf32, #tpu.memory_space<vmem>>, vector<1x192xf32>
      %30 = arith.mulf %16, %28 : vector<1x192xf32>
      %31 = arith.subf %29, %30 : vector<1x192xf32>
      %32 = vector.broadcast %28 : vector<1x192xf32> to vector<49x192xf32>
      %33 = arith.mulf %12, %32 : vector<49x192xf32>
      %34 = vector.broadcast %31 : vector<1x192xf32> to vector<49x192xf32>
      %35 = arith.addf %33, %34 : vector<49x192xf32>
      %cst_20 = arith.constant 0.000000e+00 : f32
      %36 = vector.broadcast %cst_20 : f32 to vector<49x192xf32>
      %37 = arith.maximumf %35, %36 : vector<49x192xf32>
      %cst_21 = arith.constant 0.000000e+00 : f32
      %38 = vector.broadcast %cst_21 : f32 to vector<72x192xf32>
      %c0_22 = arith.constant 0 : index
      %c0_23 = arith.constant 0 : index
      %39 = vector.load %arg8[%c0_22, %c0_23] : memref<72x192xf32, #tpu.memory_space<vmem>>, vector<72x192xf32>
      tpu.vector_store %arg8[%c0_22, %c0_23], %38 {strides = array<i32>} : memref<72x192xf32, #tpu.memory_space<vmem>>, vector<72x192xf32>,
      %c8 = arith.constant 8 : index
      %c0_24 = arith.constant 0 : index
      %40 = vector.load %arg8[%c8, %c0_24] : memref<72x192xf32, #tpu.memory_space<vmem>>, vector<49x192xf32>
      tpu.vector_store %arg8[%c8, %c0_24], %37 {strides = array<i32>} : memref<72x192xf32, #tpu.memory_space<vmem>>, vector<49x192xf32>,
      %41 = tpu.iota {dimensions = array<i32: 0>} : vector<49x1xi32>
      %42 = arith.sitofp %41 : vector<49x1xi32> to vector<49x1xf32>
      %cst_25 = arith.constant 0.142857149 : f32
      %43 = vector.broadcast %cst_25 : f32 to vector<49x1xf32>
      %44 = arith.mulf %42, %43 : vector<49x1xf32>
      %cst_26 = arith.constant 9.99999974E-5 : f32
      %45 = vector.broadcast %cst_26 : f32 to vector<49x1xf32>
      %46 = arith.addf %44, %45 : vector<49x1xf32>
      %47 = math.floor %46 : vector<49x1xf32>
      %cst_27 = arith.constant 7.000000e+00 : f32
      %48 = vector.broadcast %cst_27 : f32 to vector<49x1xf32>
      %49 = arith.mulf %48, %47 : vector<49x1xf32>
      %50 = arith.subf %42, %49 : vector<49x1xf32>
      %cst_28 = arith.constant 5.000000e-01 : f32
      %51 = vector.broadcast %cst_28 : f32 to vector<49x1xf32>
      %52 = arith.cmpf ogt, %50, %51 : vector<49x1xf32>
      %cst_29 = arith.constant 5.500000e+00 : f32
      %53 = vector.broadcast %cst_29 : f32 to vector<49x1xf32>
      %54 = arith.cmpf olt, %50, %53 : vector<49x1xf32>
      %cst_30 = arith.constant 0.000000e+00 : f32
      %55 = vector.broadcast %cst_30 : f32 to vector<49x48xf32>
      %c0_31 = arith.constant 0 : index
      %c0_32 = arith.constant 0 : index
      %56 = vector.load %arg8[%c0_31, %c0_32] : memref<72x192xf32, #tpu.memory_space<vmem>>, vector<49x192xf32>
      %57 = arith.truncf %56 : vector<49x192xf32> to vector<49x192xbf16>
      %cst_33 = arith.constant 0.000000e+00 : bf16
      %58 = vector.broadcast %cst_33 : bf16 to vector<49x192xbf16>
      %59 = vector.shape_cast %52 : vector<49x1xi1> to vector<49x1xi1>
      %60 = vector.broadcast %59 : vector<49x1xi1> to vector<49x192xi1>
      %61 = arith.select %60, %57, %58 : vector<49x192xi1>, vector<49x192xbf16>
      %c0_34 = arith.constant 0 : index
      %c0_35 = arith.constant 0 : index
      %c0_36 = arith.constant 0 : index
      %62 = vector.load %arg5[%c0_34, %c0_35, %c0_36] : memref<9x192x48xbf16, #tpu.memory_space<vmem>>, vector<1x192x48xbf16>
      %63 = vector.shape_cast %62 : vector<1x192x48xbf16> to vector<192x48xbf16>
      %cst_37 = arith.constant dense<0.000000e+00> : vector<49x48xf32>
      %64 = tpu.matmul %61, %63, %cst_37 {dimension_numbers = #tpu.dot_dimension_numbers<[1], [0], [0], [1], [0, 0, 1, 1], [], []>} : vector<49x192xbf16>, vector<192x48xbf16>, vector<49x48xf32> -> vector<49x48xf32>
      %65 = arith.addf %55, %64 : vector<49x48xf32>
      %c1 = arith.constant 1 : index
      %c0_38 = arith.constant 0 : index
      %66 = vector.load %arg8[%c1, %c0_38] : memref<72x192xf32, #tpu.memory_space<vmem>>, vector<49x192xf32>
      %67 = arith.truncf %66 : vector<49x192xf32> to vector<49x192xbf16>
      %c1_39 = arith.constant 1 : index
      %c0_40 = arith.constant 0 : index
      %c0_41 = arith.constant 0 : index
      %68 = vector.load %arg5[%c1_39, %c0_40, %c0_41] : memref<9x192x48xbf16, #tpu.memory_space<vmem>>, vector<1x192x48xbf16>
      %69 = vector.shape_cast %68 : vector<1x192x48xbf16> to vector<192x48xbf16>
      %cst_42 = arith.constant dense<0.000000e+00> : vector<49x48xf32>
      %70 = tpu.matmul %67, %69, %cst_42 {dimension_numbers = #tpu.dot_dimension_numbers<[1], [0], [0], [1], [0, 0, 1, 1], [], []>} : vector<49x192xbf16>, vector<192x48xbf16>, vector<49x48xf32> -> vector<49x48xf32>
      %71 = arith.addf %65, %70 : vector<49x48xf32>
      %c2 = arith.constant 2 : index
      %c0_43 = arith.constant 0 : index
      %72 = vector.load %arg8[%c2, %c0_43] : memref<72x192xf32, #tpu.memory_space<vmem>>, vector<49x192xf32>
      %73 = arith.truncf %72 : vector<49x192xf32> to vector<49x192xbf16>
      %cst_44 = arith.constant 0.000000e+00 : bf16
      %74 = vector.broadcast %cst_44 : bf16 to vector<49x192xbf16>
      %75 = vector.shape_cast %54 : vector<49x1xi1> to vector<49x1xi1>
      %76 = vector.broadcast %75 : vector<49x1xi1> to vector<49x192xi1>
      %77 = arith.select %76, %73, %74 : vector<49x192xi1>, vector<49x192xbf16>
      %c2_45 = arith.constant 2 : index
      %c0_46 = arith.constant 0 : index
      %c0_47 = arith.constant 0 : index
      %78 = vector.load %arg5[%c2_45, %c0_46, %c0_47] : memref<9x192x48xbf16, #tpu.memory_space<vmem>>, vector<1x192x48xbf16>
      %79 = vector.shape_cast %78 : vector<1x192x48xbf16> to vector<192x48xbf16>
      %cst_48 = arith.constant dense<0.000000e+00> : vector<49x48xf32>
      %80 = tpu.matmul %77, %79, %cst_48 {dimension_numbers = #tpu.dot_dimension_numbers<[1], [0], [0], [1], [0, 0, 1, 1], [], []>} : vector<49x192xbf16>, vector<192x48xbf16>, vector<49x48xf32> -> vector<49x48xf32>
      %81 = arith.addf %71, %80 : vector<49x48xf32>
      %c7 = arith.constant 7 : index
      %c0_49 = arith.constant 0 : index
      %82 = vector.load %arg8[%c7, %c0_49] : memref<72x192xf32, #tpu.memory_space<vmem>>, vector<49x192xf32>
      %83 = arith.truncf %82 : vector<49x192xf32> to vector<49x192xbf16>
      %cst_50 = arith.constant 0.000000e+00 : bf16
      %84 = vector.broadcast %cst_50 : bf16 to vector<49x192xbf16>
      %85 = vector.shape_cast %52 : vector<49x1xi1> to vector<49x1xi1>
      %86 = vector.broadcast %85 : vector<49x1xi1> to vector<49x192xi1>
      %87 = arith.select %86, %83, %84 : vector<49x192xi1>, vector<49x192xbf16>
      %c3 = arith.constant 3 : index
      %c0_51 = arith.constant 0 : index
      %c0_52 = arith.constant 0 : index
      %88 = vector.load %arg5[%c3, %c0_51, %c0_52] : memref<9x192x48xbf16, #tpu.memory_space<vmem>>, vector<1x192x48xbf16>
      %89 = vector.shape_cast %88 : vector<1x192x48xbf16> to vector<192x48xbf16>
      %cst_53 = arith.constant dense<0.000000e+00> : vector<49x48xf32>
      %90 = tpu.matmul %87, %89, %cst_53 {dimension_numbers = #tpu.dot_dimension_numbers<[1], [0], [0], [1], [0, 0, 1, 1], [], []>} : vector<49x192xbf16>, vector<192x48xbf16>, vector<49x48xf32> -> vector<49x48xf32>
      %91 = arith.addf %81, %90 : vector<49x48xf32>
      %c8_54 = arith.constant 8 : index
      %c0_55 = arith.constant 0 : index
      %92 = vector.load %arg8[%c8_54, %c0_55] : memref<72x192xf32, #tpu.memory_space<vmem>>, vector<49x192xf32>
      %93 = arith.truncf %92 : vector<49x192xf32> to vector<49x192xbf16>
      %c4 = arith.constant 4 : index
      %c0_56 = arith.constant 0 : index
      %c0_57 = arith.constant 0 : index
      %94 = vector.load %arg5[%c4, %c0_56, %c0_57] : memref<9x192x48xbf16, #tpu.memory_space<vmem>>, vector<1x192x48xbf16>
      %95 = vector.shape_cast %94 : vector<1x192x48xbf16> to vector<192x48xbf16>
      %cst_58 = arith.constant dense<0.000000e+00> : vector<49x48xf32>
      %96 = tpu.matmul %93, %95, %cst_58 {dimension_numbers = #tpu.dot_dimension_numbers<[1], [0], [0], [1], [0, 0, 1, 1], [], []>} : vector<49x192xbf16>, vector<192x48xbf16>, vector<49x48xf32> -> vector<49x48xf32>
      %97 = arith.addf %91, %96 : vector<49x48xf32>
      %c9 = arith.constant 9 : index
      %c0_59 = arith.constant 0 : index
      %98 = vector.load %arg8[%c9, %c0_59] : memref<72x192xf32, #tpu.memory_space<vmem>>, vector<49x192xf32>
      %99 = arith.truncf %98 : vector<49x192xf32> to vector<49x192xbf16>
      %cst_60 = arith.constant 0.000000e+00 : bf16
      %100 = vector.broadcast %cst_60 : bf16 to vector<49x192xbf16>
      %101 = vector.shape_cast %54 : vector<49x1xi1> to vector<49x1xi1>
      %102 = vector.broadcast %101 : vector<49x1xi1> to vector<49x192xi1>
      %103 = arith.select %102, %99, %100 : vector<49x192xi1>, vector<49x192xbf16>
      %c5 = arith.constant 5 : index
      %c0_61 = arith.constant 0 : index
      %c0_62 = arith.constant 0 : index
      %104 = vector.load %arg5[%c5, %c0_61, %c0_62] : memref<9x192x48xbf16, #tpu.memory_space<vmem>>, vector<1x192x48xbf16>
      %105 = vector.shape_cast %104 : vector<1x192x48xbf16> to vector<192x48xbf16>
      %cst_63 = arith.constant dense<0.000000e+00> : vector<49x48xf32>
      %106 = tpu.matmul %103, %105, %cst_63 {dimension_numbers = #tpu.dot_dimension_numbers<[1], [0], [0], [1], [0, 0, 1, 1], [], []>} : vector<49x192xbf16>, vector<192x48xbf16>, vector<49x48xf32> -> vector<49x48xf32>
      %107 = arith.addf %97, %106 : vector<49x48xf32>
      %c14 = arith.constant 14 : index
      %c0_64 = arith.constant 0 : index
      %108 = vector.load %arg8[%c14, %c0_64] : memref<72x192xf32, #tpu.memory_space<vmem>>, vector<49x192xf32>
      %109 = arith.truncf %108 : vector<49x192xf32> to vector<49x192xbf16>
      %cst_65 = arith.constant 0.000000e+00 : bf16
      %110 = vector.broadcast %cst_65 : bf16 to vector<49x192xbf16>
      %111 = vector.shape_cast %52 : vector<49x1xi1> to vector<49x1xi1>
      %112 = vector.broadcast %111 : vector<49x1xi1> to vector<49x192xi1>
      %113 = arith.select %112, %109, %110 : vector<49x192xi1>, vector<49x192xbf16>
      %c6 = arith.constant 6 : index
      %c0_66 = arith.constant 0 : index
      %c0_67 = arith.constant 0 : index
      %114 = vector.load %arg5[%c6, %c0_66, %c0_67] : memref<9x192x48xbf16, #tpu.memory_space<vmem>>, vector<1x192x48xbf16>
      %115 = vector.shape_cast %114 : vector<1x192x48xbf16> to vector<192x48xbf16>
      %cst_68 = arith.constant dense<0.000000e+00> : vector<49x48xf32>
      %116 = tpu.matmul %113, %115, %cst_68 {dimension_numbers = #tpu.dot_dimension_numbers<[1], [0], [0], [1], [0, 0, 1, 1], [], []>} : vector<49x192xbf16>, vector<192x48xbf16>, vector<49x48xf32> -> vector<49x48xf32>
      %117 = arith.addf %107, %116 : vector<49x48xf32>
      %c15 = arith.constant 15 : index
      %c0_69 = arith.constant 0 : index
      %118 = vector.load %arg8[%c15, %c0_69] : memref<72x192xf32, #tpu.memory_space<vmem>>, vector<49x192xf32>
      %119 = arith.truncf %118 : vector<49x192xf32> to vector<49x192xbf16>
      %c7_70 = arith.constant 7 : index
      %c0_71 = arith.constant 0 : index
      %c0_72 = arith.constant 0 : index
      %120 = vector.load %arg5[%c7_70, %c0_71, %c0_72] : memref<9x192x48xbf16, #tpu.memory_space<vmem>>, vector<1x192x48xbf16>
      %121 = vector.shape_cast %120 : vector<1x192x48xbf16> to vector<192x48xbf16>
      %cst_73 = arith.constant dense<0.000000e+00> : vector<49x48xf32>
      %122 = tpu.matmul %119, %121, %cst_73 {dimension_numbers = #tpu.dot_dimension_numbers<[1], [0], [0], [1], [0, 0, 1, 1], [], []>} : vector<49x192xbf16>, vector<192x48xbf16>, vector<49x48xf32> -> vector<49x48xf32>
      %123 = arith.addf %117, %122 : vector<49x48xf32>
      %c16 = arith.constant 16 : index
      %c0_74 = arith.constant 0 : index
      %124 = vector.load %arg8[%c16, %c0_74] : memref<72x192xf32, #tpu.memory_space<vmem>>, vector<49x192xf32>
      %125 = arith.truncf %124 : vector<49x192xf32> to vector<49x192xbf16>
      %cst_75 = arith.constant 0.000000e+00 : bf16
      %126 = vector.broadcast %cst_75 : bf16 to vector<49x192xbf16>
      %127 = vector.shape_cast %54 : vector<49x1xi1> to vector<49x1xi1>
      %128 = vector.broadcast %127 : vector<49x1xi1> to vector<49x192xi1>
      %129 = arith.select %128, %125, %126 : vector<49x192xi1>, vector<49x192xbf16>
      %c8_76 = arith.constant 8 : index
      %c0_77 = arith.constant 0 : index
      %c0_78 = arith.constant 0 : index
      %130 = vector.load %arg5[%c8_76, %c0_77, %c0_78] : memref<9x192x48xbf16, #tpu.memory_space<vmem>>, vector<1x192x48xbf16>
      %131 = vector.shape_cast %130 : vector<1x192x48xbf16> to vector<192x48xbf16>
      %cst_79 = arith.constant dense<0.000000e+00> : vector<49x48xf32>
      %132 = tpu.matmul %129, %131, %cst_79 {dimension_numbers = #tpu.dot_dimension_numbers<[1], [0], [0], [1], [0, 0, 1, 1], [], []>} : vector<49x192xbf16>, vector<192x48xbf16>, vector<49x48xf32> -> vector<49x48xf32>
      %133 = arith.addf %123, %132 : vector<49x48xf32>
      %c0_80 = arith.constant 0 : index
      %c0_81 = arith.constant 0 : index
      %134 = vector.load %arg6[%c0_80, %c0_81] : memref<49x48xf32, #tpu.memory_space<vmem>>, vector<49x48xf32>
      tpu.vector_store %arg6[%c0_80, %c0_81], %133 {strides = array<i32>} : memref<49x48xf32, #tpu.memory_space<vmem>>, vector<49x48xf32>,
    } else {
    }
    return
  }
  func.func @transform_0(%arg0: i32) -> (i32, i32) {
    %c0_i32 = arith.constant 0 : i32
    %c0_i32_0 = arith.constant 0 : i32
    return %c0_i32, %arg0 : i32, i32
  }
  func.func @transform_1(%arg0: i32) -> (i32, i32) {
    %c0_i32 = arith.constant 0 : i32
    %c0_i32_0 = arith.constant 0 : i32
    return %arg0, %c0_i32 : i32, i32
  }
  func.func @transform_2(%arg0: i32) -> (i32, i32) {
    %c0_i32 = arith.constant 0 : i32
    %c0_i32_0 = arith.constant 0 : i32
    %c0_i32_1 = arith.constant 0 : i32
    return %c0_i32, %c0_i32_0 : i32, i32
  }
  func.func @transform_3(%arg0: i32) -> (i32, i32) {
    %c0_i32 = arith.constant 0 : i32
    %c0_i32_0 = arith.constant 0 : i32
    %c0_i32_1 = arith.constant 0 : i32
    return %c0_i32, %c0_i32_0 : i32, i32
  }
  func.func @transform_4(%arg0: i32) -> (i32, i32, i32) {
    %c0_i32 = arith.constant 0 : i32
    %c0_i32_0 = arith.constant 0 : i32
    %c0_i32_1 = arith.constant 0 : i32
    %c0_i32_2 = arith.constant 0 : i32
    return %c0_i32, %c0_i32_0, %c0_i32_1 : i32, i32, i32
  }
  func.func @transform_5(%arg0: i32) -> (i32, i32) {
    %c0_i32 = arith.constant 0 : i32
    %c0_i32_0 = arith.constant 0 : i32
    %c0_i32_1 = arith.constant 0 : i32
    return %c0_i32, %c0_i32_0 : i32, i32
  }
}

</mosaic_0001>

<bundles_post_ra>
// kernel: model_forward.1
= control target key start
LH: loop header
LB: loop body
LE: loop exit
PB: predicated region body
PF: predicated region fallthrough
CT: control target
= control target key end

     0   :  { %s5605_s18 = smov 0   ;;  %s5607_s19 = smov 0   ;;  %s7848_s0 = inlined_call_operand.vmem [shape: bf16[49,1920], index: 0, kind: input, shape index: {}]   ;;  %s7849_s1 = inlined_call_operand.vmem [shape: bf16[1920,192], index: 1, kind: input, shape index: {}]   ;;  %s7850_s2 = inlined_call_operand.vmem [shape: f32[1,192], index: 2, kind: input, shape index: {}]   ;;  %s7851_s3 = inlined_call_operand.vmem [shape: f32[1,192], index: 3, kind: input, shape index: {}]   ;;  %s7852_s4 = inlined_call_operand.vmem [shape: bf16[9,192,48], index: 4, kind: input, shape index: {}]   ;;  %s7853_s5 = inlined_call_operand.vmem [shape: f32[49,48], index: 5, kind: output, shape index: {}]  }
   0x1   :  { %s5609_s20 = smov 0  }
   0x2 LB: > { %s5621_s21 = sadd.s32 4294967295, %s5569_s20   ;;  %s5624_s22 = sadd.s32 1, %s5569_s20   ;;  %s5569_s20 = sphi %s5609_s20, %s8067_s20   ;;  %s5565_s19 = sphi %s5607_s19, %s8066_s19   ;;  %s5561_s18 = sphi %s5605_s18, %s8065_s18  }
   0x3   : > { %s19_s23 = ssub.s32 %s5569_s20, %s5624_s22  ;;  %s22_s24 = sadd.s32 1, %s5565_s19 }
   0x4   : > { %p20_p0 = scmp.eq.s32.totalorder %s19_s23, 0  ;;  %p29_p1 = scmp.ne.s32.totalorder %s5565_s19, %s5561_s18 }
   0x5   : > { %p30_p2 = scmp.eq.s32.totalorder %s5569_s20, 0  ;;  %p4216_p4 = scmp.ge.s32.totalorder %s5569_s20, 3 }
   0x6   : > { %s5633_s25 = scalar_select %p20_p0, %s5565_s19, %s22_s24  }
   0x7   : > { %p31_p3 = por %p30_p2, %p29_p1  ;;  %174 = sbr.rel (%p4216_p4) target bundleno = 38 (0x26), region = 28 }
   0xc   : > { %177 = sbr.rel (!%p31_p3) target bundleno = 38 (0x26), region = 32  ;;  %s179_s26 = sand.u32 (%p31_p3), 1, %s5565_s19  }
   0xd   : > { %s5279_s27 = smul.u32 (%p31_p3), 20, %s5569_s20 }
   0xe   : > { %s5508_s28 = smul.u32 (%p31_p3), 140, %s179_s26 }
   0xf   : > { %s5641_s6 = scalar_lea.vmem (%p31_p3), %s7848_s0, %s5279_s27 }
  0x10   : > { %v199_v0 = vld [vmem:[%s5641_s6] sm:$0xff] (%p31_p3)  ;;  %v201_v1 = vld [vmem:[%s5641_s6 + $0x8] sm:$0xff] (%p31_p3)  ;;  %s5646_s7 = scalar_lea.vmem (%p31_p3), [#allocation4], %s5508_s28  ;;  %v207_v4 = vld [vmem:[%s5641_s6 + $0x78] sm:$0xff] (%p31_p3) }
  0x11   : > { %v203_v2 = vld [vmem:[%s5641_s6 + $0x3c] sm:$0xff]  ;;  %200 = vst [vmem:[%s5646_s7] sm:$0xff] %v199_v0  ;;  %v205_v3 = vld [vmem:[%s5641_s6 + $0x44] sm:$0xff]  ;;  %v211_v6 = vld [vmem:[%s5641_s6 + $0xb4] sm:$0xff] }
  0x12   : > { %202 = vst [vmem:[%s5646_s7 + $0x8] sm:$0xff] %v201_v1  ;;  %v209_v5 = vld [vmem:[%s5641_s6 + $0x80] sm:$0xff]  ;;  %v215_v8 = vld [vmem:[%s5641_s6 + $0xf0] sm:$0xff]  ;;  %v217_v9 = vld [vmem:[%s5641_s6 + $0xf8] sm:$0xff] }
  0x13   : > { %204 = vst [vmem:[%s5646_s7 + $0x14] sm:$0xff] %v203_v2  ;;  %v213_v7 = vld [vmem:[%s5641_s6 + $0xbc] sm:$0xff]  ;;  %v219_v10 = vld [vmem:[%s5641_s6 + $0x12c] sm:$0xff]  ;;  %v221_v11 = vld [vmem:[%s5641_s6 + $0x134] sm:$0xff] }
  0x14   : > { %206 = vst [vmem:[%s5646_s7 + $0x1c] sm:$0xff] %v205_v3  ;;  %v223_v12 = vld [vmem:[%s5641_s6 + $0x168] sm:$0xff]  ;;  %v225_v13 = vld [vmem:[%s5641_s6 + $0x170] sm:$0xff]  ;;  %v4224_v17 = vld [vmem:[%s5641_s6 + $0xc4] sm:$0xf] }
  0x15   : > { %208 = vst [vmem:[%s5646_s7 + $0x28] sm:$0xff] %v207_v4  ;;  %v4218_v14 = vld [vmem:[%s5641_s6 + $0x10] sm:$0xf]  ;;  %v4220_v15 = vld [vmem:[%s5641_s6 + $0x4c] sm:$0xf] }
  0x16   : > { %210 = vst [vmem:[%s5646_s7 + $0x30] sm:$0xff] %v209_v5  ;;  %v4222_v16 = vld [vmem:[%s5641_s6 + $0x88] sm:$0xf]  ;;  %v4226_v18 = vld [vmem:[%s5641_s6 + $0x100] sm:$0xf] }
  0x17   : > { %212 = vst [vmem:[%s5646_s7 + $0x3c] sm:$0xff] %v211_v6  ;;  %v4228_v19 = vld [vmem:[%s5641_s6 + $0x13c] sm:$0xf]  ;;  %v4230_v20 = vld [vmem:[%s5641_s6 + $0x178] sm:$0xf] }
  0x18   : > { %214 = vst [vmem:[%s5646_s7 + $0x44] sm:$0xff] %v213_v7 }
  0x19   : > { %216 = vst [vmem:[%s5646_s7 + $0x50] sm:$0xff] %v215_v8 }
  0x1a   : > { %218 = vst [vmem:[%s5646_s7 + $0x58] sm:$0xff] %v217_v9 }
  0x1b   : > { %220 = vst [vmem:[%s5646_s7 + $0x64] sm:$0xff] %v219_v10 }
  0x1c   : > { %222 = vst [vmem:[%s5646_s7 + $0x6c] sm:$0xff] %v221_v11 }
  0x1d   : > { %224 = vst [vmem:[%s5646_s7 + $0x78] sm:$0xff] %v223_v12 }
  0x1e   : > { %226 = vst [vmem:[%s5646_s7 + $0x80] sm:$0xff] %v225_v13 }
  0x1f   : > { %4219 = vst [vmem:[%s5646_s7 + $0x10] sm:$0xf] %v4218_v14 }
  0x20   : > { %4221 = vst [vmem:[%s5646_s7 + $0x24] sm:$0xf] %v4220_v15 }
  0x21   : > { %4223 = vst [vmem:[%s5646_s7 + $0x38] sm:$0xf] %v4222_v16 }
  0x22   : > { %4225 = vst [vmem:[%s5646_s7 + $0x4c] sm:$0xf] %v4224_v17 }
  0x23   : > { %4227 = vst [vmem:[%s5646_s7 + $0x60] sm:$0xf] %v4226_v18 }
  0x24   : > { %4229 = vst [vmem:[%s5646_s7 + $0x74] sm:$0xf] %v4228_v19 }
  0x25   : > { %4231 = vst [vmem:[%s5646_s7 + $0x88] sm:$0xf] %v4230_v20 }
  0x26 PF: > { %p4232_p5 = scmp.ge.s32.totalorder %s5569_s20, 1  ;;  %p263_p6 = scmp.lt.s32.totalorder %s5569_s20, 4 }
  0x28   : > { %p264_p7 = pnand %p4232_p5, %p263_p6 }
  0x29   : > { %s270_s8 = sand.u32 (!%p264_p7), 1, %s5561_s18   ;;  %s299_s9 = smul.u32 (!%p264_p7), 80, %s5621_s21 }
  0x2a   : > { %267 = sbr.rel (%p264_p7) target bundleno = 921 (0x399), region = 62  ;;  %p4235_p9 = scmp.ne.s32.totalorder (!%p264_p7), %s5621_s21, 0 }
  0x2b   : > { %s5509_s10 = smul.u32 (!%p264_p7), 140, %s270_s8  ;;  %p300_p8 = scmp.lt.s32.totalorder (!%p264_p7), %s299_s9, 239 }
  0x2d   : > { %s5696_s15 = scalar_lea.vmem (!%p264_p7), [#allocation4], %s5509_s10 }
  0x2f   : > { %s8069_s9 = smov (!%p300_p8, %s299_s9), 239  ;;  %312 = sbr.rel (%p4235_p9) target bundleno = 67 (0x43), region = 70 }
  0x30   : > { %s5280_s11 = sshll.u32 %s8069_s9, 3 }
  0x31   : > { %s5694_s14 = scalar_lea.vmem %s7849_s1, %s5280_s11 }
  0x34   : > { %v5571_v21 = vmov 0.0   ;;  %vm314_vm0 = vcmask 523264   ;;  %vm327_vm1 = vcmask 516096  }
  0x35   : > { %313 = vst [vmem:[#allocation2] sm:$0xff] %v5571_v21 }
  0x36   : > { %316 = vst [vmem:[#allocation2 + $0x10] sm:$0xff] %v5571_v21 }
  0x37   : > { %318 = vst [vmem:[#allocation2 + $0x20] sm:$0xff] %v5571_v21 }
  0x38   : > { %320 = vst [vmem:[#allocation2 + $0x30] sm:$0xff] %v5571_v21 }
  0x39   : > { %322 = vst [vmem:[#allocation2 + $0x40] sm:$0xff] %v5571_v21 }
  0x3a   : > { %324 = vst [vmem:[#allocation2 + $0x50] sm:$0xff] %v5571_v21 }
  0x3b   : > { %326 = vst [vmem:[#allocation2 + $0x60] sm:$0x1] %v5571_v21 }
  0x3c   : > { %315 = vst.msk [vmem:[#allocation2 + $0x8] sm:$0xff] %vm314_vm0, %v5571_v21 }
  0x3d   : > { %317 = vst.msk [vmem:[#allocation2 + $0x18] sm:$0xff] %vm314_vm0, %v5571_v21 }
  0x3e   : > { %319 = vst.msk [vmem:[#allocation2 + $0x28] sm:$0xff] %vm314_vm0, %v5571_v21 }
  0x3f   : > { %321 = vst.msk [vmem:[#allocation2 + $0x38] sm:$0xff] %vm314_vm0, %v5571_v21 }
  0x40   : > { %323 = vst.msk [vmem:[#allocation2 + $0x48] sm:$0xff] %vm314_vm0, %v5571_v21 }
  0x41   : > { %325 = vst.msk [vmem:[#allocation2 + $0x58] sm:$0xff] %vm314_vm0, %v5571_v21 }
  0x42   : > { %328 = vst.msk [vmem:[#allocation2 + $0x68] sm:$0x1] %vm327_vm1, %v5571_v21 }
  0x43 PF: > { %v4354_v22 = vld [vmem:[%s5694_s14 + $0x70] sm:$0xf]  ;;  %v5311_v23 = vld [vmem:[%s5694_s14 + $0x74] sm:$0xf0]  ;;  %v4346_v27 = vld [vmem:[%s5694_s14 + $0x60] sm:$0xf] }
  0x44   : > { %v4418_v24 = vld [vmem:[%s5694_s14 + $0xf0] sm:$0xf]  ;;  %v4355_v25 = vor.u32 %v5311_v23, %v4354_v22  ;;  %v5327_v26 = vld [vmem:[%s5694_s14 + $0xf4] sm:$0xf0]  ;;  %v5309_v28 = vld [vmem:[%s5694_s14 + $0x64] sm:$0xf0] }
  0x45   : > { %v4419_v29 = vor.u32 %v5327_v26, %v4418_v24  ;;  %v4410_v30 = vld [vmem:[%s5694_s14 + $0xe0] sm:$0xf]  ;;  %v5325_v31 = vld [vmem:[%s5694_s14 + $0xe4] sm:$0xf0]  ;;  %v4347_v32 = vor.u32 %v5309_v28, %v4346_v27  ;;  %v4338_v34 = vld [vmem:[%s5694_s14 + $0x50] sm:$0xf] }
  0x46   : > { %5484 = vmatpush.bf16.msra.mxu2 %v4355_v25  ;;  %940 = vmatpush.bf16.msra.mxu0 %v4355_v25  ;;  %v4411_v33 = vor.u32 %v5325_v31, %v4410_v30  ;;  %v5307_v35 = vld [vmem:[%s5694_s14 + $0x54] sm:$0xf0]  ;;  %v4402_v36 = vld [vmem:[%s5694_s14 + $0xd0] sm:$0xf]  ;;  %v4330_v40 = vld [vmem:[%s5694_s14 + $0x40] sm:$0xf] }
  0x47   : > { %5492 = vmatpush.bf16.msra.mxu3 %v4419_v29  ;;  %968 = vmatpush.bf16.msra.mxu1 %v4419_v29  ;;  %v5323_v37 = vld [vmem:[%s5694_s14 + $0xd4] sm:$0xf0]  ;;  %v4339_v38 = vor.u32 %v5307_v35, %v4338_v34  ;;  %v5305_v41 = vld [vmem:[%s5694_s14 + $0x44] sm:$0xf0]  ;;  %v4394_v42 = vld [vmem:[%s5694_s14 + $0xc0] sm:$0xf] }
  0x48   : > { %v4403_v39 = vor.u32 %v5323_v37, %v4402_v36  ;;  %v5321_v43 = vld [vmem:[%s5694_s14 + $0xc4] sm:$0xf0]  ;;  %v4331_v44 = vor.u32 %v5305_v41, %v4330_v40  ;;  %v4322_v46 = vld [vmem:[%s5694_s14 + $0x30] sm:$0xf]  ;;  %v5303_v47 = vld [vmem:[%s5694_s14 + $0x34] sm:$0xf0] }
  0x49   : > { %v4395_v45 = vor.u32 %v5321_v43, %v4394_v42  ;;  %v4386_v48 = vld [vmem:[%s5694_s14 + $0xb0] sm:$0xf]  ;;  %v5319_v49 = vld [vmem:[%s5694_s14 + $0xb4] sm:$0xf0]  ;;  %v4323_v50 = vor.u32 %v5303_v47, %v4322_v46  ;;  %v4314_v52 = vld [vmem:[%s5694_s14 + $0x20] sm:$0xf] }
  0x4a   : > { %5485 = vmatpush.bf16.msra.mxu2 %v4347_v32  ;;  %941 = vmatpush.bf16.msra.mxu0 %v4347_v32  ;;  %v4387_v51 = vor.u32 %v5319_v49, %v4386_v48  ;;  %v5301_v53 = vld [vmem:[%s5694_s14 + $0x24] sm:$0xf0]  ;;  %v4378_v54 = vld [vmem:[%s5694_s14 + $0xa0] sm:$0xf]  ;;  %v4306_v58 = vld [vmem:[%s5694_s14 + $0x10] sm:$0xf] }
  0x4b   : > { %5493 = vmatpush.bf16.msra.mxu3 %v4411_v33  ;;  %969 = vmatpush.bf16.msra.mxu1 %v4411_v33  ;;  %v5317_v55 = vld [vmem:[%s5694_s14 + $0xa4] sm:$0xf0]  ;;  %v4315_v56 = vor.u32 %v5301_v53, %v4314_v52  ;;  %v5299_v59 = vld [vmem:[%s5694_s14 + $0x14] sm:$0xf0]  ;;  %v4370_v60 = vld [vmem:[%s5694_s14 + $0x90] sm:$0xf] }
  0x4c   : > { %v4379_v57 = vor.u32 %v5317_v55, %v4378_v54  ;;  %v5315_v61 = vld [vmem:[%s5694_s14 + $0x94] sm:$0xf0]  ;;  %v4307_v62 = vor.u32 %v5299_v59, %v4306_v58  ;;  %v4298_v63 = vld [vmem:[%s5694_s14] sm:$0xf]  ;;  %v5297_v1 = vld [vmem:[%s5694_s14 + $0x4] sm:$0xf0] }
  0x4d   : > { %v4371_v0 = vor.u32 %v5315_v61, %v4370_v60  ;;  %v4362_v2 = vld [vmem:[%s5694_s14 + $0x80] sm:$0xf]  ;;  %v5313_v3 = vld [vmem:[%s5694_s14 + $0x84] sm:$0xf0]  ;;  %v4278_v4 = vld [vmem:[%s5696_s15 + $0x50] sm:$0xf]  ;;  %v4299_v12 = vor.u32 %v5297_v1, %v4298_v63 }
  0x4e   : > { %5486 = vmatpush.bf16.msra.mxu2 %v4339_v38  ;;  %942 = vmatpush.bf16.msra.mxu0 %v4339_v38  ;;  %v5293_v5 = vld [vmem:[%s5696_s15 + $0x60] sm:$0xf0]  ;;  %v5291_v7 = vld [vmem:[%s5696_s15 + $0x54] sm:$0xf]  ;;  %v4280_v8 = vld [vmem:[%s5696_s15 + $0x64] sm:$0xf0]  ;;  %v4363_v16 = vor.u32 %v5313_v3, %v4362_v2 }
  0x4f   : > { %5494 = vmatpush.bf16.msra.mxu3 %v4403_v39  ;;  %970 = vmatpush.bf16.msra.mxu1 %v4403_v39  ;;  %v4482_v6 = vld [vmem:[%s5694_s14 + $0x170] sm:$0xf]  ;;  %v5343_v9 = vld [vmem:[%s5694_s14 + $0x174] sm:$0xf0]  ;;  %v4238_v13 = vld [vmem:[%s5696_s15] sm:$0xf]  ;;  %v5748_v25 = vor.u32 %v5293_v5, %v4278_v4  ;;  %v5755_v30 = vor.u32 %v5291_v7, %v4280_v8 }
  0x50   : > { %v4546_v10 = vld [vmem:[%s5694_s14 + $0x1f0] sm:$0xf]  ;;  %v5359_v11 = vld [vmem:[%s5694_s14 + $0x1f4] sm:$0xf0]  ;;  %v5283_v14 = vld [vmem:[%s5696_s15 + $0x10] sm:$0xf0]  ;;  %v4483_v20 = vor.u32 %v5343_v9, %v4482_v6 }
  0x51   : > { %v5281_v15 = vld [vmem:[%s5696_s15 + $0x4] sm:$0xf]  ;;  %v4240_v17 = vld [vmem:[%s5696_s15 + $0x14] sm:$0xf0]  ;;  %v4547_v21 = vor.u32 %v5359_v11, %v4546_v10  ;;  %v5310_v22 = vld [vmem:[%s5694_s14 + $0x74] sm:$0xf]  ;;  %v5750_v26 = vor.u32 %v5283_v14, %v4238_v13 }
  0x52   : > { %5487 = vmatpush.bf16.msra.mxu2 %v4331_v44  ;;  %943 = vmatpush.bf16.msra.mxu0 %v4331_v44  ;;  %v4610_v18 = vld [vmem:[%s5694_s14 + $0x270] sm:$0xf]  ;;  %v5375_v19 = vld [vmem:[%s5694_s14 + $0x274] sm:$0xf0]  ;;  %v4356_v23 = vld [vmem:[%s5694_s14 + $0x78] sm:$0xf0]  ;;  %v5757_v31 = vor.u32 %v5281_v15, %v4240_v17 }
  0x53   : > { %5495 = vmatpush.bf16.msra.mxu3 %v4395_v45  ;;  %971 = vmatpush.bf16.msra.mxu1 %v4395_v45  ;;  %v4474_v24 = vld [vmem:[%s5694_s14 + $0x160] sm:$0xf]  ;;  %v5341_v27 = vld [vmem:[%s5694_s14 + $0x164] sm:$0xf0]  ;;  %v4611_v32 = vor.u32 %v5375_v19, %v4610_v18  ;;  %v4359_v33 = vor.u32 %v5310_v22, %v4356_v23  ;;  %v5308_v38 = vld [vmem:[%s5694_s14 + $0x64] sm:$0xf] }
  0x54   : > { %v4538_v28 = vld [vmem:[%s5694_s14 + $0x1e0] sm:$0xf]  ;;  %v5357_v29 = vld [vmem:[%s5694_s14 + $0x1e4] sm:$0xf0]  ;;  %v4475_v36 = vor.u32 %v5341_v27, %v4474_v24  ;;  %v4348_v39 = vld [vmem:[%s5694_s14 + $0x68] sm:$0xf0] }
  0x55   : > { %v4602_v34 = vld [vmem:[%s5694_s14 + $0x260] sm:$0xf]  ;;  %v5373_v35 = vld [vmem:[%s5694_s14 + $0x264] sm:$0xf0]  ;;  %v4539_v37 = vor.u32 %v5357_v29, %v4538_v28  ;;  %v4466_v40 = vld [vmem:[%s5694_s14 + $0x150] sm:$0xf]  ;;  %v4351_v45 = vor.u32 %v5308_v38, %v4348_v39 }
  0x56   : > { %5488 = vmatpush.bf16.msra.mxu2 %v4323_v50  ;;  %944 = vmatpush.bf16.msra.mxu0 %v4323_v50  ;;  %v5339_v41 = vld [vmem:[%s5694_s14 + $0x154] sm:$0xf0]  ;;  %v4530_v42 = vld [vmem:[%s5694_s14 + $0x1d0] sm:$0xf]  ;;  %v4603_v44 = vor.u32 %v5373_v35, %v4602_v34  ;;  %v5306_v50 = vld [vmem:[%s5694_s14 + $0x54] sm:$0xf] }
  0x57   : > { %5496 = vmatpush.bf16.msra.mxu3 %v4387_v51  ;;  %972 = vmatpush.bf16.msra.mxu1 %v4387_v51  ;;  %v5355_v43 = vld [vmem:[%s5694_s14 + $0x1d4] sm:$0xf0]  ;;  %v4594_v46 = vld [vmem:[%s5694_s14 + $0x250] sm:$0xf]  ;;  %v4467_v48 = vor.u32 %v5339_v41, %v4466_v40  ;;  %v4340_v51 = vld [vmem:[%s5694_s14 + $0x58] sm:$0xf0] }
  0x58   : > { %v5371_v47 = vld [vmem:[%s5694_s14 + $0x254] sm:$0xf0]  ;;  %v4531_v49 = vor.u32 %v5355_v43, %v4530_v42  ;;  %v4458_v52 = vld [vmem:[%s5694_s14 + $0x140] sm:$0xf]  ;;  %v5337_v53 = vld [vmem:[%s5694_s14 + $0x144] sm:$0xf0]  ;;  %v4343_v58 = vor.u32 %v5306_v50, %v4340_v51 }
  0x59   : > { %v4522_v54 = vld [vmem:[%s5694_s14 + $0x1c0] sm:$0xf]  ;;  %v5353_v55 = vld [vmem:[%s5694_s14 + $0x1c4] sm:$0xf0]  ;;  %v4459_v61 = vor.u32 %v5337_v53, %v4458_v52  ;;  %v5304_v63 = vld [vmem:[%s5694_s14 + $0x44] sm:$0xf] }
  0x5a   : > { %5489 = vmatpush.bf16.msra.mxu2 %v4315_v56  ;;  %945 = vmatpush.bf16.msra.mxu0 %v4315_v56  ;;  %v361_v56 = vld [vmem:[%s5696_s15 + $0x78] sm:$0x11]  ;;  %v4586_v59 = vld [vmem:[%s5694_s14 + $0x240] sm:$0xf]  ;;  %v4450_v1 = vld [vmem:[%s5694_s14 + $0x130] sm:$0xf] }
  0x5b   : > { %5497 = vmatpush.bf16.msra.mxu3 %v4379_v57  ;;  %973 = vmatpush.bf16.msra.mxu1 %v4379_v57  ;;  %v4595_v57 = vor.u32 %v5371_v47, %v4594_v46  ;;  %v5369_v60 = vld [vmem:[%s5694_s14 + $0x244] sm:$0xf0]  ;;  %v495_v2 = vunpack.c.l.b16 %v361_v56  ;;  %v5335_v3 = vld [vmem:[%s5694_s14 + $0x134] sm:$0xf0]  ;;  %v4514_v4 = vld [vmem:[%s5694_s14 + $0x1b0] sm:$0xf]  ;;  %v496_v6 = vunpack.c.h.b16 %v361_v56 }
  0x5c   : > { %v5351_v5 = vld [vmem:[%s5694_s14 + $0x1b4] sm:$0xf0]  ;;  %v4258_v7 = vld [vmem:[%s5696_s15 + $0x28] sm:$0xf]  ;;  %v5288_v8 = vld [vmem:[%s5696_s15 + $0x38] sm:$0xf0]  ;;  %v4587_v10 = vor.u32 %v5369_v60, %v4586_v59  ;;  %v4451_v15 = vor.u32 %v5335_v3, %v4450_v1 }
  0x5d   : > { %v5286_v9 = vld [vmem:[%s5696_s15 + $0x2c] sm:$0xf]  ;;  %v4578_v13 = vld [vmem:[%s5694_s14 + $0x230] sm:$0xf]  ;;  %v5302_v17 = vld [vmem:[%s5694_s14 + $0x34] sm:$0xf]  ;;  %v5804_v27 = vpack.c.b16 %v496_v6, %v496_v6 }
  0x5e   : > { %5490 = vmatpush.bf16.msra.mxu2 %v4307_v62  ;;  %946 = vmatpush.bf16.msra.mxu0 %v4307_v62  ;;  %v4523_v62 = vor.u32 %v5353_v55, %v4522_v54  ;;  %v5367_v14 = vld [vmem:[%s5694_s14 + $0x234] sm:$0xf0]  ;;  %v4324_v18 = vld [vmem:[%s5694_s14 + $0x38] sm:$0xf0]  ;;  %v4442_v19 = vld [vmem:[%s5694_s14 + $0x120] sm:$0xf] }
  0x5f   : > { %5498 = vmatpush.bf16.msra.mxu3 %v4371_v0  ;;  %974 = vmatpush.bf16.msra.mxu1 %v4371_v0  ;;  %v4332_v0 = vld [vmem:[%s5694_s14 + $0x48] sm:$0xf0]  ;;  %v5333_v22 = vld [vmem:[%s5694_s14 + $0x124] sm:$0xf0]  ;;  %v4506_v23 = vld [vmem:[%s5694_s14 + $0x1a0] sm:$0xf]  ;;  %v4579_v29 = vor.u32 %v5367_v14, %v4578_v13 }
  0x60   : > { %v4335_v11 = vor.u32 %v5304_v63, %v4332_v0  ;;  %v5349_v24 = vld [vmem:[%s5694_s14 + $0x1a4] sm:$0xf0]  ;;  %v4443_v35 = vor.u32 %v5333_v22, %v4442_v19  ;;  %v4316_v38 = vld [vmem:[%s5694_s14 + $0x28] sm:$0xf0]  ;;  %v4434_v39 = vld [vmem:[%s5694_s14 + $0x110] sm:$0xf] }
  0x61   : > { %v5365_v34 = vld [vmem:[%s5694_s14 + $0x224] sm:$0xf0]  ;;  %v5331_v40 = vld [vmem:[%s5694_s14 + $0x114] sm:$0xf0]  ;;  %v4498_v41 = vld [vmem:[%s5694_s14 + $0x190] sm:$0xf] }
  0x62   : > { %5491 = vmatpush.bf16.msra.mxu2 %v4299_v12  ;;  %947 = vmatpush.bf16.msra.mxu0 %v4299_v12  ;;  %v4260_v12 = vld [vmem:[%s5696_s15 + $0x3c] sm:$0xf0]  ;;  %v5347_v42 = vld [vmem:[%s5694_s14 + $0x194] sm:$0xf0]  ;;  %v5298_v47 = vld [vmem:[%s5694_s14 + $0x14] sm:$0xf] }
  0x63   : > { %5499 = vmatpush.bf16.msra.mxu3 %v4363_v16  ;;  %975 = vmatpush.bf16.msra.mxu1 %v4363_v16  ;;  %v4515_v16 = vor.u32 %v5351_v5, %v4514_v4  ;;  %v5806_v28 = vor.u32 %v5286_v9, %v4260_v12  ;;  %v5363_v46 = vld [vmem:[%s5694_s14 + $0x214] sm:$0xf0]  ;;  %v4308_v50 = vld [vmem:[%s5694_s14 + $0x18] sm:$0xf0]  ;;  %v4426_v51 = vld [vmem:[%s5694_s14 + $0x100] sm:$0xf] }
  0x64   : > { %v5329_v52 = vld [vmem:[%s5694_s14 + $0x104] sm:$0xf0]  ;;  %v4490_v53 = vld [vmem:[%s5694_s14 + $0x180] sm:$0xf]  ;;  %v5326_v55 = vld [vmem:[%s5694_s14 + $0xf4] sm:$0xf] }
  0x65   : > { %958 = vmatmul.bf16.vlgmr.msra.gmra.mxu2 %v5748_v25  ;;  %948 = vmatmul.bf16.vlgmr.msra.gmra.mxu0 %v5750_v26  ;;  %v5345_v54 = vld [vmem:[%s5694_s14 + $0x184] sm:$0xf0]  ;;  %v4554_v56 = vld [vmem:[%s5694_s14 + $0x200] sm:$0xf]  ;;  %v4484_v59 = vld [vmem:[%s5694_s14 + $0x178] sm:$0xf0]  ;;  %v4427_v1 = vor.u32 %v5329_v52, %v4426_v51 }
  0x66   : > { %996 = vmatpush.bf16.msrb.mxu2 %v4483_v20  ;;  %986 = vmatmul.bf16.vlgmr.msra.gmra.mxu3 %v5755_v30  ;;  %v5797_v20 = vpack.c.b16 %v495_v2, %v495_v2  ;;  %v5296_v63 = vld [vmem:[%s5694_s14 + $0x4] sm:$0xf]  ;;  %v4300_v0 = vld [vmem:[%s5694_s14 + $0x8] sm:$0xf0]  ;;  %v4491_v2 = vor.u32 %v5345_v54, %v4490_v53  ;;  %v4246_v3 = vld [vmem:[%s5696_s15 + $0x8] sm:$0xf] }
  0x67   : > { %1024 = vmatpush.bf16.msrb.mxu3 %v4547_v21  ;;  %976 = vmatmul.bf16.vlgmr.msra.gmra.mxu1 %v5757_v31  ;;  %v5799_v21 = vor.u32 %v5288_v8, %v4258_v7  ;;  %v5284_v4 = vld [vmem:[%s5696_s15 + $0x18] sm:$0xf0]  ;;  %v5358_v5 = vld [vmem:[%s5694_s14 + $0x1f4] sm:$0xf]  ;;  %v5340_v12 = vld [vmem:[%s5694_s14 + $0x164] sm:$0xf] }
  0x68   : > { %1052 = vmatpush.bf16.msrb.mxu0 %v4611_v32  ;;  %1080 = vmatpush.bf16.msrb.mxu1 %v4359_v33  ;;  %v4327_v32 = vor.u32 %v5302_v17, %v4324_v18  ;;  %v4570_v33 = vld [vmem:[%s5694_s14 + $0x220] sm:$0xf]  ;;  %v4548_v8 = vld [vmem:[%s5694_s14 + $0x1f8] sm:$0xf0]  ;;  %v5374_v9 = vld [vmem:[%s5694_s14 + $0x274] sm:$0xf] }
  0x69   : > { %v4571_v43 = vor.u32 %v5365_v34, %v4570_v33  ;;  %v4476_v13 = vld [vmem:[%s5694_s14 + $0x168] sm:$0xf0]  ;;  %v4254_v17 = vld [vmem:[%s5696_s15 + $0x10] sm:$0xf]  ;;  %v5285_v18 = vld [vmem:[%s5696_s15 + $0x20] sm:$0xf0] }
  0x6a   : > { %997 = vmatpush.bf16.msrb.mxu2 %v4475_v36  ;;  %v4507_v36 = vor.u32 %v5349_v24, %v4506_v23  ;;  %v5324_v19 = vld [vmem:[%s5694_s14 + $0xe4] sm:$0xf]  ;;  %v4412_v22 = vld [vmem:[%s5694_s14 + $0xe8] sm:$0xf0]  ;;  %v4551_v23 = vor.u32 %v5358_v5, %v4548_v8  ;;  %v4479_v33 = vor.u32 %v5340_v12, %v4476_v13  ;;  %v5287_v12 = vld [vmem:[%s5696_s15 + $0x34] sm:$0xf] }
  0x6b   : > { %1025 = vmatpush.bf16.msrb.mxu3 %v4539_v37  ;;  %v5300_v37 = vld [vmem:[%s5694_s14 + $0x24] sm:$0xf]  ;;  %v4540_v34 = vld [vmem:[%s5694_s14 + $0x1e8] sm:$0xf0]  ;;  %vm7877_vm2 = vcmask 523264   ;;  %vm7873_vm3 = vcmask 516096  }
  0x6c   : > { %1053 = vmatpush.bf16.msrb.mxu0 %v4603_v44  ;;  %1081 = vmatpush.bf16.msrb.mxu1 %v4351_v45  ;;  %v4319_v44 = vor.u32 %v5300_v37, %v4316_v38  ;;  %v4562_v45 = vld [vmem:[%s5694_s14 + $0x210] sm:$0xf]  ;;  %v5858_v38 = vor.u32 %v5285_v18, %v4254_v17  ;;  %v5336_v51 = vld [vmem:[%s5694_s14 + $0x144] sm:$0xf]  ;;  %v4460_v52 = vld [vmem:[%s5694_s14 + $0x148] sm:$0xf0] }
  0x6d   : > { %v4563_v60 = vor.u32 %v5363_v46, %v4562_v45  ;;  %v5354_v46 = vld [vmem:[%s5694_s14 + $0x1d4] sm:$0xf]  ;;  %v5320_v54 = vld [vmem:[%s5694_s14 + $0xc4] sm:$0xf]  ;;  %v5290_v17 = vld [vmem:[%s5696_s15 + $0x48] sm:$0xf0] }
  0x6e   : > { %998 = vmatpush.bf16.msrb.mxu2 %v4467_v48  ;;  %v4435_v48 = vor.u32 %v5331_v40, %v4434_v39  ;;  %v5338_v39 = vld [vmem:[%s5694_s14 + $0x154] sm:$0xf]  ;;  %v4468_v40 = vld [vmem:[%s5694_s14 + $0x158] sm:$0xf0]  ;;  %v5332_v13 = vld [vmem:[%s5694_s14 + $0x124] sm:$0xf] }
  0x6f   : > { %1026 = vmatpush.bf16.msrb.mxu3 %v4531_v49  ;;  %v4499_v49 = vor.u32 %v5347_v42, %v4498_v41  ;;  %v4415_v41 = vor.u32 %v5324_v19, %v4412_v22  ;;  %v5322_v42 = vld [vmem:[%s5694_s14 + $0xd4] sm:$0xf]  ;;  %v5316_v19 = vld [vmem:[%s5694_s14 + $0xa4] sm:$0xf]  ;;  %v4380_v22 = vld [vmem:[%s5694_s14 + $0xa8] sm:$0xf0] }
  0x70   : > { %1054 = vmatpush.bf16.msrb.mxu0 %v4595_v57  ;;  %1082 = vmatpush.bf16.msrb.mxu1 %v4343_v58  ;;  %v4420_v57 = vld [vmem:[%s5694_s14 + $0xf8] sm:$0xf0]  ;;  %v5342_v58 = vld [vmem:[%s5694_s14 + $0x174] sm:$0xf]  ;;  %p4616_p10 = scmp.ne.s32.totalorder %s5621_s21, 2 }
  0x71   : > { %v4423_v6 = vor.u32 %v5326_v55, %v4420_v57  ;;  %v4487_v7 = vor.u32 %v5342_v58, %v4484_v59  ;;  %v4396_v55 = vld [vmem:[%s5694_s14 + $0xc8] sm:$0xf0]  ;;  %v5352_v58 = vld [vmem:[%s5694_s14 + $0x1c4] sm:$0xf]  ;;  %v4463_v59 = vor.u32 %v5336_v51, %v4460_v52 }
  0x72   : > { %999 = vmatpush.bf16.msrb.mxu2 %v4459_v61  ;;  %v4311_v61 = vor.u32 %v5298_v47, %v4308_v50  ;;  %v4471_v47 = vor.u32 %v5338_v39, %v4468_v40  ;;  %v4596_v50 = vld [vmem:[%s5694_s14 + $0x258] sm:$0xf0]  ;;  %v5314_v39 = vld [vmem:[%s5694_s14 + $0x94] sm:$0xf]  ;;  %v5312_v51 = vld [vmem:[%s5694_s14 + $0x84] sm:$0xf] }
  0x73   : > { %1027 = vmatpush.bf16.msrb.mxu3 %v4523_v62  ;;  %v5361_v62 = vld [vmem:[%s5694_s14 + $0x204] sm:$0xf0]  ;;  %v4372_v40 = vld [vmem:[%s5694_s14 + $0x98] sm:$0xf0]  ;;  %v4364_v52 = vld [vmem:[%s5694_s14 + $0x88] sm:$0xf0] }
  0x74   : > { %1055 = vmatpush.bf16.msrb.mxu0 %v4587_v10  ;;  %1083 = vmatpush.bf16.msrb.mxu1 %v4335_v11  ;;  %v4612_v10 = vld [vmem:[%s5694_s14 + $0x278] sm:$0xf0]  ;;  %v5282_v11 = vld [vmem:[%s5696_s15 + $0xc] sm:$0xf]  ;;  %v4555_v14 = vor.u32 %v5361_v62, %v4554_v56  ;;  %v5334_v62 = vld [vmem:[%s5694_s14 + $0x134] sm:$0xf] }
  0x75   : > { %963 = vmatmul.bf16.gmra.mxu2 %v5797_v20  ;;  %953 = vmatmul.bf16.gmra.mxu0 %v5799_v21  ;;  %v4615_v24 = vor.u32 %v5374_v9, %v4612_v10  ;;  %v4516_v9 = vld [vmem:[%s5694_s14 + $0x1b8] sm:$0xf0]  ;;  %v5366_v10 = vld [vmem:[%s5694_s14 + $0x234] sm:$0xf] }
  0x76   : > { %1000 = vmatpush.bf16.msrb.mxu2 %v4451_v15  ;;  %991 = vmatmul.bf16.gmra.mxu3 %v5804_v27  ;;  %v4303_v15 = vor.u32 %v5296_v63, %v4300_v0  ;;  %v4452_v63 = vld [vmem:[%s5694_s14 + $0x138] sm:$0xf0]  ;;  %v4399_v0 = vor.u32 %v5320_v54, %v4396_v55  ;;  %v5362_v54 = vld [vmem:[%s5694_s14 + $0x214] sm:$0xf] }
  0x77   : > { %1028 = vmatpush.bf16.msrb.mxu3 %v4515_v16  ;;  %981 = vmatmul.bf16.gmra.mxu1 %v5806_v28  ;;  %v4248_v16 = vld [vmem:[%s5696_s15 + $0x1c] sm:$0xf0]  ;;  %v4455_v8 = vor.u32 %v5334_v62, %v4452_v63  ;;  %v4564_v55 = vld [vmem:[%s5694_s14 + $0x218] sm:$0xf0]  ;;  %v5360_v63 = vld [vmem:[%s5694_s14 + $0x204] sm:$0xf] }
  0x78   : > { %1056 = vmatpush.bf16.msrb.mxu0 %v4579_v29  ;;  %1084 = vmatpush.bf16.msrb.mxu1 %v4327_v32  ;;  %v5356_v29 = vld [vmem:[%s5694_s14 + $0x1e4] sm:$0xf]  ;;  %v5851_v32 = vor.u32 %v5284_v4, %v4246_v3  ;;  %v5856_v37 = vor.u32 %v5282_v11, %v4248_v16  ;;  %v5318_v3 = vld [vmem:[%s5694_s14 + $0xb4] sm:$0xf]  ;;  %v4388_v4 = vld [vmem:[%s5694_s14 + $0xb8] sm:$0xf0] }
  0x79   : > { %v4580_v11 = vld [vmem:[%s5694_s14 + $0x238] sm:$0xf0]  ;;  %v4274_v16 = vld [vmem:[%s5696_s15 + $0x38] sm:$0xf]  ;;  %v4391_v18 = vor.u32 %v5318_v3, %v4388_v4  ;;  %v4492_v62 = vld [vmem:[%s5694_s14 + $0x188] sm:$0xf0] }
  0x7a   : > { %1001 = vmatpush.bf16.msrb.mxu2 %v4443_v35  ;;  %v5372_v35 = vld [vmem:[%s5694_s14 + $0x264] sm:$0xf]  ;;  %v5292_v3 = vld [vmem:[%s5696_s15 + $0x5c] sm:$0xf] }
  0x7b   : > { %1029 = vmatpush.bf16.msrb.mxu3 %v4507_v36  ;;  %v4604_v36 = vld [vmem:[%s5694_s14 + $0x268] sm:$0xf0] }
  0x7c   : > { %1057 = vmatpush.bf16.msrb.mxu0 %v4571_v43  ;;  %1085 = vmatpush.bf16.msrb.mxu1 %v4319_v44  ;;  %v4404_v43 = vld [vmem:[%s5694_s14 + $0xd8] sm:$0xf0]  ;;  %v4543_v44 = vor.u32 %v5356_v29, %v4540_v34  ;;  %v4607_v45 = vor.u32 %v5372_v35, %v4604_v36  ;;  %v5902_v35 = vor.u32 %v5290_v17, %v4274_v16 }
  0x7d   : > { %v4407_v53 = vor.u32 %v5322_v42, %v4404_v43  ;;  %v4383_v36 = vor.u32 %v5316_v19, %v4380_v22  ;;  %v5348_v42 = vld [vmem:[%s5694_s14 + $0x1a4] sm:$0xf]  ;;  %v4508_v43 = vld [vmem:[%s5694_s14 + $0x1a8] sm:$0xf0] }
  0x7e   : > { %1002 = vmatpush.bf16.msrb.mxu2 %v4435_v48  ;;  %v4532_v48 = vld [vmem:[%s5694_s14 + $0x1d8] sm:$0xf0] }
  0x7f   : > { %1030 = vmatpush.bf16.msrb.mxu3 %v4499_v49  ;;  %v5370_v49 = vld [vmem:[%s5694_s14 + $0x254] sm:$0xf]  ;;  %v4535_v56 = vor.u32 %v5354_v46, %v4532_v48  ;;  %v4572_v46 = vld [vmem:[%s5694_s14 + $0x228] sm:$0xf0]  ;;  %v4436_v48 = vld [vmem:[%s5694_s14 + $0x118] sm:$0xf0] }
  0x80   : > { %1058 = vmatpush.bf16.msrb.mxu0 %v4563_v60  ;;  %1086 = vmatpush.bf16.msrb.mxu1 %v4311_v61  ;;  %v4599_v57 = vor.u32 %v5370_v49, %v4596_v50  ;;  %v4524_v60 = vld [vmem:[%s5694_s14 + $0x1c8] sm:$0xf0]  ;;  %v5368_v61 = vld [vmem:[%s5694_s14 + $0x244] sm:$0xf] }
  0x81   : > { %v4527_v5 = vor.u32 %v5352_v58, %v4524_v60  ;;  %v4567_v58 = vor.u32 %v5362_v54, %v4564_v55  ;;  %v4428_v60 = vld [vmem:[%s5694_s14 + $0x108] sm:$0xf0]  ;;  %v331_v55 = vld [vmem:[#allocation2 + $0x10] sm:$0xff] }
  0x82   : > { %1003 = vmatpush.bf16.msrb.mxu2 %v4427_v1  ;;  %v4266_v1 = vld [vmem:[%s5696_s15 + $0x30] sm:$0xf] }
  0x83   : > { %1031 = vmatpush.bf16.msrb.mxu3 %v4491_v2  ;;  %v5289_v2 = vld [vmem:[%s5696_s15 + $0x40] sm:$0xf0] }
  0x84   : > { %1059 = vmatpush.bf16.msrb.mxu0 %v4555_v14  ;;  %1087 = vmatpush.bf16.msrb.mxu1 %v4303_v15  ;;  %v4444_v14 = vld [vmem:[%s5694_s14 + $0x128] sm:$0xf0]  ;;  %v4268_v15 = vld [vmem:[%s5696_s15 + $0x44] sm:$0xf0]  ;;  %v5898_v29 = vor.u32 %v5289_v2, %v4266_v1  ;;  %v4286_v1 = vld [vmem:[%s5696_s15 + $0x58] sm:$0xf] }
  0x85   : > { %1004 = vmatmul.bf16.vlgmr.msrb.gmra.mxu2 %v5851_v32  ;;  %v5900_v34 = vor.u32 %v5287_v12, %v4268_v15  ;;  %v5294_v2 = vld [vmem:[%s5696_s15 + $0x68] sm:$0xf0]  ;;  %v362_v12 = vld [vmem:[%s5696_s15 + $0x80] sm:$0x11] }
  0x86   : > { %1108 = vmatpush.bf16.msra.mxu2 %v4423_v6  ;;  %1032 = vmatmul.bf16.vlgmr.msrb.gmra.mxu3 %v5856_v37  ;;  %v498_v15 = vunpack.c.h.b16 %v362_v12 }
  0x87   : > { %1136 = vmatpush.bf16.msra.mxu3 %v4487_v7  ;;  %1060 = vmatmul.bf16.vlgmr.msrb.gmra.mxu0 %v5858_v38  ;;  %v5350_v7 = vld [vmem:[%s5694_s14 + $0x1b4] sm:$0xf] }
  0x88   : > { %1164 = vmatpush.bf16.msra.mxu0 %v4551_v23  ;;  %1192 = vmatpush.bf16.msra.mxu1 %v4615_v24  ;;  %v4519_v23 = vor.u32 %v5350_v7, %v4516_v9  ;;  %v4583_v24 = vor.u32 %v5366_v10, %v4580_v11  ;;  %v5295_v7 = vld [vmem:[%s5696_s15 + $0x70] sm:$0xf0]  ;;  %v4287_v9 = vor.u32 %v5294_v2, %v4286_v1 }
  0x89   : > { %1088 = vmatmul.bf16.vlgmr.msrb.gmra.mxu1 %v5750_v26  ;;  %v4588_v26 = vld [vmem:[%s5694_s14 + $0x248] sm:$0xf0] }
  0x8a   : > { %1109 = vmatpush.bf16.msra.mxu2 %v4415_v41  ;;  %v4591_v6 = vor.u32 %v5368_v61, %v4588_v26  ;;  %v4375_v41 = vor.u32 %v5314_v39, %v4372_v40  ;;  %v5344_v61 = vld [vmem:[%s5694_s14 + $0x184] sm:$0xf] }
  0x8b   : > { %1137 = vmatpush.bf16.msra.mxu3 %v4479_v33  ;;  %v4447_v33 = vor.u32 %v5332_v13, %v4444_v14  ;;  %v4495_v4 = vor.u32 %v5344_v61, %v4492_v62  ;;  %v363_v13 = vld [vmem:[%s5696_s15 + $0x88] sm:$0x1]  ;;  %v497_v14 = vunpack.c.l.b16 %v362_v12 }
  0x8c   : > { %1165 = vmatpush.bf16.msra.mxu0 %v4543_v44  ;;  %1193 = vmatpush.bf16.msra.mxu1 %v4607_v45  ;;  %v5364_v44 = vld [vmem:[%s5694_s14 + $0x224] sm:$0xf]  ;;  %v4511_v45 = vor.u32 %v5348_v42, %v4508_v43  ;;  %v499_v16 = vunpack.c.l.b16 %v363_v13 }
  0x8d   : > { %v4575_v49 = vor.u32 %v5364_v44, %v4572_v46  ;;  %v517_v17 = vpack.c.b16 %v497_v14, %v497_v14  ;;  %v329_v46 = vld [vmem:[#allocation2] sm:$0xff] }
  0x8e   : > { %1110 = vmatpush.bf16.msra.mxu2 %v4407_v53  ;;  %v4500_v53 = vld [vmem:[%s5694_s14 + $0x198] sm:$0xf0]  ;;  %v519_v19 = vpack.c.b16 %v499_v16, %v499_v16 }
  0x8f   : > { %1138 = vmatpush.bf16.msra.mxu3 %v4471_v47  ;;  %v5330_v47 = vld [vmem:[%s5694_s14 + $0x114] sm:$0xf] }
  0x90   : > { %1166 = vmatpush.bf16.msra.mxu0 %v4535_v56  ;;  %1194 = vmatpush.bf16.msra.mxu1 %v4599_v57  ;;  %v4439_v50 = vor.u32 %v5330_v47, %v4436_v48  ;;  %v4367_v56 = vor.u32 %v5312_v51, %v4364_v52 }
  0x92   : > { %1111 = vmatpush.bf16.msra.mxu2 %v4399_v0  ;;  %v4556_v0 = vld [vmem:[%s5694_s14 + $0x208] sm:$0xf0] }
  0x93   : > { %1139 = vmatpush.bf16.msra.mxu3 %v4463_v59  ;;  %v5328_v59 = vld [vmem:[%s5694_s14 + $0x104] sm:$0xf] }
  0x94   : > { %1167 = vmatpush.bf16.msra.mxu0 %v4527_v5  ;;  %1195 = vmatpush.bf16.msra.mxu1 %v4591_v6  ;;  %v4431_v26 = vor.u32 %v5328_v59, %v4428_v60  ;;  %v4288_v5 = vld [vmem:[%s5696_s15 + $0x6c] sm:$0xf0]  ;;  %v4294_v6 = vld [vmem:[%s5696_s15 + $0x60] sm:$0xf] }
  0x95   : > { %1009 = vmatmul.bf16.gmra.mxu2 %v5898_v29  ;;  %v4291_v10 = vor.u32 %v5292_v3, %v4288_v5  ;;  %v4295_v11 = vor.u32 %v5295_v7, %v4294_v6 }
  0x96   : > { %1112 = vmatpush.bf16.msra.mxu2 %v4391_v18  ;;  %1037 = vmatmul.bf16.gmra.mxu3 %v5900_v34  ;;  %v518_v18 = vpack.c.b16 %v498_v15, %v498_v15 }
  0x97   : > { %1140 = vmatpush.bf16.msra.mxu3 %v4455_v8  ;;  %1065 = vmatmul.bf16.gmra.mxu0 %v5902_v35  ;;  %v4559_v8 = vor.u32 %v5360_v63, %v4556_v0  ;;  %v333_v0 = vld [vmem:[#allocation2 + $0x20] sm:$0xff] }
  0x98   : > { %1168 = vmatpush.bf16.msra.mxu0 %v4519_v23  ;;  %1196 = vmatpush.bf16.msra.mxu1 %v4583_v24 }
  0x99   : > { %1093 = vmatmul.bf16.gmra.mxu1 %v5799_v21  ;;  %v5346_v21 = vld [vmem:[%s5694_s14 + $0x194] sm:$0xf] }
  0x9a   : > { %1113 = vmatpush.bf16.msra.mxu2 %v4383_v36  ;;  %v4503_v57 = vor.u32 %v5346_v21, %v4500_v53 }
  0x9b   : > { %1141 = vmatpush.bf16.msra.mxu3 %v4447_v33 }
  0x9c   : > { %1169 = vmatpush.bf16.msra.mxu0 %v4511_v45  ;;  %1197 = vmatpush.bf16.msra.mxu1 %v4575_v49 }
  0x9e   : > { %1114 = vmatpush.bf16.msra.mxu2 %v4375_v41 }
  0x9f   : > { %1142 = vmatpush.bf16.msra.mxu3 %v4439_v50 }
  0xa0   : > { %1170 = vmatpush.bf16.msra.mxu0 %v4503_v57  ;;  %1198 = vmatpush.bf16.msra.mxu1 %v4567_v58 }
  0xa2   : > { %1115 = vmatpush.bf16.msra.mxu2 %v4367_v56 }
  0xa3   : > { %1143 = vmatpush.bf16.msra.mxu3 %v4431_v26 }
  0xa4   : > { %1171 = vmatpush.bf16.msra.mxu0 %v4495_v4  ;;  %1199 = vmatpush.bf16.msra.mxu1 %v4559_v8 }
  0xa5   : > { %1014 = vmatmul.bf16.gmra.mxu2 %v4287_v9 }
  0xa6   : > { %1042 = vmatmul.bf16.gmra.mxu3 %v4291_v10 }
  0xa7   : > { %1070 = vmatmul.bf16.gmra.mxu0 %v4295_v11 }
  0xa9   : > { %1098 = vmatmul.bf16.gmra.mxu1 %v5748_v25 }
  0xb5   : > { %1019 = vmatmul.bf16.gmra.mxu2 %v517_v17 }
  0xb6   : > { %1047 = vmatmul.bf16.gmra.mxu3 %v518_v18 }
  0xb7   : > { %1075 = vmatmul.bf16.gmra.mxu0 %v519_v19 }
  0xb9   : > { %1103 = vmatmul.bf16.gmra.mxu1 %v5797_v20 }
  0xc5   : > { %1116 = vmatmul.bf16.vlgmr.msra.gmra.mxu2 %v5757_v31 }
  0xc6   : > { %1144 = vmatmul.bf16.vlgmr.msra.gmra.mxu3 %v5851_v32 }
  0xc7   : > { %1172 = vmatmul.bf16.vlgmr.msra.gmra.mxu0 %v5856_v37 }
  0xc9   : > { %1200 = vmatmul.bf16.vlgmr.msra.gmra.mxu1 %v5858_v38 }
  0xd5   : > { %1121 = vmatmul.bf16.gmra.mxu2 %v5806_v28 }
  0xd6   : > { %1149 = vmatmul.bf16.gmra.mxu3 %v5898_v29 }
  0xd7   : > { %1177 = vmatmul.bf16.gmra.mxu0 %v5900_v34 }
  0xd9   : > { %1205 = vmatmul.bf16.gmra.mxu1 %v5902_v35 }
  0xe2   : > { %v949_v25 = vpop.f32.mrf.mxu0 }
  0xe4   : > { %v977_v22 = vpop.f32.mrf.mxu1 }
  0xe5   : > { %1126 = vmatmul.bf16.gmra.mxu2 %v5755_v30  ;;  %v978_v41 = vadd.f32 %v977_v22, %v949_v25  ;;  %v337_v25 = vld [vmem:[#allocation2 + $0x40] sm:$0xff] }
  0xe6   : > { %1154 = vmatmul.bf16.gmra.mxu3 %v4287_v9 }
  0xe7   : > { %1182 = vmatmul.bf16.gmra.mxu0 %v4291_v10  ;;  %v335_v10 = vld [vmem:[#allocation2 + $0x30] sm:$0xff] }
  0xe8   : > { %v959_v31 = vpop.f32.mrf.mxu2 }
  0xe9   : > { %1210 = vmatmul.bf16.gmra.mxu1 %v4295_v11  ;;  %v987_v20 = vpop.f32.mrf.mxu3 }
  0xea   : > { %v951_v32 = vpop.f32.mrf.mxu0  ;;  %v988_v13 = vadd.f32 %v987_v20, %v959_v31 }
  0xec   : > { %v979_v37 = vpop.f32.mrf.mxu1 }
  0xed   : > { %v980_v49 = vadd.f32 %v979_v37, %v951_v32 }
  0xf0   : > { %v5947_v38 = vpop.f32.mrf.mxu2 }
  0xf1   : > { %v5949_v28 = vpop.f32.mrf.mxu3 }
  0xf2   : > { %v954_v23 = vpop.f32.mrf.mxu0  ;;  %v990_v37 = vadd.f32 %v5949_v28, %v5947_v38 }
  0xf4   : > { %v982_v24 = vpop.f32.mrf.mxu1 }
  0xf5   : > { %1131 = vmatmul.bf16.gmra.mxu2 %v5804_v27  ;;  %v983_v58 = vadd.f32 %v982_v24, %v954_v23 }
  0xf6   : > { %1159 = vmatmul.bf16.gmra.mxu3 %v517_v17 }
  0xf7   : > { %1187 = vmatmul.bf16.gmra.mxu0 %v518_v18 }
  0xf8   : > { %v5952_v29 = vpop.f32.mrf.mxu2 }
  0xf9   : > { %1215 = vmatmul.bf16.gmra.mxu1 %v519_v19  ;;  %v5954_v30 = vpop.f32.mrf.mxu3 }
  0xfa   : > { %v956_v33 = vpop.f32.mrf.mxu0 }
  0xfc   : > { %v984_v34 = vpop.f32.mrf.mxu1 }
  0xfd   : > { %v985_v3 = vadd.f32 %v984_v34, %v956_v33 }
 0x100   : > { %v966_v35 = vpop.f32.mrf.mxu2 }
 0x101   : > { %v994_v36 = vpop.f32.mrf.mxu3  ;;  %v339_v35 = vld [vmem:[#allocation2 + $0x50] sm:$0xff] }
 0x104   : > { %v1061_v39 = vpop.f32.mrf.mxu0 }
 0x106   : > { %v5956_v40 = vpop.f32.mrf.mxu1 }
 0x108   : > { %v1005_v42 = vpop.f32.mrf.mxu2 }
 0x109   : > { %v1006_v43 = vadd.f32 %v1005_v42, %v978_v41  ;;  %v1033_v44 = vpop.f32.mrf.mxu3  ;;  %v993_v41 = vadd.f32 %v5954_v30, %v5952_v29 }
 0x10b   : > { %v1034_v45 = vadd.f32 %v1033_v44, %v1006_v43 }
 0x10c   : > { %v1063_v27 = vpop.f32.mrf.mxu0 }
 0x10d   : > { %v1062_v48 = vadd.f32 %v1061_v39, %v1034_v45 }
 0x10e   : > { %v5958_v47 = vpop.f32.mrf.mxu1 }
 0x10f   : > { %v1220_v50 = vadd.f32 %v1062_v48, %v329_v46 }
 0x110   : > { %v1007_v51 = vpop.f32.mrf.mxu2 }
 0x111   : > { %1234 = vst [vmem:[#allocation2] sm:$0xff] %v1220_v50  ;;  %v1008_v52 = vadd.f32 %v1007_v51, %v980_v49  ;;  %v1035_v21 = vpop.f32.mrf.mxu3 }
 0x113   : > { %v1036_v53 = vadd.f32 %v1035_v21, %v1008_v52 }
 0x114   : > { %v1066_v54 = vpop.f32.mrf.mxu0 }
 0x115   : > { %v1064_v57 = vadd.f32 %v1063_v27, %v1036_v53  ;;  %v341_v27 = vld [vmem:[#allocation2 + $0x60] sm:$0x1] }
 0x116   : > { %v5960_v56 = vpop.f32.mrf.mxu1 }
 0x117   : > { %v1222_v59 = vadd.f32 %v1064_v57, %v331_v55 }
 0x118   : > { %v1010_v60 = vpop.f32.mrf.mxu2 }
 0x119   : > { %1237 = vst [vmem:[#allocation2 + $0x10] sm:$0xff] %v1222_v59  ;;  %v1011_v61 = vadd.f32 %v1010_v60, %v983_v58  ;;  %v1038_v26 = vpop.f32.mrf.mxu3  ;;  %v330_v59 = vld [vmem:[#allocation2 + $0x8] sm:$0xff] }
 0x11b   : > { %v1039_v62 = vadd.f32 %v1038_v26, %v1011_v61 }
 0x11c   : > { %v1068_v63 = vpop.f32.mrf.mxu0 }
 0x11d   : > { %v1067_v2 = vadd.f32 %v1066_v54, %v1039_v62 }
 0x11e   : > { %v5962_v1 = vpop.f32.mrf.mxu1 }
 0x11f   : > { %v1224_v4 = vadd.f32 %v1067_v2, %v333_v0 }
 0x120   : > { %v1012_v5 = vpop.f32.mrf.mxu2 }
 0x121   : > { %1239 = vst [vmem:[#allocation2 + $0x20] sm:$0xff] %v1224_v4  ;;  %v1013_v6 = vadd.f32 %v1012_v5, %v985_v3  ;;  %v1040_v7 = vpop.f32.mrf.mxu3 }
 0x123   : > { %v1041_v8 = vadd.f32 %v1040_v7, %v1013_v6 }
 0x124   : > { %v1071_v9 = vpop.f32.mrf.mxu0 }
 0x125   : > { %v1069_v12 = vadd.f32 %v1068_v63, %v1041_v8 }
 0x126   : > { %v5964_v11 = vpop.f32.mrf.mxu1 }
 0x127   : > { %v1226_v14 = vadd.f32 %v1069_v12, %v335_v10 }
 0x128   : > { %v1015_v15 = vpop.f32.mrf.mxu2 }
 0x129   : > { %1241 = vst [vmem:[#allocation2 + $0x30] sm:$0xff] %v1226_v14  ;;  %v1016_v16 = vadd.f32 %v1015_v15, %v988_v13  ;;  %v1043_v17 = vpop.f32.mrf.mxu3  ;;  %v334_v14 = vld [vmem:[#allocation2 + $0x28] sm:$0xff] }
 0x12b   : > { %v1044_v18 = vadd.f32 %v1043_v17, %v1016_v16 }
 0x12c   : > { %v1073_v19 = vpop.f32.mrf.mxu0 }
 0x12d   : > { %v1072_v32 = vadd.f32 %v1071_v9, %v1044_v18 }
 0x12e   : > { %v5966_v22 = vpop.f32.mrf.mxu1 }
 0x12f   : > { %v1228_v23 = vadd.f32 %v1072_v32, %v337_v25 }
 0x130   : > { %v1017_v24 = vpop.f32.mrf.mxu2 }
 0x131   : > { %1243 = vst [vmem:[#allocation2 + $0x40] sm:$0xff] %v1228_v23  ;;  %v1018_v33 = vadd.f32 %v1017_v24, %v990_v37  ;;  %v1045_v34 = vpop.f32.mrf.mxu3  ;;  %v336_v23 = vld [vmem:[#allocation2 + $0x38] sm:$0xff] }
 0x133   : > { %v1046_v31 = vadd.f32 %v1045_v34, %v1018_v33 }
 0x134   : > { %v1076_v20 = vpop.f32.mrf.mxu0 }
 0x135   : > { %v1074_v39 = vadd.f32 %v1073_v19, %v1046_v31 }
 0x136   : > { %v5970_v36 = vpop.f32.mrf.mxu1 }
 0x137   : > { %v1230_v42 = vadd.f32 %v1074_v39, %v339_v35 }
 0x138   : > { %v1020_v43 = vpop.f32.mrf.mxu2 }
 0x139   : > { %1245 = vst [vmem:[#allocation2 + $0x50] sm:$0xff] %v1230_v42  ;;  %v1021_v44 = vadd.f32 %v1020_v43, %v993_v41  ;;  %v1048_v45 = vpop.f32.mrf.mxu3  ;;  %v338_v42 = vld [vmem:[#allocation2 + $0x48] sm:$0xff] }
 0x13b   : > { %v1049_v38 = vadd.f32 %v1048_v45, %v1021_v44 }
 0x13c   : > { %v1078_v28 = vpop.f32.mrf.mxu0 }
 0x13d   : > { %v1077_v48 = vadd.f32 %v1076_v20, %v1049_v38 }
 0x13e   : > { %v1106_v46 = vpop.f32.mrf.mxu1 }
 0x13f   : > { %v1232_v49 = vadd.f32 %v1077_v48, %v341_v27 }
 0x140   : > { %v1022_v50 = vpop.f32.mrf.mxu2 }
 0x141   : > { %1247 = vst [vmem:[#allocation2 + $0x60] sm:$0x1] %v1232_v49  ;;  %v1050_v51 = vpop.f32.mrf.mxu3  ;;  %v340_v49 = vld [vmem:[#allocation2 + $0x58] sm:$0xff] }
 0x144   : > { %v1173_v52 = vpop.f32.mrf.mxu0 }
 0x146   : > { %v1201_v21 = vpop.f32.mrf.mxu1 }
 0x148   : > { %v1117_v53 = vpop.f32.mrf.mxu2 }
 0x149   : > { %v1118_v54 = vadd.f32 %v1117_v53, %v5956_v40  ;;  %v1145_v29 = vpop.f32.mrf.mxu3  ;;  %v332_v40 = vld [vmem:[#allocation2 + $0x18] sm:$0xff] }
 0x14b   : > { %v1146_v30 = vadd.f32 %v1145_v29, %v1118_v54 }
 0x14c   : > { %v1175_v55 = vpop.f32.mrf.mxu0 }
 0x14d   : > { %v1174_v58 = vadd.f32 %v1173_v52, %v1146_v30 }
 0x14e   : > { %v1203_v57 = vpop.f32.mrf.mxu1 }
 0x14f   : > { %v1202_v60 = vadd.f32 %v1201_v21, %v1174_v58 }
 0x150   : > { %v1119_v61 = vpop.f32.mrf.mxu2 }
 0x151   : > { %v1221_v26 = vadd.f32 %v1202_v60, %v330_v59  ;;  %v1120_v62 = vadd.f32 %v1119_v61, %v5958_v47  ;;  %v1147_v63 = vpop.f32.mrf.mxu3 }
 0x153   : > { %1236 = vst.msk [vmem:[#allocation2 + $0x8] sm:$0xff] %vm7877_vm2, %v1221_v26  ;;  %v1148_v0 = vadd.f32 %v1147_v63, %v1120_v62 }
 0x154   : > { %v1178_v2 = vpop.f32.mrf.mxu0 }
 0x155   : > { %v1176_v4 = vadd.f32 %v1175_v55, %v1148_v0  ;;  %v342_v55 = vld [vmem:[#allocation2 + $0x68] sm:$0x1] }
 0x156   : > { %v1206_v3 = vpop.f32.mrf.mxu1 }
 0x157   : > { %v1204_v5 = vadd.f32 %v1203_v57, %v1176_v4 }
 0x158   : > { %v1122_v6 = vpop.f32.mrf.mxu2 }
 0x159   : > { %v1223_v7 = vadd.f32 %v1204_v5, %v332_v40  ;;  %v1123_v8 = vadd.f32 %v1122_v6, %v5960_v56  ;;  %v1150_v9 = vpop.f32.mrf.mxu3 }
 0x15b   : > { %1238 = vst.msk [vmem:[#allocation2 + $0x18] sm:$0xff] %vm7877_vm2, %v1223_v7  ;;  %v1151_v10 = vadd.f32 %v1150_v9, %v1123_v8 }
 0x15c   : > { %v1180_v12 = vpop.f32.mrf.mxu0 }
 0x15d   : > { %v1179_v47 = vadd.f32 %v1178_v2, %v1151_v10 }
 0x15e   : > { %v1208_v13 = vpop.f32.mrf.mxu1 }
 0x15f   : > { %v1207_v15 = vadd.f32 %v1206_v3, %v1179_v47 }
 0x160   : > { %v1124_v16 = vpop.f32.mrf.mxu2 }
 0x161   : > { %v1225_v17 = vadd.f32 %v1207_v15, %v334_v14  ;;  %v1125_v18 = vadd.f32 %v1124_v16, %v5962_v1  ;;  %v1152_v19 = vpop.f32.mrf.mxu3 }
 0x163   : > { %1240 = vst.msk [vmem:[#allocation2 + $0x28] sm:$0xff] %vm7877_vm2, %v1225_v17  ;;  %v1153_v25 = vadd.f32 %v1152_v19, %v1125_v18 }
 0x164   : > { %v1183_v32 = vpop.f32.mrf.mxu0 }
 0x165   : > { %v1181_v56 = vadd.f32 %v1180_v12, %v1153_v25 }
 0x166   : > { %v1211_v37 = vpop.f32.mrf.mxu1 }
 0x167   : > { %v1209_v24 = vadd.f32 %v1208_v13, %v1181_v56 }
 0x168   : > { %v1127_v33 = vpop.f32.mrf.mxu2 }
 0x169   : > { %v1227_v34 = vadd.f32 %v1209_v24, %v336_v23  ;;  %v1128_v31 = vadd.f32 %v1127_v33, %v5964_v11  ;;  %v1155_v20 = vpop.f32.mrf.mxu3 }
 0x16b   : > { %1242 = vst.msk [vmem:[#allocation2 + $0x38] sm:$0xff] %vm7877_vm2, %v1227_v34  ;;  %v1156_v35 = vadd.f32 %v1155_v20, %v1128_v31 }
 0x16c   : > { %v1185_v39 = vpop.f32.mrf.mxu0 }
 0x16d   : > { %v1184_v1 = vadd.f32 %v1183_v32, %v1156_v35 }
 0x16e   : > { %v1213_v41 = vpop.f32.mrf.mxu1 }
 0x16f   : > { %v1212_v43 = vadd.f32 %v1211_v37, %v1184_v1 }
 0x170   : > { %v1129_v44 = vpop.f32.mrf.mxu2 }
 0x171   : > { %v1229_v45 = vadd.f32 %v1212_v43, %v338_v42  ;;  %v1130_v38 = vadd.f32 %v1129_v44, %v5966_v22  ;;  %v1157_v28 = vpop.f32.mrf.mxu3 }
 0x173   : > { %1244 = vst.msk [vmem:[#allocation2 + $0x48] sm:$0xff] %vm7877_vm2, %v1229_v45  ;;  %v1158_v27 = vadd.f32 %v1157_v28, %v1130_v38 }
 0x174   : > { %v1188_v46 = vpop.f32.mrf.mxu0 }
 0x175   : > { %v1186_v11 = vadd.f32 %v1185_v39, %v1158_v27 }
 0x176   : > { %v1216_v48 = vpop.f32.mrf.mxu1 }
 0x177   : > { %v1214_v50 = vadd.f32 %v1213_v41, %v1186_v11 }
 0x178   : > { %v1132_v51 = vpop.f32.mrf.mxu2 }
 0x179   : > { %v1231_v52 = vadd.f32 %v1214_v50, %v340_v49  ;;  %v1133_v21 = vadd.f32 %v1132_v51, %v5970_v36  ;;  %v1160_v53 = vpop.f32.mrf.mxu3 }
 0x17b   : > { %1246 = vst.msk [vmem:[#allocation2 + $0x58] sm:$0xff] %vm7877_vm2, %v1231_v52  ;;  %v1161_v54 = vadd.f32 %v1160_v53, %v1133_v21 }
 0x17c   : > { %v1190_v29 = vpop.f32.mrf.mxu0 }
 0x17d   : > { %v1189_v22 = vadd.f32 %v1188_v46, %v1161_v54 }
 0x17e   : > { %v1218_v30 = vpop.f32.mrf.mxu1 }
 0x17f   : > { %v1217_v57 = vadd.f32 %v1216_v48, %v1189_v22  ;;  %1253 = sbr.rel (%p4616_p10) target bundleno = 921 (0x399), region = 74 }
 0x180   : > { %v1134_v58 = vpop.f32.mrf.mxu2 }
 0x181   : > { %v1233_v59 = vadd.f32 %v1217_v57, %v342_v55  ;;  %v1162_v60 = vpop.f32.mrf.mxu3 }
 0x183   : > { %1249 = vst.msk [vmem:[#allocation2 + $0x68] sm:$0x1] %vm7873_vm3, %v1233_v59 }
 0x184   : > { %v5383_v36 = vld [vmem:[%s7852_s4 + $0x38] sm:$0xff]  ;;  %v5382_v26 = vld [vmem:[%s7852_s4 + $0x30] sm:$0xff]  ;;  %v5572_v0 = vmov 49.0   ;;  %v5381_v3 = vld [vmem:[%s7852_s4 + $0x28] sm:$0xff]  ;;  %vm1273_vm4 = vcmask 1040384  }
 0x185   : > { %v5395_v61 = vld [vmem:[%s7852_s4 + $0x98] sm:$0xff]  ;;  %1980 = vmatpush.bf16.msra.mxu2 %v5383_v36  ;;  %v5394_v62 = vld [vmem:[%s7852_s4 + $0x90] sm:$0xff]  ;;  %5538 = vrcp.f32 %v5572_v0  ;;  %v5393_v4 = vld [vmem:[%s7852_s4 + $0x88] sm:$0xff]  ;;  %vm2381_vm0 = vsmask.f32 3328 }
 0x186   : > { %1807 = vmatpush.bf16.msra.mxu0 %v5395_v61  ;;  %v6004_v63 = vld [vmem:[%s7852_s4 + $0x58] sm:$0xff]  ;;  %v6010_v2 = vld [vmem:[%s7852_s4 + $0x50] sm:$0xff]  ;;  %v6023_v5 = vld [vmem:[#allocation2] sm:$0xff]  ;;  %vm2382_vm1 = vsmask.f32 7440 }
 0x187   : > { %5504 = vmatpush.bf16.msra.mxu3 %v6004_v63  ;;  %v6021_v40 = vld [vmem:[%s7852_s4 + $0xb8] sm:$0xff]  ;;  %v6025_v6 = vld [vmem:[#allocation2 + $0x8] sm:$0xff]  ;;  %v6027_v7 = vld [vmem:[#allocation2 + $0x10] sm:$0xff]  ;;  %v1310_v44 = vmul.f32 %v6023_v5, %v6023_v5 }
 0x188   : > { %5500 = vmatpush.bf16.msra.mxu1 %v6021_v40  ;;  %v6030_v8 = vld [vmem:[#allocation2 + $0x18] sm:$0xff]  ;;  %v6032_v9 = vld [vmem:[#allocation2 + $0x20] sm:$0xff]  ;;  %v6034_v10 = vld [vmem:[#allocation2 + $0x28] sm:$0xff]  ;;  %v1268_v12 = vadd.f32 %v6027_v7, %v6023_v5  ;;  %v1282_v13 = vsel %vm7877_vm2, %v6025_v6, 0.0  ;;  %v1311_v31 = vmul.f32 %v6025_v6, %v6025_v6  ;;  %v1312_v45 = vmul.f32 %v6027_v7, %v6027_v7 }
 0x189   : > { %1981 = vmatpush.bf16.msra.mxu2 %v5382_v26  ;;  %v6046_v14 = vld [vmem:[%s7852_s4 + $0x48] sm:$0xff]  ;;  %v6048_v15 = vld [vmem:[#allocation2 + $0x30] sm:$0xff]  ;;  %v6050_v16 = vld [vmem:[#allocation2 + $0x38] sm:$0xff]  ;;  %v1283_v17 = vsel %vm7877_vm2, %v6030_v8, 0.0  ;;  %v1285_v18 = vsel %vm7877_vm2, %v6034_v10, 0.0  ;;  %v1313_v38 = vmul.f32 %v6030_v8, %v6030_v8  ;;  %v1314_v50 = vmul.f32 %v6032_v9, %v6032_v9 }
 0x18a   : > { %1808 = vmatpush.bf16.msra.mxu0 %v5394_v62  ;;  %v5380_v19 = vld [vmem:[%s7852_s4 + $0x20] sm:$0xff]  ;;  %v6062_v32 = vld [vmem:[#allocation2 + $0x48] sm:$0xff]  ;;  %v1269_v37 = vadd.f32 %v1268_v12, %v6032_v9  ;;  %v1284_v56 = vadd.f32 %v1283_v17, %v1282_v13  ;;  %v6067_v24 = vld [vmem:[#allocation2 + $0x58] sm:$0xff]  ;;  %v1287_v34 = vsel %vm7877_vm2, %v6050_v16, 0.0  ;;  %v1315_v51 = vmul.f32 %v6034_v10, %v6034_v10 }
 0x18b   : > { %v6040_v47 = vpop.eup %5538  ;;  %5505 = vmatpush.bf16.msra.mxu3 %v6010_v2  ;;  %v5392_v25 = vld [vmem:[%s7852_s4 + $0x80] sm:$0xff]  ;;  %v6083_v1 = vld [vmem:[#allocation2 + $0x50] sm:$0xff]  ;;  %v1267_v42 = vld [vmem:[#allocation2 + $0x68] sm:$0x1]  ;;  %v1289_v43 = vsel %vm7877_vm2, %v6062_v32, 0.0  ;;  %v1291_v49 = vsel %vm7877_vm2, %v6067_v24, 0.0  ;;  %v1317_v52 = vmul.f32 %v6050_v16, %v6050_v16  ;;  %v1316_v30 = vmul.f32 %v6048_v15, %v6048_v15 }
 0x18c   : > { %v6065_v23 = vld [vmem:[#allocation2 + $0x40] sm:$0xff]  ;;  %v1270_v20 = vadd.f32 %v1269_v37, %v6048_v15  ;;  %v1286_v35 = vadd.f32 %v1285_v18, %v1284_v56  ;;  %v6075_v39 = vmul.f32 49.0, %v6040_v47  ;;  %v5379_v28 = vld [vmem:[%s7852_s4 + $0x18] sm:$0xff]  ;;  %v1337_v21 = vsel %vm7877_vm2, %v1311_v31, 0.0  ;;  %v5378_v59 = vld [vmem:[%s7852_s4 + $0x10] sm:$0xff] }
 0x18d   : > { %1982 = vmatpush.bf16.msra.mxu2 %v5381_v3  ;;  %v1266_v33 = vld [vmem:[#allocation2 + $0x60] sm:$0x1]  ;;  %v5391_v27 = vld [vmem:[%s7852_s4 + $0x78] sm:$0xff]  ;;  %v1293_v29 = vsel %vm7873_vm3, %v1267_v42, 0.0  ;;  %v1318_v22 = vmul.f32 %v6065_v23, %v6065_v23  ;;  %v1319_v55 = vmul.f32 %v6062_v32, %v6062_v32  ;;  %v1324_v57 = vadd.f32 %v1312_v45, %v1310_v44  ;;  %v5390_v60 = vld [vmem:[%s7852_s4 + $0x70] sm:$0xff] }
 0x18e   : > { %1809 = vmatpush.bf16.msra.mxu0 %v5393_v4  ;;  %v6081_v41 = vld [vmem:[%s7852_s4 + $0x40] sm:$0xff]  ;;  %v1271_v46 = vadd.f32 %v1270_v20, %v6065_v23  ;;  %v1274_v48 = vsel %vm1273_vm4, %v1266_v33, 0.0  ;;  %v1288_v11 = vadd.f32 %v1287_v34, %v1286_v35  ;;  %v1338_v58 = vsel %vm7877_vm2, %v1313_v38, 0.0  ;;  %v5377_v31 = vld [vmem:[%s7852_s4 + $0x8] sm:$0xff] }
 0x18f   : > { %5506 = vmatpush.bf16.msra.mxu3 %v6046_v14  ;;  %v1303_v26 = vsub.f32 1.0, %v6075_v39  ;;  %v1339_v62 = vadd.f32 %v1338_v58, %v1337_v21  ;;  %v1321_v0 = vmul.f32 %v6067_v24, %v6067_v24  ;;  %v1325_v3 = vadd.f32 %v1324_v57, %v1314_v50  ;;  %v5389_v20 = vld [vmem:[%s7852_s4 + $0x68] sm:$0xff] }
 0x190   : > { %v1272_v53 = vadd.f32 %v1271_v46, %v6083_v1  ;;  %v1290_v54 = vadd.f32 %v1289_v43, %v1288_v11  ;;  %v1340_v4 = vsel %vm7877_vm2, %v1315_v51, 0.0  ;;  %v1342_v12 = vsel %vm7877_vm2, %v1317_v52, 0.0  ;;  %v5376_v11 = vld [vmem:[%s7852_s4] sm:$0xff] }
 0x191   : > { %1983 = vmatpush.bf16.msra.mxu2 %v5380_v19  ;;  %v1322_v18 = vmul.f32 %v1266_v33, %v1266_v33  ;;  %v1341_v19 = vadd.f32 %v1340_v4, %v1339_v62  ;;  %v1323_v37 = vmul.f32 %v1267_v42, %v1267_v42  ;;  %v1326_v56 = vadd.f32 %v1325_v3, %v1316_v30 }
 0x192   : > { %1810 = vmatpush.bf16.msra.mxu0 %v5392_v25  ;;  %v1275_v36 = vadd.f32 %v1274_v48, %v1272_v53  ;;  %v1292_v61 = vadd.f32 %v1291_v49, %v1290_v54  ;;  %v1320_v25 = vmul.f32 %v6083_v1, %v6083_v1  ;;  %v1344_v34 = vsel %vm7877_vm2, %v1319_v55, 0.0  ;;  %v5388_v49 = vld [vmem:[%s7852_s4 + $0x60] sm:$0xff] }
 0x193   : > { %5507 = vmatpush.bf16.msra.mxu3 %v6081_v41  ;;  %v1343_v39 = vadd.f32 %v1342_v12, %v1341_v19  ;;  %v1327_v43 = vadd.f32 %v1326_v56, %v1318_v22  ;;  %v1346_v44 = vsel %vm7877_vm2, %v1321_v0, 0.0  ;;  %v1329_v38 = vsel %vm1273_vm4, %v1322_v18, 0.0 }
 0x194   : > { %v1276_v13 = vrot.slane %v1275_v36, 4  ;;  %v1294_v17 = vadd.f32 %v1293_v29, %v1292_v61  ;;  %v1348_v48 = vsel %vm7873_vm3, %v1323_v37, 0.0  ;;  %vm1306_vm5 = vweird.f32 %v6040_v47 }
 0x195   : > { %1984 = vmatpush.bf16.msra.mxu2 %v5379_v28  ;;  %v1345_v28 = vadd.f32 %v1344_v34, %v1343_v39  ;;  %v1328_v46 = vadd.f32 %v1327_v43, %v1320_v25 }
 0x196   : > { %1811 = vmatpush.bf16.msra.mxu0 %v5391_v27  ;;  %v1277_v35 = vadd.f32 %v1276_v13, %v1275_v36  ;;  %v1295_v33 = vrot.slane %v1294_v17, 4  ;;  %v1304_v27 = vmul.f32 %v6040_v47, %v1303_v26 }
 0x197   : > { %v1347_v52 = vadd.f32 %v1346_v44, %v1345_v28  ;;  %v1330_v21 = vadd.f32 %v1329_v38, %v1328_v46 }
 0x198   : > { %v1278_v42 = vrot.slane %v1277_v35, 2  ;;  %v1296_v45 = vadd.f32 %v1295_v33, %v1294_v17  ;;  %v1305_v30 = vadd.f32 %v6040_v47, %v1304_v27 }
 0x199   : > { %1985 = vmatpush.bf16.msra.mxu2 %v5378_v59  ;;  %v1349_v29 = vadd.f32 %v1348_v48, %v1347_v52  ;;  %v1331_v22 = vrot.slane %v1330_v21, 4 }
 0x19a   : > { %1812 = vmatpush.bf16.msra.mxu0 %v5390_v60  ;;  %v1279_v50 = vadd.f32 %v1278_v42, %v1277_v35  ;;  %v1297_v51 = vrot.slane %v1296_v45, 2  ;;  %v1307_v61 = vsel %vm1306_vm5, %v6040_v47, %v1305_v30  ;;  %vm6286_vm5 = vmor %vm2381_vm0, %vm2382_vm1 }
 0x19b   : > { %v1350_v57 = vrot.slane %v1349_v29, 4  ;;  %v1332_v59 = vadd.f32 %v1331_v22, %v1330_v21 }
 0x19c   : > { %v1280_v53 = vrot.slane %v1279_v50, 1  ;;  %v1298_v54 = vadd.f32 %v1297_v51, %v1296_v45 }
 0x19d   : > { %1986 = vmatpush.bf16.msra.mxu2 %v5377_v31  ;;  %v1351_v36 = vadd.f32 %v1350_v57, %v1349_v29  ;;  %v1333_v26 = vrot.slane %v1332_v59, 2  ;;  %v5573_v31 = vmov 0.0  }
 0x19e   : > { %1813 = vmatpush.bf16.msra.mxu0 %v5389_v20  ;;  %v1299_v55 = vrot.slane %v1298_v54, 1  ;;  %v1281_v58 = vadd.f32 %v1280_v53, %v1279_v50  ;;  %1452 = vst [vmem:[#allocation3] sm:$0xff] %v5573_v31 }
 0x19f   : > { %v1352_v62 = vrot.slane %v1351_v36, 2  ;;  %v1334_v3 = vadd.f32 %v1333_v26, %v1332_v59  ;;  %1453 = vst.msk [vmem:[#allocation3 + $0x8] sm:$0xff] %vm7877_vm2, %v5573_v31 }
 0x1a0   : > { %v1300_v60 = vadd.f32 %v1299_v55, %v1298_v54  ;;  %v6155_v0 = vmul.f32 %v1307_v61, %v1281_v58  ;;  %1455 = vst.msk [vmem:[#allocation3 + $0x18] sm:$0xff] %vm7877_vm2, %v5573_v31 }
 0x1a1   : > { %1987 = vmatpush.bf16.msra.mxu2 %v5376_v11  ;;  %v1353_v12 = vadd.f32 %v1352_v62, %v1351_v36  ;;  %v1335_v13 = vrot.slane %v1334_v3, 1  ;;  %1457 = vst.msk [vmem:[#allocation3 + $0x28] sm:$0xff] %vm7877_vm2, %v5573_v31 }
 0x1a2   : > { %1814 = vmatpush.bf16.msra.mxu0 %v5388_v49  ;;  %v6158_v4 = vmul.f32 %v1307_v61, %v1300_v60  ;;  %1459 = vst.msk [vmem:[#allocation3 + $0x38] sm:$0xff] %vm7877_vm2, %v5573_v31 }
 0x1a3   : > { %v1354_v17 = vrot.slane %v1353_v12, 1  ;;  %v1336_v18 = vadd.f32 %v1335_v13, %v1334_v3  ;;  %1461 = vst.msk [vmem:[#allocation3 + $0x48] sm:$0xff] %vm7877_vm2, %v5573_v31  ;;  %v1362_v3 = vld [vmem:[%s7850_s2] sm:$0x3] }
 0x1a4   : > { %v1359_v47 = vmul.f32 %v6158_v4, %v6158_v4  ;;  %1463 = vst.msk [vmem:[#allocation3 + $0x58] sm:$0xff] %vm7877_vm2, %v5573_v31 }
 0x1a5   : > { %2012 = vmatpush.bf16.msrb.mxu2 %v6004_v63  ;;  %v1358_v63 = vmul.f32 %v6155_v0, %v6155_v0  ;;  %v1356_v19 = vmul.f32 %v1336_v18, %v1307_v61  ;;  %1465 = vst.msk [vmem:[#allocation3 + $0x68] sm:$0xff] %vm7877_vm2, %v5573_v31 }
 0x1a6   : > { %1839 = vmatpush.bf16.msrb.mxu0 %v6021_v40  ;;  %v1355_v40 = vadd.f32 %v1354_v17, %v1353_v12  ;;  %1466 = vst [vmem:[#allocation3 + $0x70] sm:$0xff] %v5573_v31 }
 0x1a7   : > { %v1360_v37 = vsub.f32 %v1356_v19, %v1358_v63  ;;  %1467 = vst.msk [vmem:[#allocation3 + $0x78] sm:$0xff] %vm7877_vm2, %v5573_v31 }
 0x1a8   : > { %v1357_v25 = vmul.f32 %v1355_v40, %v1307_v61  ;;  %1468 = vst [vmem:[#allocation3 + $0x80] sm:$0xff] %v5573_v31 }
 0x1a9   : > { %2013 = vmatpush.bf16.msrb.mxu2 %v6010_v2  ;;  %v1363_v56 = vadd.f32 1e-05, %v1360_v37  ;;  %1469 = vst.msk [vmem:[#allocation3 + $0x88] sm:$0xff] %vm7877_vm2, %v5573_v31 }
 0x1aa   : > { %v1361_v2 = vsub.f32 %v1357_v25, %v1359_v47 }
 0x1ab   : > { %5540 = vrsqrt.f32 %v1363_v56  ;;  %vm1371_vm6 = vweird.f32 %v1363_v56 }
 0x1ac   : > { %v1364_v34 = vadd.f32 1e-05, %v1361_v2 }
 0x1ad   : > { %2014 = vmatpush.bf16.msrb.mxu2 %v6046_v14  ;;  %v1484_v14 = vlaneseq }
 0x1ae   : > { %5542 = vrsqrt.f32 %v1364_v34  ;;  %vm1381_vm7 = vweird.f32 %v1364_v34 }
 0x1b1   : > { %2015 = vmatpush.bf16.msrb.mxu2 %v6081_v41  ;;  %v6175_v41 = vshrl.u32 %v1484_v14, 7  ;;  %v5541_v20 = vpop.eup %5540  ;;  %v7857_v14 = vmov 0  }
 0x1b2   : > { %v1366_v39 = vmul.f32 %v5541_v20, %v1363_v56  ;;  %vm1372_vm8 = vweird.f32 %v5541_v20 }
 0x1b3   : > { %v1486_v35 = vadd.s32 8, %v6175_v41  ;;  %v6185_v43 = vadd.s32 16, %v6175_v41  ;;  %v1492_v42 = vcvt.s32.f32 %v6175_v41  ;;  %v6190_v38 = vadd.s32 24, %v6175_v41  ;;  %vm6200_vm10 = vmor %vm1371_vm6, %vm1372_vm8 }
 0x1b4   : > { %v5543_v33 = vpop.eup %5542  ;;  %v1367_v28 = vmul.f32 %v5541_v20, %v1366_v39  ;;  %vm3372_vm8 = vcmask 1042432  }
 0x1b5   : > { %v1376_v44 = vmul.f32 %v5543_v33, %v1364_v34  ;;  %v1493_v45 = vcvt.s32.f32 %v1486_v35  ;;  %v1499_v46 = vmul.f32 0.14285715, %v1492_v42  ;;  %vm1382_vm9 = vweird.f32 %v5543_v33  ;;  %v1391_v35 = vld [vmem:[%s7851_s3] sm:$0x3] }
 0x1b6   : > { %v1368_v11 = vmul.f32 0.5, %v1367_v28  ;;  %v1494_v49 = vcvt.s32.f32 %v6185_v43  ;;  %v1495_v21 = vcvt.s32.f32 %v6190_v38  ;;  %vm1383_vm11 = vmor %vm1381_vm7, %vm1382_vm9  ;;  %vm3373_vm9 = vcmask 1046532  }
 0x1b7   : > { %v1377_v27 = vmul.f32 %v5543_v33, %v1376_v44  ;;  %v1500_v48 = vmul.f32 0.14285715, %v1493_v45  ;;  %v1506_v51 = vadd.f32 0.0001, %v1499_v46 }
 0x1b8   : > { %v1369_v53 = vsub.f32 1.5, %v1368_v11  ;;  %v1501_v59 = vmul.f32 0.14285715, %v1494_v49  ;;  %v1502_v60 = vmul.f32 0.14285715, %v1495_v21 }
 0x1b9   : > { %v1378_v50 = vmul.f32 0.5, %v1377_v27  ;;  %v1507_v52 = vadd.f32 0.0001, %v1500_v48  ;;  %v1513_v30 = vfloor.f32 %v1506_v51  ;;  %v5411_v48 = vld [vmem:[%s7852_s4 + $0x118] sm:$0xff] }
 0x1ba   : > { %v1370_v55 = vmul.f32 %v5541_v20, %v1369_v53  ;;  %v1508_v13 = vadd.f32 0.0001, %v1501_v59  ;;  %v1509_v17 = vadd.f32 0.0001, %v1502_v60  ;;  %2337 = vmatpush.bf16.msrb.mxu3 %v5411_v48 }
 0x1bb   : > { %v1379_v29 = vsub.f32 1.5, %v1378_v50  ;;  %v1514_v22 = vfloor.f32 %v1507_v52  ;;  %v1520_v58 = vmul.f32 7.0, %v1513_v30 }
 0x1bc   : > { %v1374_v61 = vsel %vm6200_vm10, %v5541_v20, %v1370_v55  ;;  %v1515_v25 = vfloor.f32 %v1508_v13  ;;  %v1516_v37 = vfloor.f32 %v1509_v17  ;;  %v5410_v13 = vld [vmem:[%s7852_s4 + $0x110] sm:$0xff] }
 0x1bd   : > { %v1380_v57 = vmul.f32 %v5543_v33, %v1379_v29  ;;  %v1521_v36 = vmul.f32 7.0, %v1514_v22  ;;  %v6209_v62 = vsub.f32 %v1492_v42, %v1520_v58 }
 0x1be   : > { %v1522_v44 = vmul.f32 7.0, %v1515_v25  ;;  %2338 = vmatpush.bf16.msrb.mxu3 %v5410_v13 }
 0x1bf   : > { %v1384_v26 = vsel %vm1383_vm11, %v5543_v33, %v1380_v57  ;;  %v6215_v63 = vsub.f32 %v1493_v45, %v1521_v36  ;;  %vm1534_vm12 = vcmp.gt.f32.partialorder %v6209_v62, 0.5 }
 0x1c0   : > { %v1387_v12 = vrot.slane %v1384_v26, 7  ;;  %vm6223_vm14 = vmpackc.low %vm1534_vm12, %vm1534_vm12  ;;  %v6277_v30 = vsub.f32 %v1494_v49, %v1522_v44  ;;  %v5398_v26 = vld [vmem:[%s7852_s4 + $0xb0] sm:$0xff] }
 0x1c1   : > { %vm1535_vm13 = vcmp.gt.f32.partialorder %v6215_v63, 0.5  ;;  %v6234_v20 = vsel %vm6223_vm14, 65537, %v7857_v14  ;;  %5501 = vmatpush.bf16.msra.mxu1 %v5398_v26  ;;  %1840 = vmatpush.bf16.msrb.mxu0 %v5398_v26  ;;  %vm6340_vm12 = vmor %vm3372_vm8, %vm3373_vm9 }
 0x1c2   : > { %v1388_v18 = vsel %vm1273_vm4, %v1374_v61, %v1387_v12  ;;  %vm6239_vm15 = vmpackc.low %vm1535_vm13, %vm1535_vm13  ;;  %v2385_v42 = vshll.u32 %v6234_v20, 16  ;;  %v2388_v45 = vshrl.u32 %v6234_v20, 16  ;;  %vm1536_vm6 = vcmp.gt.f32.partialorder %v6277_v30, 0.5 }
 0x1c3   : > { %v1390_v40 = vmul.f32 %v1388_v18, %v1362_v3  ;;  %v1549_v18 = vld [vmem:[#allocation3 + $0x8] sm:$0xff]  ;;  %vm6317_vm10 = vmpackc.low %vm1536_vm6, %vm1536_vm6  ;;  %vm1541_vm6 = vcmp.lt.f32.partialorder %v6209_v62, 5.5 }
 0x1c4   : > { %v6262_v51 = vrot.slane %v2385_v42, 5  ;;  %v2390_v52 = vrot.slane %v2388_v45, 4  ;;  %v1562_v44 = vpack.c.bf16 %v1549_v18, %v5573_v31  ;;  %v6327_v42 = vunpack.c.h.b16 %v7857_v14 }
 0x1c5   : > { %v6218_v47 = vperm.slane %v1390_v40, 0  ;;  %v6220_v19 = vperm.slane %v1390_v40, 1  ;;  %v5397_v40 = vld [vmem:[%s7852_s4 + $0xa8] sm:$0xff]  ;;  %v6330_v45 = vrot.slane %v6234_v20, 5 }
 0x1c6   : > { %v2391_v29 = vor.u32 %v2390_v52, %v6262_v51  ;;  %5502 = vmatpush.bf16.msra.mxu1 %v5397_v40  ;;  %1841 = vmatpush.bf16.msrb.mxu0 %v5397_v40 }
 0x1c7   : > { %7881 = vst [vmem:[#allocation5_spill] sm:$0xff] %v6218_v47  ;;  %v1397_v56 = vmul.f32 %v6218_v47, %v6155_v0  ;;  %v1398_v34 = vmul.f32 %v6220_v19, %v6158_v4  ;;  %v1523_v0 = vmul.f32 7.0, %v1516_v37  ;;  %v6246_v4 = vsel %vm6239_vm15, 65537, %v7857_v14 }
 0x1c8   : > { %7882 = vst [vmem:[#allocation6_spill] sm:$0xff] %v6220_v19  ;;  %v1405_v28 = vmul.f32 %v6218_v47, %v6023_v5  ;;  %v1406_v27 = vmul.f32 %v6220_v19, %v6025_v6  ;;  %v1407_v46 = vmul.f32 %v6218_v47, %v6027_v7  ;;  %v1408_v50 = vmul.f32 %v6220_v19, %v6030_v8 }
 0x1c9   : > { %v1401_v33 = vrot.slane %v1398_v34, 7  ;;  %v1409_v5 = vmul.f32 %v6218_v47, %v6032_v9  ;;  %v1410_v6 = vmul.f32 %v6220_v19, %v6034_v10  ;;  %v2394_v7 = vshll.u32 %v6246_v4, 16  ;;  %7893 = vst [vmem:[#allocation9_spill] sm:$0xff] %v6330_v45 }
 0x1ca   : > { %v2398_v8 = vshrl.u32 %v6246_v4, 16  ;;  %v6279_v9 = vsub.f32 %v1495_v21, %v1523_v0  ;;  %v2392_v43 = vrot.slane %v2391_v29, 4  ;;  %v6324_v0 = vunpack.c.l.b16 %v7857_v14 }
 0x1cb   : > { %v1402_v38 = vsel %vm1273_vm4, %v1397_v56, %v1401_v33  ;;  %v2396_v49 = vrot.slane %v2394_v7, 5  ;;  %v6375_v29 = vsel %vm6223_vm14, %v1562_v44, 0  ;;  %vm1542_vm14 = vcmp.lt.f32.partialorder %v6215_v63, 5.5  ;;  %v5407_v63 = vld [vmem:[%s7852_s4 + $0xf8] sm:$0xff] }
 0x1cc   : > { %v1404_v11 = vsub.f32 %v1391_v35, %v1402_v38  ;;  %v2400_v61 = vrot.slane %v2398_v8, 4  ;;  %vm1537_vm7 = vcmp.gt.f32.partialorder %v6279_v9, 0.5 }
 0x1cd   : > { %v2397_v12 = vsel %vm6286_vm5, %v2392_v43, %v2396_v49  ;;  %vm6335_vm11 = vmpackc.low %vm1537_vm7, %vm1537_vm7 }
 0x1ce   : > { %v6269_v53 = vperm.slane %v1404_v11, 0  ;;  %v6271_v54 = vperm.slane %v1404_v11, 1  ;;  %v2455_v37 = vunpack.c.l.b16 %v2397_v12  ;;  %v2456_v56 = vunpack.c.h.b16 %v2397_v12  ;;  %vm6415_vm7 = vmpackc.low %vm1541_vm6, %vm1541_vm6 }
 0x1cf   : > { %v2401_v35 = vor.u32 %v2400_v61, %v2396_v49  ;;  %v6352_v20 = vsel %vm6335_vm11, 65537, %v7857_v14  ;;  %v3376_v11 = vrot.slane %v6330_v45, 4  ;;  %vm1543_vm6 = vcmp.lt.f32.partialorder %v6277_v30, 5.5 }
 0x1d0   : > { %7887 = vst [vmem:[#allocation7_spill] sm:$0xff] %v6269_v53  ;;  %v1424_v10 = vadd.f32 %v6269_v53, %v1405_v28  ;;  %v1425_v22 = vadd.f32 %v6271_v54, %v1406_v27  ;;  %v1426_v55 = vadd.f32 %v6269_v53, %v1407_v46  ;;  %v1427_v57 = vadd.f32 %v6271_v54, %v1408_v50  ;;  %v5396_v27 = vld [vmem:[%s7852_s4 + $0xa0] sm:$0xff] }
 0x1d1   : > { %7888 = vst [vmem:[#allocation8_spill] sm:$0xff] %v6271_v54  ;;  %v1429_v59 = vadd.f32 %v6271_v54, %v1410_v6  ;;  %v1428_v21 = vadd.f32 %v6269_v53, %v1409_v5  ;;  %v6347_v28 = vsel %vm6317_vm10, 65537, %v7857_v14  ;;  %vm6359_vm13 = vcmp.ne.s32.totalorder %v2455_v37, %v6324_v0  ;;  %5503 = vmatpush.bf16.msra.mxu1 %v5396_v27 }
 0x1d2   : > { %v6292_v60 = vmax.f32 %v1424_v10, 0.0  ;;  %v1439_v36 = vmax.f32 %v1425_v22, 0.0  ;;  %v1441_v3 = vmax.f32 %v1427_v57, 0.0  ;;  %v6303_v17 = vmax.f32 %v1426_v55, 0.0  ;;  %1842 = vmatpush.bf16.msrb.mxu0 %v5396_v27 }
 0x1d3   : > { %v1443_v25 = vmax.f32 %v1429_v59, 0.0  ;;  %v6311_v34 = vmax.f32 %v1428_v21, 0.0  ;;  %vm6364_vm0 = vcmp.ne.s32.totalorder %v2456_v56, %v6327_v42  ;;  %v7854_v50 = vrot.slane %v6246_v4, 5 }
 0x1d4   : > { %1470 = vst [vmem:[#allocation3 + $0x10] sm:$0xff] %v6292_v60  ;;  %v2402_v52 = vrot.slane %v2401_v35, 4  ;;  %v2404_v5 = vshll.u32 %v6347_v28, 16  ;;  %v2408_v6 = vshrl.u32 %v6347_v28, 16  ;;  %v2414_v7 = vshll.u32 %v6352_v20, 16  ;;  %vm2461_vm1 = vmpackc.low %vm6364_vm0, %vm6359_vm13 }
 0x1d5   : > { %1471 = vst.msk [vmem:[#allocation3 + $0x18] sm:$0xff] %vm7877_vm2, %v1439_v36  ;;  %v6381_v8 = vsel %vm6340_vm12, %v3376_v11, %v7854_v50  ;;  %v1870_v57 = vunpack.c.l.b16 %v6375_v29  ;;  %v1621_v11 = vld [vmem:[#allocation3] sm:$0xfe]  ;;  %2305 = vmatpush.bf16.msrb.mxu1 %v5407_v63  ;;  %v6534_v30 = vsel %vm6415_vm7, 65537, %v7857_v14 }
 0x1d6   : > { %1472 = vst [vmem:[#allocation3 + $0x20] sm:$0xff] %v6303_v17  ;;  %v2406_v22 = vrot.slane %v2404_v5, 5  ;;  %v2410_v55 = vrot.slane %v2408_v6, 4  ;;  %v6400_v49 = vrot.slane %v2414_v7, 5  ;;  %v1625_v38 = vpack.c.bf16 %v6292_v60, %v1621_v11 }
 0x1d7   : > { %1473 = vst.msk [vmem:[#allocation3 + $0x28] sm:$0xff] %vm7877_vm2, %v1441_v3 }
 0x1d8   : > { %1474 = vst [vmem:[#allocation3 + $0x30] sm:$0xff] %v6311_v34  ;;  %v2407_v43 = vsel %vm6286_vm5, %v2402_v52, %v2406_v22  ;;  %v2411_v61 = vor.u32 %v2410_v55, %v2406_v22  ;;  %v6468_v55 = vpack.c.bf16 %v6311_v34, %v6303_v17 }
 0x1d9   : > { %1475 = vst.msk [vmem:[#allocation3 + $0x38] sm:$0xff] %vm7877_vm2, %v1443_v25  ;;  %v2462_v13 = vunpack.c.l.b16 %v2407_v43  ;;  %v2463_v48 = vunpack.c.h.b16 %v2407_v43  ;;  %v1660_v43 = vshrl.u32 %v1625_v38, 16 }
 0x1da   : > { %7902 = vst [vmem:[#allocation10_spill] sm:$0xff] %v6381_v8  ;;  %v2412_v25 = vrot.slane %v2411_v61, 4  ;;  %v1667_v61 = vshll.u32 %v6468_v55, 16 }
 0x1db   : > { %vm2466_vm8 = vcmp.ne.s32.totalorder %v2462_v13, %v6324_v0  ;;  %vm2467_vm9 = vcmp.ne.s32.totalorder %v2463_v48, %v6327_v42  ;;  %v5405_v13 = vld [vmem:[%s7852_s4 + $0xe8] sm:$0xff] }
 0x1dc   : > { %v6383_v10 = vld [vmem:[#allocation3 + $0x18] sm:$0xff]  ;;  %v2417_v27 = vsel %vm6286_vm5, %v2412_v25, %v6400_v49  ;;  %v1416_v25 = vmul.f32 %v6220_v19, %v6067_v24  ;;  %v1669_v63 = vrot.slane %v1667_v61, 1 }
 0x1dd   : > { %v6392_v2 = vpack.c.bf16 %v6383_v10, %v6292_v60  ;;  %v2469_v52 = vunpack.c.l.b16 %v2417_v27  ;;  %v2470_v5 = vunpack.c.h.b16 %v2417_v27  ;;  %v1662_v60 = vshll.u32 %v1625_v38, 16 }
 0x1de   : > { %v6396_v59 = vld [vmem:[#allocation3 + $0x28] sm:$0xff]  ;;  %v1435_v11 = vadd.f32 %v6271_v54, %v1416_v25 }
 0x1df   : > { %v6405_v62 = vsel %vm6239_vm15, %v6392_v2, 0  ;;  %v6408_v21 = vsel %vm2461_vm1, %v6392_v2, 0  ;;  %v6412_v36 = vpack.c.bf16 %v6396_v59, %v6303_v17  ;;  %vm6436_vm15 = vmpackc.low %vm1542_vm14, %vm1542_vm14  ;;  %vm2474_vm13 = vcmp.ne.s32.totalorder %v2470_v5, %v6327_v42  ;;  %v5409_v17 = vld [vmem:[%s7852_s4 + $0x108] sm:$0xff] }
 0x1e0   : > { %v1872_v26 = vunpack.c.l.b16 %v6405_v62  ;;  %v6419_v12 = vld [vmem:[#allocation3 + $0x38] sm:$0xff]  ;;  %vm7874_vm1 = vsmask.f32 7424  ;;  %v1664_v27 = vrot.slane %v1662_v60, 1  ;;  %2339 = vmatpush.bf16.msrb.mxu3 %v5409_v17  ;;  %v1449_v38 = vmax.f32 %v1435_v11, 0.0 }
 0x1e1   : > { %v6423_v39 = vpack.c.bf16 %v6419_v12, %v6311_v34  ;;  %v6428_v18 = vsel %vm6415_vm7, %v6412_v36, 0  ;;  %v1592_v40 = vsel %vm6317_vm10, %v6412_v36, 0  ;;  %vm2468_vm10 = vmpackc.low %vm2467_vm9, %vm2466_vm8  ;;  %v1414_v34 = vmul.f32 %v6220_v19, %v6062_v32 }
 0x1e2   : > { %7905 = vst [vmem:[#allocation11_spill] sm:$0xff] %v6428_v18  ;;  %v1884_v37 = vpack.c.b16 %v1872_v26, %v1870_v57  ;;  %v1875_v35 = vunpack.c.h.b16 %v1592_v40  ;;  %v6461_v7 = vsel %vm2468_vm10, %v6412_v36, 0  ;;  %v5406_v57 = vld [vmem:[%s7852_s4 + $0xf0] sm:$0xff]  ;;  %v1412_v26 = vmul.f32 %v6220_v19, %v6050_v16  ;;  %vm6537_vm8 = vmpackc.low %vm1543_vm6, %vm1543_vm6 }
 0x1e3   : > { %v6443_v44 = vsel %vm6436_vm15, %v6423_v39, 0  ;;  %v1593_v33 = vsel %vm6335_vm11, %v6423_v39, 0  ;;  %vm2473_vm11 = vcmp.ne.s32.totalorder %v2469_v52, %v6324_v0  ;;  %2306 = vmatpush.bf16.msrb.mxu1 %v5406_v57  ;;  %v1433_v48 = vadd.f32 %v6271_v54, %v1414_v34  ;;  %1481 = vst.msk [vmem:[#allocation3 + $0x68] sm:$0xff] %vm7877_vm2, %v1449_v38  ;;  %v6611_v18 = vld [vmem:[#allocation3] sm:$0xfc] }
 0x1e4   : > { %7908 = vst [vmem:[#allocation12_spill] sm:$0xff] %v6443_v44  ;;  %1988 = vmatmul.bf16.vlgmr.msra.gmra.mxu2 %v1884_v37  ;;  %v1877_v46 = vunpack.c.h.b16 %v1593_v33  ;;  %vm2475_vm0 = vmpackc.low %vm2474_vm13, %vm2473_vm11  ;;  %v1874_v37 = vunpack.c.l.b16 %v1592_v40  ;;  %v1431_v16 = vadd.f32 %v6271_v54, %v1412_v26  ;;  %v1413_v32 = vmul.f32 %v6218_v47, %v6065_v23 }
 0x1e5   : > { %v6464_v22 = vsel %vm2475_vm0, %v6423_v39, 0  ;;  %v1665_v5 = vor.u32 %v1664_v27, %v1660_v43  ;;  %v1490_v60 = vadd.s32 40, %v6175_v41  ;;  %v1415_v17 = vmul.f32 %v6218_v47, %v6083_v1 }
 0x1e6   : > { %v1887_v6 = vpack.c.b16 %v1877_v46, %v1875_v35  ;;  %v1876_v35 = vunpack.c.l.b16 %v1593_v33  ;;  %v1411_v46 = vmul.f32 %v6218_v47, %v6048_v15  ;;  %v1445_v24 = vmax.f32 %v1431_v16, 0.0  ;;  %v5404_v15 = vld [vmem:[%s7852_s4 + $0xe0] sm:$0xff] }
 0x1e7   : > { %v1489_v33 = vadd.s32 32, %v6175_v41  ;;  %2307 = vmatpush.bf16.msrb.mxu1 %v5405_v13  ;;  %v1432_v57 = vadd.f32 %v6269_v53, %v1413_v32  ;;  %v1670_v61 = vsel %vm7874_vm1, %v1665_v5, %v1669_v63  ;;  %v1497_v13 = vcvt.s32.f32 %v1490_v60 }
 0x1e8   : > { %4742 = vmatmul.msk.bf16.vlgmr.msra.gmra.mxu3 %vm7877_vm2, %v1887_v6  ;;  %v1886_v52 = vpack.c.b16 %v1876_v35, %v1874_v37  ;;  %v1430_v40 = vadd.f32 %v6269_v53, %v1411_v46  ;;  %v1447_v6 = vmax.f32 %v1433_v48, 0.0  ;;  %1477 = vst.msk [vmem:[#allocation3 + $0x48] sm:$0xff] %vm7877_vm2, %v1445_v24  ;;  %1815 = vmatmul.bf16.vlgmr.msra.gmra.mxu0 %v1670_v61  ;;  %v6506_v34 = vadd.s32 48, %v6175_v41  ;;  %v5403_v37 = vld [vmem:[%s7852_s4 + $0xd8] sm:$0xff]  ;;  %v5408_v41 = vld [vmem:[%s7852_s4 + $0x100] sm:$0xff]  ;;  %v5402_v24 = vld [vmem:[%s7852_s4 + $0xd0] sm:$0xff] }
 0x1e9   : > { %v1496_v43 = vcvt.s32.f32 %v1489_v33  ;;  %v1446_v26 = vmax.f32 %v1432_v57, 0.0  ;;  %v1504_v35 = vmul.f32 0.14285715, %v1497_v13  ;;  %v6515_v16 = vadd.f32 %v6269_v53, %v1415_v17  ;;  %2340 = vmatpush.bf16.msrb.mxu3 %v5408_v41  ;;  %v5401_v41 = vld [vmem:[%s7852_s4 + $0xc8] sm:$0xff] }
 0x1ea   : > { %v1444_v23 = vmax.f32 %v1430_v40, 0.0  ;;  %1479 = vst.msk [vmem:[#allocation3 + $0x58] sm:$0xff] %vm7877_vm2, %v1447_v6  ;;  %v1683_v48 = vshrl.u32 %v6468_v55, 16  ;;  %vm1544_vm14 = vcmp.lt.f32.partialorder %v6279_v9, 5.5  ;;  %v2418_v55 = vshrl.u32 %v6352_v20, 16 }
 0x1eb   : > { %v1503_v25 = vmul.f32 0.14285715, %v1496_v43  ;;  %2308 = vmatpush.bf16.msrb.mxu1 %v5404_v15  ;;  %1478 = vst [vmem:[#allocation3 + $0x50] sm:$0xff] %v1446_v26  ;;  %v1511_v46 = vadd.f32 0.0001, %v1504_v35  ;;  %v7855_v11 = vmax.f32 %v6515_v16, 0.0  ;;  %vm6543_vm9 = vmpackc.low %vm1544_vm14, %vm1544_vm14 }
 0x1ec   : > { %1476 = vst [vmem:[#allocation3 + $0x40] sm:$0xff] %v1444_v23  ;;  %v6512_v27 = vpack.c.bf16 %v1446_v26, %v1444_v23  ;;  %v7909_v38 = vmov 0  ;;  %v1624_v57 = vld [vmem:[#allocation3 + $0x68] sm:$0x3]  ;;  %v1685_v61 = vor.u32 %v1683_v48, %v1669_v63  ;;  %vm2071_vm0 = vcmask 1044484  }
 0x1ed   : > { %v1510_v1 = vadd.f32 0.0001, %v1503_v25  ;;  %v1518_v33 = vfloor.f32 %v1511_v46  ;;  %1480 = vst [vmem:[#allocation3 + $0x60] sm:$0xff] %v7855_v11  ;;  %v7910_v38 = vsel %vm6537_vm8, 4294967295, %v7909_v38  ;;  %v7912_v25 = vmov 0 }
 0x1ee   : > { %v1687_v5 = vshll.u32 %v6512_v27, 16  ;;  %7911 = vst [vmem:[#allocation13_spill] sm:$0xff] %v7910_v38  ;;  %v7913_v25 = vsel %vm6543_vm9, 4294967295, %v7912_v25  ;;  %v6547_v3 = vpack.c.bf16 %v1624_v57, %v1624_v57  ;;  %v2073_v57 = vrot.slane %v6534_v30, 7 }
 0x1ef   : > { %v1517_v32 = vfloor.f32 %v1510_v1  ;;  %2309 = vmatpush.bf16.msrb.mxu1 %v5403_v37  ;;  %v1557_v40 = vld [vmem:[#allocation3 + $0x48] sm:$0xff]  ;;  %v1525_v60 = vmul.f32 7.0, %v1518_v33  ;;  %7914 = vst [vmem:[#allocation14_spill] sm:$0xff] %v7913_v25  ;;  %v6561_v33 = vsel %vm6436_vm15, 65537, %v7857_v14  ;;  %v7925_v44 = vmov 0 }
 0x1f0   : > { %v6549_v35 = vpack.c.bf16 %v1557_v40, %v1444_v23  ;;  %v6551_v1 = vrot.slane %v1687_v5, 1  ;;  %v6566_v23 = vsel %vm6537_vm8, 65537, %v7857_v14  ;;  %v6572_v5 = vsel %vm6543_vm9, 65537, %v7857_v14 }
 0x1f1   : > { %v1559_v15 = vld [vmem:[#allocation3 + $0x58] sm:$0xff]  ;;  %v1524_v6 = vmul.f32 7.0, %v1517_v32  ;;  %v1532_v48 = vsub.f32 %v1497_v13, %v1525_v60  ;;  %v2075_v50 = vrot.slane %v6561_v33, 7  ;;  %v2093_v38 = vunpack.c.h.b16 %v2073_v57 }
 0x1f2   : > { %v1630_v9 = vpack.c.bf16 %v1559_v15, %v1557_v40  ;;  %v6556_v32 = vpack.c.bf16 %v1559_v15, %v1446_v26  ;;  %v2420_v26 = vrot.slane %v2418_v55, 4  ;;  %v1690_v55 = vsel %vm7874_vm1, %v1685_v61, %v6551_v1 }
 0x1f3   : > { %v1531_v37 = vsub.f32 %v1496_v43, %v1524_v6  ;;  %2310 = vmatpush.bf16.msrb.mxu1 %v5402_v24  ;;  %v1711_v43 = vshll.u32 %v6547_v3, 16  ;;  %vm1539_vm10 = vcmp.gt.f32.partialorder %v1532_v48, 0.5  ;;  %v2078_v61 = vrot.slane %v6566_v23, 7 }
 0x1f4   : > { %1993 = vmatmul.bf16.gmra.mxu2 %v1886_v52  ;;  %v7856_v52 = vcvt.s32.f32 %v6506_v34  ;;  %v1695_v63 = vshll.u32 %v1630_v9, 16  ;;  %v1707_v46 = vshrl.u32 %v1630_v9, 16  ;;  %vm6580_vm15 = vmpackc.low %vm1539_vm10, %vm1539_vm10  ;;  %vm1546_vm6 = vcmp.lt.f32.partialorder %v1532_v48, 5.5  ;;  %v1623_v45 = vld [vmem:[#allocation3 + $0x60] sm:$0x3] }
 0x1f5   : > { %vm1538_vm7 = vcmp.gt.f32.partialorder %v1531_v37, 0.5  ;;  %v1713_v24 = vrot.slane %v1711_v43, 1  ;;  %v6596_v60 = vsel %vm6580_vm15, %v6556_v32, 0  ;;  %v5400_v43 = vld [vmem:[%s7852_s4 + $0xc0] sm:$0xff]  ;;  %vm1545_vm13 = vcmp.lt.f32.partialorder %v1531_v37, 5.5  ;;  %vm6645_vm10 = vmpackc.low %vm1546_vm6, %vm1546_vm6 }
 0x1f6   : > { %v1505_v17 = vmul.f32 0.14285715, %v7856_v52  ;;  %v6574_v13 = vrot.slane %v1695_v63, 1  ;;  %vm6576_vm11 = vmpackc.low %vm1538_vm7, %vm1538_vm7  ;;  %v2092_v52 = vunpack.c.l.b16 %v2073_v57  ;;  %v7926_v44 = vsel %vm6645_vm10, 4294967295, %v7925_v44 }
 0x1f7   : > { %v6587_v15 = vsel %vm6576_vm11, %v6549_v35, 0  ;;  %2311 = vmatpush.bf16.msrb.mxu1 %v5401_v41  ;;  %v1881_v41 = vunpack.c.h.b16 %v6596_v60  ;;  %vm6620_vm14 = vmpackc.low %vm1545_vm13, %vm1545_vm13  ;;  %7927 = vst [vmem:[#allocation16_spill] sm:$0xff] %v7926_v44  ;;  %v1717_v8 = vshrl.u32 %v6547_v3, 16  ;;  %v6698_v44 = vpack.c.bf16 %v1623_v45, %v1623_v45 }
 0x1f8   : > { %v1512_v6 = vadd.f32 0.0001, %v1505_v17  ;;  %v1709_v9 = vor.u32 %v1707_v46, %v6574_v13  ;;  %v1879_v63 = vunpack.c.h.b16 %v6587_v15  ;;  %v2421_v46 = vor.u32 %v2420_v26, %v6400_v49  ;;  %1820 = vmatmul.bf16.gmra.mxu0 %v1690_v55  ;;  %v6613_v49 = vld [vmem:[#allocation3 + $0x8] sm:$0xfc]  ;;  %vm6639_vm7 = vmor %vm1273_vm4, %vm2071_vm0 }
 0x1f9   : > { %v1699_v17 = vshrl.u32 %v6512_v27, 16  ;;  %v2074_v26 = vrot.slane %v2073_v57, 4  ;;  %v5435_v27 = vld [vmem:[%s7852_s4 + $0x1d8] sm:$0xff]  ;;  %vm6655_vm13 = vcmp.ne.s32.totalorder %v2092_v52, %v6324_v0  ;;  %vm6660_vm4 = vcmp.ne.s32.totalorder %v2093_v38, %v6327_v42 }
 0x1fa   : > { %v1714_v11 = vsel %vm7874_vm1, %v1709_v9, %v1713_v24  ;;  %v1889_v14 = vpack.c.b16 %v1881_v41, %v1879_v63  ;;  %v1519_v25 = vfloor.f32 %v1512_v6  ;;  %v2077_v24 = vrot.slane %v2075_v50, 4  ;;  %v5431_v57 = vld [vmem:[%s7852_s4 + $0x1b8] sm:$0xff]  ;;  %2943 = vmatpush.bf16.msra.mxu3 %v5435_v27 }
 0x1fb   : > { %4691 = vmatmul.msk.bf16.vlgmr.msra.gmra.mxu1 %vm7877_vm2, %v1714_v11  ;;  %v7919_v6 = vmov 0  ;;  %v2080_v63 = vrot.slane %v2078_v61, 4  ;;  %v6635_v37 = vrot.slane %v2421_v46, 4  ;;  %v7928_v9 = vmov 0   ;;  %v1561_v52 = vld [vmem:[#allocation3 + $0x68] sm:$0x1] }
 0x1fc   : > { %2312 = vmatpush.bf16.msrb.mxu1 %v5400_v43  ;;  %4743 = vmatmul.msk.bf16.gmra.mxu3 %vm7877_vm2, %v1889_v14  ;;  %v7920_v6 = vsel %vm6620_vm14, 4294967295, %v7919_v6  ;;  %v7922_v43 = vrot.slane %v6572_v5, 7  ;;  %v6652_v11 = vsel %vm6576_vm11, 65537, %v7928_v9  ;;  %v6667_v48 = vsel %vm6620_vm14, 65537, %v7928_v9 }
 0x1fd   : > { %7921 = vst [vmem:[#allocation15_spill] sm:$0xff] %v7920_v6  ;;  %v1701_v56 = vor.u32 %v1699_v17, %v6551_v1  ;;  %v2040_v38 = vpack.c.bf16 %v6613_v49, %v6611_v18  ;;  %v1878_v27 = vunpack.c.l.b16 %v6587_v15  ;;  %v2076_v6 = vsel %vm6639_vm7, %v2074_v26, %v2075_v50 }
 0x1fe   : > { %v6633_v14 = vrot.slane %v7922_v43, 4  ;;  %7929 = vst [vmem:[#allocation17_spill] sm:$0xff] %v6652_v11  ;;  %v1526_v43 = vmul.f32 7.0, %v1519_v25  ;;  %v6672_v25 = vsel %vm6580_vm15, 65537, %v7928_v9  ;;  %v2079_v40 = vsel %vm6639_vm7, %v2077_v24, %v2078_v61 }
 0x1ff   : > { %v6686_v54 = vsel %vm6645_vm10, 65537, %v7928_v9  ;;  %v2424_v1 = vshll.u32 %v6652_v11, 16  ;;  %v2428_v18 = vshrl.u32 %v6652_v11, 16  ;;  %v7875_v3 = vrot.slane %v6672_v25, 5 }
 0x200   : > { %2911 = vmatpush.bf16.msra.mxu1 %v5431_v57  ;;  %v1560_v57 = vld [vmem:[#allocation3 + $0x60] sm:$0x1]  ;;  %v2434_v17 = vshll.u32 %v6672_v25, 16  ;;  %v1880_v50 = vunpack.c.l.b16 %v6596_v60  ;;  %v7934_v49 = vcvt.s32.f32 %v6506_v34  ;;  %v2099_v19 = vunpack.c.l.b16 %v2076_v6 }
 0x201   : > { %v3391_v26 = vrot.slane %v7875_v3, 4  ;;  %v1568_v24 = vpack.c.bf16 %v1561_v52, %v1560_v57  ;;  %v7935_v47 = vrot.slane %v6572_v5, 7  ;;  %v2100_v11 = vunpack.c.h.b16 %v2076_v6 }
 0x202   : > { %v1533_v61 = vsub.f32 %v7934_v49, %v1526_v43  ;;  %v1888_v53 = vpack.c.b16 %v1880_v50, %v1878_v27  ;;  %v1703_v60 = vshll.u32 %v6698_v44, 16  ;;  %vm6706_vm0 = vcmp.ne.s32.totalorder %v2099_v19, %v6324_v0 }
 0x203   : > { %v2082_v15 = vsel %vm6639_vm7, %v2080_v63, %v7935_v47  ;;  %v2106_v43 = vunpack.c.l.b16 %v2079_v40  ;;  %v2107_v45 = vunpack.c.h.b16 %v2079_v40  ;;  %vm6716_vm3 = vcmp.ne.s32.totalorder %v2100_v11, %v6327_v42  ;;  %v5418_v47 = vld [vmem:[%s7852_s4 + $0x150] sm:$0xff] }
 0x204   : > { %vm1540_vm11 = vcmp.gt.f32.partialorder %v1533_v61, 0.5  ;;  %1998 = vmatmul.bf16.gmra.mxu2 %v1888_v53  ;;  %vm1547_vm6 = vcmp.lt.f32.partialorder %v1533_v61, 5.5  ;;  %v2087_v6 = vrot.slane %v6686_v54, 7  ;;  %v2113_v53 = vunpack.c.l.b16 %v2082_v15 }
 0x205   : > { %vm1589_vm15 = vmpackc.low %vm1540_vm11, %vm1540_vm11  ;;  %v6727_v57 = vrot.slane %v2424_v1, 5  ;;  %v6729_v40 = vrot.slane %v2428_v18, 4  ;;  %v1705_v11 = vrot.slane %v1703_v60, 1  ;;  %vm6736_vm1 = vcmp.ne.s32.totalorder %v2106_v43, %v6324_v0  ;;  %v5420_v60 = vld [vmem:[%s7852_s4 + $0x160] sm:$0xff] }
 0x206   : > { %v6710_v52 = vsel %vm1589_vm15, %v1568_v24, 0  ;;  %v6713_v27 = vsel %vm1589_vm15, 65537, %v7928_v9  ;;  %v7942_v49 = vrot.slane %v6667_v48, 7  ;;  %vm6744_vm11 = vmpackc.low %vm1547_vm6, %vm1547_vm6  ;;  %vm6753_vm15 = vcmp.ne.s32.totalorder %v2107_v45, %v6327_v42  ;;  %v5430_v45 = vld [vmem:[%s7852_s4 + $0x1b0] sm:$0xff] }
 0x207   : > { %v1883_v19 = vunpack.c.h.b16 %v6710_v52  ;;  %v3392_v63 = vrot.slane %v6713_v27, 5  ;;  %v6757_v43 = vrot.slane %v2434_v17, 5  ;;  %vm7947_vm10 = vsmask.f32 7424  ;;  %vm2112_vm6 = vmpackc.low %vm6753_vm15, %vm6736_vm1  ;;  %v5419_v17 = vld [vmem:[%s7852_s4 + $0x158] sm:$0xff]  ;;  %2912 = vmatpush.bf16.msra.mxu1 %v5430_v45 }
 0x208   : > { %v2086_v24 = vrot.slane %v7942_v49, 4  ;;  %v2438_v49 = vshrl.u32 %v6672_v25, 16  ;;  %v1706_v61 = vsel %vm7947_vm10, %v1701_v56, %v1705_v11  ;;  %vm6777_vm10 = vcmp.ne.s32.totalorder %v2113_v53, %v6324_v0  ;;  %vm7950_vm1 = vmpackc.low %vm6660_vm4, %vm6655_vm13  ;;  %2717 = vmatpush.bf16.msra.mxu0 %v5419_v17  ;;  %v5423_v53 = vld [vmem:[%s7852_s4 + $0x178] sm:$0xff] }
 0x209   : > { %v1891_v3 = vpack.c.b16 %v1883_v19, %v1883_v19  ;;  %v6750_v18 = vsel %vm6340_vm12, %v3391_v26, %v3392_v63  ;;  %v2114_v26 = vunpack.c.h.b16 %v2082_v15  ;;  %v6774_v19 = vrot.slane %v2087_v6, 4  ;;  %1825 = vmatmul.bf16.gmra.mxu0 %v1706_v61  ;;  %vm7951_vm15 = vmpackc.low %vm6716_vm3, %vm6706_vm0  ;;  %2749 = vmatpush.bf16.msra.mxu2 %v5423_v53 }
 0x20a   : > { %v2141_v56 = vsel %vm7950_vm1, %v2040_v38, 0  ;;  %v2142_v15 = vsel %vm7951_vm15, %v6392_v2, 0  ;;  %v6796_v63 = vsel %vm6286_vm5, %v6635_v37, %v6727_v57  ;;  %v2431_v55 = vor.u32 %v6729_v40, %v6727_v57  ;;  %v5434_v2 = vld [vmem:[%s7852_s4 + $0x1d0] sm:$0xff]  ;;  %v5429_v38 = vld [vmem:[%s7852_s4 + $0x1a8] sm:$0xff] }
 0x20b   : > { %4692 = vmatmul.msk.bf16.gmra.mxu1 %vm7877_vm2, %v1717_v8  ;;  %vm2118_vm13 = vcmp.ne.s32.totalorder %v2114_v26, %v6327_v42  ;;  %v2143_v46 = vsel %vm2112_vm6, %v6412_v36, 0  ;;  %v6812_v37 = vsel %vm6744_vm11, 65537, %v7928_v9  ;;  %v2182_v34 = vunpack.c.l.b16 %v2142_v15  ;;  %2944 = vmatpush.bf16.msra.mxu3 %v5434_v2 }
 0x20c   : > { %4744 = vmatmul.msk.bf16.gmra.mxu3 %vm7877_vm2, %v1891_v3  ;;  %vm2119_vm3 = vmpackc.low %vm2118_vm13, %vm6777_vm10  ;;  %v2180_v3 = vunpack.c.l.b16 %v2141_v56  ;;  %v2184_v36 = vunpack.c.l.b16 %v2143_v46  ;;  %v1882_v9 = vunpack.c.l.b16 %v6710_v52  ;;  %v2181_v40 = vunpack.c.h.b16 %v2141_v56  ;;  %2913 = vmatpush.bf16.msra.mxu1 %v5429_v38 }
 0x20d   : > { %v2144_v57 = vsel %vm2119_vm3, %v6423_v39, 0  ;;  %v2183_v11 = vunpack.c.h.b16 %v2142_v15  ;;  %v7952_v50 = vunpack.c.l.b16 %v6262_v51  ;;  %v7955_v61 = vunpack.c.h.b16 %v6262_v51  ;;  %2718 = vmatpush.bf16.msra.mxu0 %v5418_v47 }
 0x20e   : > { %v2186_v39 = vunpack.c.l.b16 %v2144_v57  ;;  %v2194_v45 = vpack.c.b16 %v2182_v34, %v2180_v3  ;;  %v2185_v52 = vunpack.c.h.b16 %v2143_v46  ;;  %v2187_v17 = vunpack.c.h.b16 %v2144_v57  ;;  %v1622_v46 = vld [vmem:[#allocation3 + $0x8] sm:$0xfe]  ;;  %v5417_v3 = vld [vmem:[%s7852_s4 + $0x148] sm:$0xff] }
 0x20f   : > { %vm6827_vm4 = vcmp.ne.s32.totalorder %v7952_v50, %v6324_v0  ;;  %vm6834_vm0 = vcmp.ne.s32.totalorder %v7955_v61, %v6327_v42  ;;  %v6838_v8 = vrot.slane %v2438_v49, 4  ;;  %v2090_v56 = vrot.slane %v6812_v37, 7 }
 0x210   : > { %vm2202_vm6 = vcmask 1046528   ;;  %v7958_v15 = vrot.slane %v6667_v48, 7  ;;  %v6846_v2 = vpack.c.b16 %v2186_v39, %v2184_v36  ;;  %v2195_v50 = vpack.c.b16 %v2183_v11, %v2181_v40 }
 0x211   : > { %v6848_v61 = vpack.c.b16 %v2187_v17, %v2185_v52  ;;  %v2088_v49 = vsel %vm6639_vm7, %v2086_v24, %v2087_v6  ;;  %v1890_v34 = vpack.c.b16 %v1882_v9, %v1882_v9  ;;  %v2203_v36 = vrot.slane %v2194_v45, 1  ;;  %2719 = vmatpush.bf16.msra.mxu0 %v5417_v3 }
 0x212   : > { %v2085_v51 = vsel %vm6639_vm7, %v6633_v14, %v7958_v15  ;;  %v2127_v38 = vunpack.c.l.b16 %v2088_v49  ;;  %v2204_v57 = vrot.slane %v6846_v2, 1  ;;  %v2128_v40 = vunpack.c.h.b16 %v2088_v49  ;;  %v5412_v2 = vld [vmem:[%s7852_s4 + $0x120] sm:$0xff] }
 0x213   : > { %v2120_v53 = vunpack.c.l.b16 %v2085_v51  ;;  %v2121_v14 = vunpack.c.h.b16 %v2085_v51  ;;  %v7959_v11 = vunpack.c.h.b16 %v6375_v29  ;;  %v7960_v39 = vunpack.c.h.b16 %v6405_v62 }
 0x214   : > { %vm6867_vm15 = vcmp.ne.s32.totalorder %v2127_v38, %v6324_v0  ;;  %v1626_v24 = vpack.c.bf16 %v6383_v10, %v1622_v46  ;;  %v2206_v47 = vrot.slane %v2195_v50, 1  ;;  %v2207_v9 = vrot.slane %v6848_v61, 1  ;;  %2003 = vmatmul.bf16.gmra.mxu2 %v1890_v34  ;;  %v5416_v10 = vld [vmem:[%s7852_s4 + $0x140] sm:$0xff]  ;;  %v5422_v34 = vld [vmem:[%s7852_s4 + $0x170] sm:$0xff] }
 0x215   : > { %v6862_v52 = vpack.c.b16 %v7960_v39, %v7959_v11  ;;  %vm2124_vm10 = vcmp.ne.s32.totalorder %v2120_v53, %v6324_v0  ;;  %vm2125_vm1 = vcmp.ne.s32.totalorder %v2121_v14, %v6327_v42  ;;  %vm2132_vm3 = vcmp.ne.s32.totalorder %v2128_v40, %v6327_v42  ;;  %v2368_v53 = vld [vmem:[#allocation3] sm:$0x80]  ;;  %v2369_v14 = vld [vmem:[#allocation3 + $0x8] sm:$0x80]  ;;  %2720 = vmatpush.bf16.msra.mxu0 %v5416_v10 }
 0x216   : > { %vm2126_vm13 = vmpackc.low %vm2125_vm1, %vm2124_vm10  ;;  %v1628_v29 = vpack.c.bf16 %v6419_v12, %v6396_v59  ;;  %v2432_v62 = vrot.slane %v2431_v55, 4  ;;  %v1672_v17 = vshrl.u32 %v1626_v24, 16  ;;  %v1674_v15 = vshll.u32 %v1626_v24, 16  ;;  %2750 = vmatpush.bf16.msra.mxu2 %v5422_v34 }
 0x217   : > { %vm2133_vm2 = vmpackc.low %vm2132_vm3, %vm6867_vm15  ;;  %v2145_v45 = vsel %vm2126_vm13, %v6549_v35, 0  ;;  %v2205_v51 = vsel %vm2202_vm6, %v2203_v36, %v2204_v57  ;;  %v1715_v59 = vshrl.u32 %v6698_v44, 16  ;;  %v2091_v3 = vsel %vm6639_vm7, %v6774_v19, %v2090_v56  ;;  %v5428_v19 = vld [vmem:[%s7852_s4 + $0x1a0] sm:$0xff]  ;;  %v5415_v56 = vld [vmem:[%s7852_s4 + $0x138] sm:$0xff] }
 0x218   : > { %v2146_v12 = vsel %vm2133_vm2, %v6556_v32, 0  ;;  %v1679_v55 = vshll.u32 %v1628_v29, 16  ;;  %v2188_v50 = vunpack.c.l.b16 %v2145_v45  ;;  %v1676_v46 = vrot.slane %v1674_v15, 1  ;;  %vm2454_vm2 = vmpackc.low %vm6834_vm0, %vm6827_vm4  ;;  %2914 = vmatpush.bf16.msra.mxu1 %v5428_v19 }
 0x219   : > { %v2190_v49 = vunpack.c.l.b16 %v2146_v12  ;;  %v2208_v44 = vsel %vm2202_vm6, %v2206_v47, %v2207_v9  ;;  %v2189_v38 = vunpack.c.h.b16 %v2145_v45  ;;  %v1691_v40 = vshrl.u32 %v1628_v29, 16  ;;  %1830 = vmatmul.bf16.gmra.mxu0 %v1715_v59  ;;  %v5433_v59 = vld [vmem:[%s7852_s4 + $0x1c8] sm:$0xff] }
 0x21a   : > { %v1681_v36 = vrot.slane %v1679_v55, 1  ;;  %v2191_v11 = vunpack.c.h.b16 %v2146_v12  ;;  %v1677_v39 = vor.u32 %v1676_v46, %v1672_v17  ;;  %v2134_v6 = vunpack.c.l.b16 %v2091_v3  ;;  %v5421_v12 = vld [vmem:[%s7852_s4 + $0x168] sm:$0xff]  ;;  %v2039_v55 = vld [vmem:[#allocation3 + $0x68] sm:$0x7]  ;;  %2721 = vmatpush.bf16.msra.mxu0 %v5415_v56  ;;  %v5414_v46 = vld [vmem:[%s7852_s4 + $0x130] sm:$0xff]  ;;  %2945 = vmatpush.bf16.msra.mxu3 %v5433_v59 }
 0x21b   : > { %2313 = vmatmul.bf16.vlgmr.msrb.gmra.mxu1 %v2205_v51  ;;  %v2135_v41 = vunpack.c.h.b16 %v2091_v3  ;;  %v2441_v24 = vor.u32 %v6838_v8, %v6757_v43  ;;  %v2476_v47 = vunpack.c.l.b16 %v6796_v63  ;;  %v2372_v45 = vpack.c.bf16 %v2369_v14, %v2368_v53  ;;  %v2038_v51 = vld [vmem:[#allocation3 + $0x60] sm:$0x7]  ;;  %2751 = vmatpush.bf16.msra.mxu2 %v5421_v12  ;;  %v5413_v56 = vld [vmem:[%s7852_s4 + $0x128] sm:$0xff] }
 0x21c   : > { %v1693_v29 = vor.u32 %v1691_v40, %v1681_v36  ;;  %v6912_v17 = vsel %vm6286_vm5, %v2432_v62, %v6757_v43  ;;  %vm7963_vm7 = vcmask 523264   ;;  %v6915_v15 = vpack.c.b16 %v2190_v49, %v2188_v50  ;;  %v5427_v49 = vld [vmem:[%s7852_s4 + $0x198] sm:$0xff] }
 0x21d   : > { %4817 = vmatmul.msk.bf16.vlgmr.msrb.gmra.mxu3 %vm7963_vm7, %v2208_v44  ;;  %vm7964_vm10 = vsmask.f32 7424  ;;  %v2541_v62 = vunpack.c.h.b16 %v6461_v7  ;;  %v2497_v3 = vsel %vm2454_vm2, %v2372_v45, 0  ;;  %v2539_v34 = vunpack.c.h.b16 %v6408_v21  ;;  %2915 = vmatpush.bf16.msra.mxu1 %v5427_v49  ;;  %vm7970_vm0 = vmmov %vm7963_vm7 }
 0x21e   : > { %v6918_v10 = vsel %vm7964_vm10, %v1677_v39, %v1681_v36  ;;  %vm7965_vm1 = vmmov %vm7964_vm10  ;;  %v2477_v53 = vunpack.c.h.b16 %v6796_v63  ;;  %v6945_v14 = vpack.c.b16 %v2191_v11, %v2189_v38  ;;  %vm6948_vm15 = vcmp.ne.s32.totalorder %v2134_v6, %v6324_v0  ;;  %2722 = vmatpush.bf16.msra.mxu0 %v5414_v46 }
 0x21f   : > { %v6929_v50 = vsel %vm7965_vm1, %v1693_v29, %v6574_v13  ;;  %v2543_v13 = vunpack.c.h.b16 %v6464_v22  ;;  %vm6953_vm13 = vcmp.ne.s32.totalorder %v2135_v41, %v6327_v42  ;;  %v2483_v36 = vunpack.c.l.b16 %v6912_v17  ;;  %2752 = vmatpush.bf16.msra.mxu2 %v5420_v60 }
 0x220   : > { %v2484_v38 = vunpack.c.h.b16 %v6912_v17  ;;  %v2537_v40 = vunpack.c.h.b16 %v2497_v3  ;;  %v2209_v39 = vrot.slane %v6915_v15, 1  ;;  %v2041_v6 = vpack.c.bf16 %v2039_v55, %v2038_v51  ;;  %vm2140_vm4 = vmpackc.low %vm6953_vm13, %vm6948_vm15 }
 0x221   : > { %v2553_v11 = vpack.c.b16 %v2543_v13, %v2541_v62  ;;  %v2536_v41 = vunpack.c.l.b16 %v2497_v3  ;;  %v2538_v19 = vunpack.c.l.b16 %v6408_v21  ;;  %v2540_v59 = vunpack.c.l.b16 %v6461_v7 }
 0x222   : > { %v2551_v29 = vpack.c.b16 %v2539_v34, %v2537_v40  ;;  %v2444_v51 = vshll.u32 %v6713_v27, 16  ;;  %v2211_v12 = vrot.slane %v6945_v14, 1  ;;  %v2542_v21 = vunpack.c.l.b16 %v6464_v22  ;;  %2723 = vmatpush.bf16.msra.mxu0 %v5413_v56 }
 0x223   : > { %v2585_v45 = vshrl.u32 %v2553_v11, 16  ;;  %v2588_v17 = vshll.u32 %v2553_v11, 16  ;;  %v2550_v62 = vpack.c.b16 %v2538_v19, %v2536_v41  ;;  %v2210_v34 = vsel %vm2202_vm6, %v2204_v57, %v2209_v39 }
 0x224   : > { %v2577_v55 = vshrl.u32 %v2551_v29, 16  ;;  %v2580_v49 = vshll.u32 %v2551_v29, 16  ;;  %v2147_v7 = vsel %vm2140_vm4, %v2041_v6, 0  ;;  %v2552_v27 = vpack.c.b16 %v2542_v21, %v2540_v59  ;;  %4741 = vmatmul.msk.bf16.vlgmr.msrb.gmra.mxu2 %vm7970_vm0, %v6862_v52  ;;  %vm7971_vm4 = vmmov %vm7970_vm0 }
 0x225   : > { %v2587_v46 = vrot.slane %v2585_v45, 3  ;;  %v2590_v3 = vrot.slane %v2588_v17, 4  ;;  %v2560_v13 = vshrl.u32 %v2550_v62, 16  ;;  %v2563_v11 = vshll.u32 %v2550_v62, 16 }
 0x226   : > { %v2579_v22 = vrot.slane %v2577_v55, 3  ;;  %v2582_v60 = vrot.slane %v2580_v49, 4  ;;  %vm7878_vm3 = vsmask.f32 4352  ;;  %v2568_v44 = vshrl.u32 %v2552_v27, 16  ;;  %2724 = vmatpush.bf16.msra.mxu0 %v5412_v2  ;;  %v5424_v55 = vld [vmem:[%s7852_s4 + $0x180] sm:$0xff] }
 0x227   : > { %v6985_v40 = vor.u32 %v2590_v3, %v2587_v46  ;;  %v2562_v57 = vrot.slane %v2560_v13, 3  ;;  %v2571_v26 = vshll.u32 %v2552_v27, 16  ;;  %v2565_v41 = vrot.slane %v2563_v11, 4 }
 0x228   : > { %v2583_v6 = vor.u32 %v2582_v60, %v2579_v22  ;;  %vm2480_vm2 = vcmp.ne.s32.totalorder %v2476_v47, %v6324_v0  ;;  %vm2481_vm7 = vcmp.ne.s32.totalorder %v2477_v53, %v6327_v42  ;;  %v2570_v19 = vrot.slane %v2568_v44, 3  ;;  %v5426_v53 = vld [vmem:[%s7852_s4 + $0x190] sm:$0xff] }
 0x229   : > { %v2573_v56 = vrot.slane %v2571_v26, 4  ;;  %vm2482_vm10 = vmpackc.low %vm2481_vm7, %vm2480_vm2  ;;  %vm2487_vm1 = vcmp.ne.s32.totalorder %v2483_v36, %v6324_v0  ;;  %vm2488_vm15 = vcmp.ne.s32.totalorder %v2484_v38, %v6327_v42  ;;  %v2212_v52 = vsel %vm2202_vm6, %v2207_v9, %v2211_v12  ;;  %4689 = vmatmul.msk.bf16.vlgmr.msrb.gmra.mxu0 %vm7971_vm4, %v6918_v10  ;;  %2916 = vmatpush.bf16.msra.mxu1 %v5426_v53  ;;  %v5425_v10 = vld [vmem:[%s7852_s4 + $0x188] sm:$0xff] }
 0x22a   : > { %v2592_v29 = vsel %vm7878_vm3, %v2583_v6, %v6985_v40  ;;  %v2566_v63 = vor.u32 %v2565_v41, %v2562_v57  ;;  %vm2489_vm13 = vmpackc.low %vm2488_vm15, %vm2487_vm1  ;;  %v2501_v47 = vsel %vm2482_vm10, %v6549_v35, 0  ;;  %v2192_v61 = vunpack.c.l.b16 %v2147_v7  ;;  %v5432_v35 = vld [vmem:[%s7852_s4 + $0x1c0] sm:$0xff] }
 0x22b   : > { %2318 = vmatmul.bf16.gmra.mxu1 %v2210_v34  ;;  %v2574_v36 = vor.u32 %v2573_v56, %v2570_v19  ;;  %v2502_v38 = vsel %vm2489_vm13, %v6556_v32, 0  ;;  %v2545_v45 = vunpack.c.h.b16 %v2501_v47  ;;  %v2442_v17 = vrot.slane %v2441_v24, 4  ;;  %2946 = vmatpush.bf16.msra.mxu3 %v5432_v35  ;;  %vm7974_vm1 = vmmov %vm7970_vm0 }
 0x22c   : > { %v2547_v9 = vunpack.c.h.b16 %v2502_v38  ;;  %v2446_v59 = vrot.slane %v2444_v51, 5  ;;  %v2193_v21 = vunpack.c.h.b16 %v2147_v7  ;;  %v7025_v43 = vpack.c.b16 %v2192_v61, %v2192_v61  ;;  %vm7975_vm15 = vmmov %vm7970_vm0  ;;  %v5443_v61 = vld [vmem:[%s7852_s4 + $0x218] sm:$0xff] }
 0x22d   : > { %4818 = vmatmul.msk.bf16.gmra.mxu3 %vm7970_vm0, %v2212_v52  ;;  %v7020_v32 = vsel %vm7878_vm3, %v2566_v63, %v2574_v36  ;;  %2917 = vmatpush.bf16.msra.mxu1 %v5425_v10  ;;  %v2544_v49 = vunpack.c.l.b16 %v2501_v47  ;;  %v2546_v46 = vunpack.c.l.b16 %v2502_v38  ;;  %v2989_v3 = vshrl.u32 %v6534_v30, 16  ;;  %v7049_v47 = vld [vmem:[#allocation3 + $0x68] sm:$0xff] }
 0x22e   : > { %v2555_v62 = vpack.c.b16 %v2547_v9, %v2545_v45  ;;  %v2447_v51 = vsel %vm6286_vm5, %v2442_v17, %v2446_v59  ;;  %v7033_v34 = vpack.c.b16 %v2193_v21, %v2193_v21  ;;  %v2997_v13 = vshrl.u32 %v6561_v33, 16  ;;  %vm7972_vm5 = vmmov %vm7970_vm0  ;;  %v5455_v9 = vld [vmem:[%s7852_s4 + $0x278] sm:$0xff]  ;;  %3303 = vmatpush.bf16.msrb.mxu0 %v5443_v61 }
 0x22f   : > { %v2554_v22 = vpack.c.b16 %v2546_v46, %v2544_v49  ;;  %v2490_v60 = vunpack.c.l.b16 %v2447_v51  ;;  %v2491_v11 = vunpack.c.h.b16 %v2447_v51  ;;  %v2213_v58 = vrot.slane %v7025_v43, 1 }
 0x230   : > { %v2603_v8 = vshrl.u32 %v2555_v62, 16  ;;  %v2606_v24 = vshll.u32 %v2555_v62, 16  ;;  %v7039_v26 = vrot.slane %v2989_v3, 7  ;;  %v2215_v6 = vrot.slane %v7033_v34, 1 }
 0x231   : > { %2918 = vmatpush.bf16.msra.mxu1 %v5424_v55  ;;  %v2594_v57 = vshrl.u32 %v2554_v22, 16  ;;  %v2597_v44 = vshll.u32 %v2554_v22, 16  ;;  %v7045_v19 = vrot.slane %v2997_v13, 7  ;;  %v3000_v56 = vshll.u32 %v6561_v33, 16 }
 0x232   : > { %v2605_v7 = vrot.slane %v2603_v8, 3  ;;  %v2608_v27 = vrot.slane %v2606_v24, 4  ;;  %v2214_v53 = vsel %vm2202_vm6, %v2209_v39, %v2213_v58  ;;  %vm2494_vm2 = vcmp.ne.s32.totalorder %v2490_v60, %v6324_v0 }
 0x233   : > { %v2596_v52 = vrot.slane %v2594_v57, 3  ;;  %v2599_v63 = vrot.slane %v2597_v44, 4  ;;  %vm2495_vm7 = vcmp.ne.s32.totalorder %v2491_v11, %v6327_v42  ;;  %v2995_v15 = vrot.slane %v7039_v26, 4  ;;  %v5446_v44 = vld [vmem:[%s7852_s4 + $0x230] sm:$0xff] }
 0x234   : > { %v7037_v2 = vor.u32 %v2608_v27, %v2605_v7  ;;  %4893 = vmatmul.msk.bf16.vlgmr.msra.gmra.mxu2 %vm7972_vm5, %v2592_v29  ;;  %v2216_v29 = vsel %vm2202_vm6, %v2211_v12, %v2215_v6  ;;  %vm2496_vm10 = vmpackc.low %vm2495_vm7, %vm2494_vm2  ;;  %v3002_v39 = vor.u32 %v3000_v56, %v7045_v19  ;;  %vm2985_vm13 = vsmask.f32 256  ;;  %v5447_v12 = vld [vmem:[%s7852_s4 + $0x238] sm:$0xff] }
 0x235   : > { %v7056_v38 = vor.u32 %v2599_v63, %v2596_v52  ;;  %vm2986_vm4 = vsmask.f32 4368  ;;  %3335 = vmatpush.bf16.msrb.mxu2 %v5447_v12  ;;  %3607 = vmatpush.bf16.msrb.mxu1 %v5455_v9  ;;  %v3006_v59 = vshrl.u32 %v6566_v23, 16  ;;  %v3015_v35 = vshrl.u32 %v6572_v5, 16  ;;  %vm7979_vm5 = vmmov %vm7970_vm0  ;;  %v5453_v63 = vld [vmem:[%s7852_s4 + $0x268] sm:$0xff] }
 0x236   : > { %v2610_v41 = vsel %vm7878_vm3, %v6985_v40, %v7037_v2  ;;  %v7973_v40 = vmax.f32 %v6515_v16, 0.0  ;;  %vm7076_vm6 = vmor %vm2985_vm13, %vm2986_vm4  ;;  %v3009_v62 = vshll.u32 %v6566_v23, 16  ;;  %v3018_v8 = vshll.u32 %v6572_v5, 16  ;;  %v5454_v5 = vld [vmem:[%s7852_s4 + $0x270] sm:$0xff] }
 0x237   : > { %v7070_v45 = vsel %vm7878_vm3, %v2574_v36, %v7056_v38  ;;  %v5459_v36 = vld [vmem:[%s7852_s4 + $0x298] sm:$0xff]  ;;  %v3008_v21 = vrot.slane %v3006_v59, 7  ;;  %v7097_v43 = vrot.slane %v3015_v35, 7  ;;  %v3380_v24 = vrot.slane %v6347_v28, 5  ;;  %v5442_v28 = vld [vmem:[%s7852_s4 + $0x210] sm:$0xff] }
 0x238   : > { %v7061_v33 = vpack.c.bf16 %v7049_v47, %v7973_v40  ;;  %3639 = vmatpush.bf16.msrb.mxu3 %v5459_v36  ;;  %v3004_v49 = vrot.slane %v7045_v19, 4  ;;  %v7978_v46 = vrot.slane %v6246_v4, 5  ;;  %v2992_v23 = vshll.u32 %v6534_v30, 16  ;;  %3304 = vmatpush.bf16.msrb.mxu0 %v5442_v28 }
 0x239   : > { %4690 = vmatmul.msk.bf16.gmra.mxu0 %vm7974_vm1, %v6929_v50  ;;  %v3003_v50 = vsel %vm7076_vm6, %v2995_v15, %v3002_v39  ;;  %v3011_v34 = vor.u32 %v3009_v62, %v3008_v21  ;;  %v3013_v7 = vrot.slane %v3008_v21, 4  ;;  %v3020_v27 = vor.u32 %v3018_v8, %v7097_v43  ;;  %3608 = vmatpush.bf16.msrb.mxu1 %v5454_v5  ;;  %v7174_v62 = vld [vmem:[#allocation3 + $0x20] sm:$0xff]  ;;  %v7176_v8 = vld [vmem:[#allocation3 + $0x30] sm:$0xff]  ;;  %v7992_v5 = vld [vmem:[#allocation17_spill] sm:$0xff] }
 0x23a   : > { %v2503_v16 = vsel %vm2496_vm10, %v7061_v33, 0  ;;  %v3379_v3 = vrot.slane %v7978_v46, 4  ;;  %v3383_v13 = vrot.slane %v6352_v20, 5  ;;  %v3382_v22 = vrot.slane %v3380_v24, 4  ;;  %3336 = vmatpush.bf16.msrb.mxu2 %v5446_v44  ;;  %v7196_v46 = vld [vmem:[#allocation3 + $0x48] sm:$0xff]  ;;  %v5440_v44 = vld [vmem:[%s7852_s4 + $0x200] sm:$0xff] }
 0x23b   : > { %2323 = vmatmul.bf16.gmra.mxu1 %v2214_v53  ;;  %v2549_v17 = vunpack.c.h.b16 %v2503_v16  ;;  %v2548_v11 = vunpack.c.l.b16 %v2503_v16  ;;  %v3024_v30 = vshrl.u32 %v6667_v48, 16  ;;  %v3053_v57 = vunpack.c.h.b16 %v3003_v50 }
 0x23c   : > { %v3033_v19 = vshrl.u32 %v6686_v54, 16  ;;  %v3021_v56 = vsel %vm7076_vm6, %v3013_v7, %v3020_v27  ;;  %v7135_v52 = vsel %vm6340_vm12, %v3379_v3, %v3380_v24  ;;  %v2994_v39 = vor.u32 %v2992_v23, %v7039_v26  ;;  %v7198_v27 = vld [vmem:[#allocation3 + $0x28] sm:$0xff] }
 0x23d   : > { %4819 = vmatmul.msk.bf16.gmra.mxu3 %vm7975_vm15, %v2216_v29  ;;  %v2557_v10 = vpack.c.b16 %v2549_v17, %v2549_v17  ;;  %v3066_v29 = vunpack.c.l.b16 %v3021_v56  ;;  %v3067_v15 = vunpack.c.h.b16 %v3021_v56  ;;  %v7146_v12 = vsel %vm6340_vm12, %v3382_v22, %v3383_v13  ;;  %v2780_v17 = vld [vmem:[#allocation3 + $0x10] sm:$0xff]  ;;  %3609 = vmatpush.bf16.msrb.mxu1 %v5453_v63 }
 0x23e   : > { %v2556_v36 = vpack.c.b16 %v2548_v11, %v2548_v11  ;;  %vm7154_vm7 = vcmp.ne.s32.totalorder %v3053_v57, %v6327_v42  ;;  %v7158_v26 = vrot.slane %v3024_v30, 7  ;;  %v3027_v9 = vshll.u32 %v6667_v48, 16  ;;  %v2786_v48 = vld [vmem:[#allocation3 + $0x40] sm:$0xff] }
 0x23f   : > { %v2621_v51 = vshrl.u32 %v2557_v10, 16  ;;  %v2624_v55 = vshll.u32 %v2557_v10, 16  ;;  %v7171_v10 = vrot.slane %v3033_v19, 7  ;;  %v3036_v21 = vshll.u32 %v6686_v54, 16 }
 0x240   : > { %vm7179_vm15 = vcmp.ne.s32.totalorder %v3066_v29, %v6324_v0  ;;  %vm7184_vm13 = vcmp.ne.s32.totalorder %v3067_v15, %v6327_v42  ;;  %v2612_v3 = vshrl.u32 %v2556_v36, 16  ;;  %v3046_v7 = vunpack.c.h.b16 %v2994_v39 }
 0x241   : > { %v7115_v4 = vrot.slane %v2621_v51, 3  ;;  %v2626_v60 = vrot.slane %v2624_v55, 4  ;;  %v3045_v55 = vunpack.c.l.b16 %v2994_v39  ;;  %v7205_v28 = vpack.c.bf16 %v7196_v46, %v2786_v48 }
 0x242   : > { %v3386_v22 = vrot.slane %v7992_v5, 5  ;;  %v7215_v11 = vpack.c.bf16 %v7198_v27, %v7174_v62  ;;  %v3029_v30 = vor.u32 %v3027_v9, %v7158_v26  ;;  %v3038_v57 = vor.u32 %v3036_v21, %v7171_v10 }
 0x243   : > { %v2627_v16 = vor.u32 %v2626_v60, %v7115_v4  ;;  %v2781_v60 = vld [vmem:[#allocation3 + $0x18] sm:$0xff]  ;;  %v7229_v19 = vrot.slane %v2612_v3, 3  ;;  %v3385_v15 = vrot.slane %v3383_v13, 4  ;;  %v3408_v3 = vunpack.c.l.b16 %v7135_v52 }
 0x244   : > { %4894 = vmatmul.msk.bf16.gmra.mxu2 %vm7970_vm0, %v2610_v41  ;;  %v5458_v41 = vld [vmem:[%s7852_s4 + $0x290] sm:$0xff]  ;;  %v2795_v63 = vpack.c.bf16 %v7198_v27, %v2781_v60  ;;  %v3388_v39 = vrot.slane %v3386_v22, 4  ;;  %v7995_v5 = vrot.slane %v6672_v25, 5 }
 0x245   : > { %3640 = vmatpush.bf16.msrb.mxu3 %v5458_v41  ;;  %v2628_v54 = vsel %vm7878_vm3, %v7037_v2, %v2627_v16  ;;  %v3022_v2 = vrot.slane %v7097_v43, 4  ;;  %v2794_v43 = vpack.c.bf16 %v7174_v62, %v2780_v17  ;;  %vm7993_vm3 = vcmask 523264   ;;  %v2974_v41 = vld [vmem:[#allocation3 + $0x10] sm:$0xfe]  ;;  %v5445_v17 = vld [vmem:[%s7852_s4 + $0x228] sm:$0xff] }
 0x246   : > { %v5452_v16 = vld [vmem:[%s7852_s4 + $0x260] sm:$0xff]  ;;  %v3390_v60 = vsel %vm6340_vm12, %v3388_v39, %v7995_v5  ;;  %3337 = vmatpush.bf16.msrb.mxu2 %v5445_v17 }
 0x247   : > { %3610 = vmatpush.bf16.msrb.mxu1 %v5452_v16  ;;  %v3030_v13 = vsel %vm7076_vm6, %v3022_v2, %v3029_v30  ;;  %v7290_v2 = vsel %vm6340_vm12, %v3385_v15, %v3386_v22  ;;  %v5451_v22 = vld [vmem:[%s7852_s4 + $0x258] sm:$0xff]  ;;  %v3409_v16 = vunpack.c.h.b16 %v7135_v52  ;;  %v5436_v5 = vld [vmem:[%s7852_s4 + $0x1e0] sm:$0xff] }
 0x248   : > { %v3073_v21 = vunpack.c.l.b16 %v3030_v13  ;;  %v3074_v24 = vunpack.c.h.b16 %v3030_v13 }
 0x249   : > { %2725 = vmatmul.bf16.vlgmr.msra.gmra.mxu0 %v7020_v32  ;;  %v5441_v32 = vld [vmem:[%s7852_s4 + $0x208] sm:$0xff] }
 0x24a   : > { %3305 = vmatpush.bf16.msrb.mxu0 %v5441_v32  ;;  %v2975_v32 = vld [vmem:[#allocation3 + $0x18] sm:$0xfe]  ;;  %vm7313_vm12 = vcmp.ne.s32.totalorder %v3074_v24, %v6327_v42 }
 0x24b   : > { %2328 = vmatmul.bf16.gmra.mxu1 %v2213_v58  ;;  %v3052_v58 = vunpack.c.l.b16 %v3003_v50  ;;  %v2978_v56 = vpack.c.bf16 %v2975_v32, %v2974_v41  ;;  %v3430_v41 = vunpack.c.h.b16 %v3390_v60 }
 0x24c   : > { %3611 = vmatpush.bf16.msrb.mxu1 %v5451_v22 }
 0x24d   : > { %4820 = vmatmul.msk.bf16.gmra.mxu3 %vm7979_vm5, %v2215_v6  ;;  %v3012_v6 = vsel %vm7076_vm6, %v3004_v49, %v3011_v34  ;;  %vm7149_vm2 = vcmp.ne.s32.totalorder %v3052_v58, %v6324_v0  ;;  %v7194_v49 = vld [vmem:[#allocation3 + $0x38] sm:$0xff]  ;;  %v2615_v34 = vshll.u32 %v2556_v36, 16  ;;  %vm3072_vm5 = vmpackc.low %vm7184_vm13, %vm7179_vm15  ;;  %v3031_v58 = vrot.slane %v7158_v26, 4  ;;  %v5439_v36 = vld [vmem:[%s7852_s4 + $0x1f8] sm:$0xff] }
 0x24e   : > { %v3059_v53 = vunpack.c.l.b16 %v3012_v6  ;;  %v3060_v40 = vunpack.c.h.b16 %v3012_v6  ;;  %vm3058_vm4 = vmpackc.low %vm7154_vm7, %vm7149_vm2  ;;  %v7202_v23 = vpack.c.bf16 %v7194_v49, %v7176_v8  ;;  %vm3049_vm15 = vcmp.ne.s32.totalorder %v3045_v55, %v6324_v0  ;;  %3306 = vmatpush.bf16.msrb.mxu0 %v5440_v44 }
 0x24f   : > { %v2617_v6 = vrot.slane %v2615_v34, 4  ;;  %v7251_v29 = vsel %vm3058_vm4, %v7215_v11, 0  ;;  %vm7994_vm2 = vcmask 523264   ;;  %v3039_v9 = vsel %vm7076_vm6, %v3031_v58, %v3038_v57  ;;  %v7284_v34 = vld [vmem:[#allocation3 + $0x50] sm:$0xff] }
 0x250   : > { %vm7162_vm10 = vcmp.ne.s32.totalorder %v3059_v53, %v6324_v0  ;;  %vm7167_vm1 = vcmp.ne.s32.totalorder %v3060_v40, %v6327_v42  ;;  %v7242_v40 = vsel %vm3072_vm5, %v7205_v28, 0  ;;  %v3136_v35 = vunpack.c.h.b16 %v7251_v29 }
 0x251   : > { %vm3065_vm0 = vmpackc.low %vm7167_vm1, %vm7162_vm10  ;;  %v3140_v26 = vunpack.c.h.b16 %v7242_v40  ;;  %v2618_v20 = vor.u32 %v2617_v6, %v7229_v19  ;;  %v3080_v51 = vunpack.c.l.b16 %v3039_v9  ;;  %v3081_v55 = vunpack.c.h.b16 %v3039_v9 }
 0x252   : > { %v7239_v53 = vsel %vm3065_vm0, %v7202_v23, 0  ;;  %3307 = vmatpush.bf16.msrb.mxu0 %v5439_v36  ;;  %vm7996_vm7 = vsmask.f32 4352  ;;  %vm7308_vm10 = vcmp.ne.s32.totalorder %v3073_v21, %v6324_v0  ;;  %v3429_v44 = vunpack.c.l.b16 %v3390_v60  ;;  %v5456_v36 = vld [vmem:[%s7852_s4 + $0x280] sm:$0xff] }
 0x253   : > { %v3138_v50 = vunpack.c.h.b16 %v7239_v53  ;;  %vm7326_vm1 = vcmp.ne.s32.totalorder %v3080_v51, %v6324_v0  ;;  %vm7331_vm4 = vcmp.ne.s32.totalorder %v3081_v55, %v6327_v42  ;;  %v7340_v39 = vpack.c.bf16 %v7196_v46, %v7194_v49  ;;  %vm3079_vm5 = vmpackc.low %vm7313_vm12, %vm7308_vm10  ;;  %v5437_v49 = vld [vmem:[%s7852_s4 + $0x1e8] sm:$0xff] }
 0x254   : > { %4895 = vmatmul.msk.bf16.gmra.mxu2 %vm7993_vm3, %v2628_v54  ;;  %vm3050_vm3 = vcmp.ne.s32.totalorder %v3046_v7, %v6327_v42  ;;  %v7281_v54 = vpack.c.bf16 %v2786_v48, %v7176_v8  ;;  %v7286_v7 = vld [vmem:[#allocation3 + $0x58] sm:$0xff]  ;;  %v5438_v8 = vld [vmem:[%s7852_s4 + $0x1f0] sm:$0xff]  ;;  %v7301_v48 = vsel %vm7996_vm7, %v7056_v38, %v2618_v20  ;;  %v5444_v38 = vld [vmem:[%s7852_s4 + $0x220] sm:$0xff]  ;;  %vm7344_vm0 = vcmp.ne.s32.totalorder %v3408_v3, %v6324_v0 }
 0x255   : > { %vm3051_vm13 = vmpackc.low %vm3050_vm3, %vm3049_vm15  ;;  %v7305_v30 = vpack.c.bf16 %v7286_v7, %v7284_v34  ;;  %v7335_v6 = vpack.c.b16 %v3140_v26, %v3138_v50  ;;  %v3415_v20 = vunpack.c.l.b16 %v7146_v12  ;;  %3338 = vmatpush.bf16.msrb.mxu2 %v5444_v38  ;;  %v3137_v46 = vunpack.c.l.b16 %v7239_v53 }
 0x256   : > { %v7261_v61 = vsel %vm3051_vm13, %v2978_v56, 0  ;;  %3308 = vmatpush.bf16.msrb.mxu0 %v5438_v8  ;;  %v5544_v56 = vld [vmem:[#allocation2 + $0x60] sm:$0x1]  ;;  %v3139_v52 = vunpack.c.l.b16 %v7242_v40  ;;  %v3416_v50 = vunpack.c.h.b16 %v7146_v12  ;;  %vm7360_vm15 = vcmp.ne.s32.totalorder %v3429_v44, %v6324_v0  ;;  %vm3086_vm3 = vmpackc.low %vm7331_vm4, %vm7326_vm1  ;;  %v8010_v12 = vld [vmem:[#allocation7_spill] sm:$0xff] }
 0x257   : > { %v3134_v59 = vunpack.c.h.b16 %v7261_v61  ;;  %vm3434_vm13 = vcmp.ne.s32.totalorder %v3430_v41, %v6327_v42  ;;  %v3175_v53 = vshll.u32 %v7335_v6, 16  ;;  %v7371_v40 = vsel %vm3079_vm5, %v7305_v30, 0  ;;  %v8013_v8 = vld [vmem:[#allocation8_spill] sm:$0xff] }
 0x258   : > { %v3133_v21 = vunpack.c.l.b16 %v7261_v61  ;;  %vm8012_vm7 = vcmask 523264   ;;  %v3135_v60 = vunpack.c.l.b16 %v7251_v29  ;;  %v7395_v61 = vsel %vm3086_vm3, %v7061_v33, 0 }
 0x259   : > { %2730 = vmatmul.bf16.gmra.mxu0 %v7070_v45  ;;  %v5457_v45 = vld [vmem:[%s7852_s4 + $0x288] sm:$0xff]  ;;  %v3148_v32 = vpack.c.b16 %v3136_v35, %v3134_v59  ;;  %v8011_v59 = vld [vmem:[#allocation6_spill] sm:$0xff]  ;;  %v3177_v3 = vrot.slane %v3175_v53, 1  ;;  %v7398_v31 = vpack.c.b16 %v3139_v52, %v3137_v46  ;;  %vm7401_vm10 = vcmp.ne.s32.totalorder %v3409_v16, %v6327_v42  ;;  %vm8022_vm3 = vmmov %vm8012_vm7 }
 0x25a   : > { %3641 = vmatpush.bf16.msrb.mxu3 %v5457_v45  ;;  %3309 = vmatpush.bf16.msrb.mxu0 %v5437_v49  ;;  %v5545_v45 = vld [vmem:[#allocation2 + $0x68] sm:$0x1]  ;;  %vm7406_vm12 = vcmp.ne.s32.totalorder %v3415_v20, %v6324_v0  ;;  %v3147_v57 = vpack.c.b16 %v3135_v60, %v3133_v21  ;;  %vm7411_vm1 = vcmp.ne.s32.totalorder %v3416_v50, %v6327_v42  ;;  %vm8020_vm4 = vsmask.f32 7424  ;;  %vm3414_vm5 = vmpackc.low %vm7401_vm10, %vm7344_vm0  ;;  %v8024_v21 = vld [vmem:[#allocation9_spill] sm:$0xff] }
 0x25b   : > { %2919 = vmatmul.bf16.vlgmr.msra.gmra.mxu1 %v2794_v43  ;;  %v3168_v13 = vshrl.u32 %v3148_v32, 16  ;;  %v3170_v9 = vshll.u32 %v3148_v32, 16  ;;  %v1418_v35 = vmul.f32 %v5545_v45, %v8011_v59  ;;  %v3142_v43 = vunpack.c.h.b16 %v7371_v40  ;;  %vm8023_vm0 = vmmov %vm8020_vm4 }
 0x25c   : > { %v3163_v41 = vshll.u32 %v7398_v31, 16  ;;  %v3156_v16 = vshrl.u32 %v3147_v57, 16  ;;  %v3158_v20 = vshll.u32 %v3147_v57, 16  ;;  %v3141_v53 = vunpack.c.l.b16 %v7371_v40 }
 0x25d   : > { %4969 = vmatmul.msk.bf16.vlgmr.msra.gmra.mxu3 %vm7994_vm2, %v2795_v63  ;;  %v8005_v63 = vld [vmem:[#allocation5_spill] sm:$0xff]  ;;  %vm3435_vm2 = vmpackc.low %vm3434_vm13, %vm7360_vm15  ;;  %v3172_v55 = vrot.slane %v3170_v9, 1  ;;  %v1437_v25 = vadd.f32 %v8013_v8, %v1418_v35  ;;  %vm8021_vm15 = vcmask 516096   ;;  %v3187_v59 = vshrl.u32 %v7335_v6, 16 }
 0x25e   : > { %v1417_v15 = vmul.f32 %v5544_v56, %v8005_v63  ;;  %v7383_v51 = vsel %vm3435_vm2, %v7061_v33, 0  ;;  %3310 = vmatpush.bf16.msrb.mxu0 %v5436_v5  ;;  %v3144_v56 = vunpack.c.h.b16 %v7395_v61  ;;  %vm3421_vm13 = vmpackc.low %vm7411_vm1, %vm7406_vm12  ;;  %v3160_v46 = vrot.slane %v3158_v20, 1  ;;  %3642 = vmatpush.bf16.msrb.mxu3 %v5456_v36 }
 0x25f   : > { %v3173_v38 = vor.u32 %v3172_v55, %v3168_v13  ;;  %v1451_v44 = vmax.f32 %v1437_v25, 0.0  ;;  %v3165_v52 = vrot.slane %v3163_v41, 1  ;;  %v7447_v13 = vsel %vm3414_vm5, %v7202_v23, 0  ;;  %vm8026_vm2 = vmmov %vm8023_vm0 }
 0x260   : > { %v1436_v17 = vadd.f32 %v8010_v12, %v1417_v15  ;;  %v5450_v15 = vld [vmem:[%s7852_s4 + $0x250] sm:$0xff]  ;;  %v3161_v50 = vor.u32 %v3160_v46, %v3156_v16  ;;  %v7444_v26 = vpack.c.b16 %v3144_v56, %v3142_v43  ;;  %v3446_v9 = vsel %vm3421_vm13, %v7205_v28, 0  ;;  %v5449_v12 = vld [vmem:[%s7852_s4 + $0x248] sm:$0xff]  ;;  %v8025_v28 = vld [vmem:[#allocation10_spill] sm:$0xff] }
 0x261   : > { %v3178_v63 = vsel %vm8020_vm4, %v3173_v38, %v3177_v3  ;;  %1483 = vst.msk [vmem:[#allocation3 + $0x78] sm:$0x1] %vm8021_vm15, %v1451_v44  ;;  %3612 = vmatpush.bf16.msrb.mxu1 %v5450_v15  ;;  %v3394_v23 = vunpack.c.l.b16 %v8024_v21  ;;  %v3395_v55 = vunpack.c.h.b16 %v8024_v21  ;;  %v3401_v5 = vunpack.c.l.b16 %v8025_v28  ;;  %v5546_v38 = vld [vmem:[#allocation3 + $0x60] sm:$0xff]  ;;  %v3367_v43 = vld [vmem:[#allocation3 + $0x18] sm:$0xc0]  ;;  %vm8029_vm1 = vmmov %vm8022_vm3 }
 0x262   : > { %v7456_v45 = vsel %vm8023_vm0, %v3161_v50, %v3165_v52  ;;  %v3191_v35 = vshll.u32 %v7444_v26, 16  ;;  %v3402_v40 = vunpack.c.h.b16 %v8025_v28  ;;  %v3040_v60 = vrot.slane %v7171_v10, 4  ;;  %v5448_v46 = vld [vmem:[%s7852_s4 + $0x240] sm:$0xff] }
 0x263   : > { %v3486_v6 = vunpack.c.l.b16 %v7447_v13  ;;  %v3487_v25 = vunpack.c.h.b16 %v7447_v13  ;;  %v3488_v22 = vunpack.c.l.b16 %v3446_v9  ;;  %v3489_v29 = vunpack.c.h.b16 %v3446_v9 }
 0x264   : > { %4896 = vmatmul.msk.bf16.gmra.mxu2 %vm8012_vm7, %v7115_v4  ;;  %v1450_v4 = vmax.f32 %v1436_v17, 0.0  ;;  %v3143_v17 = vunpack.c.l.b16 %v7395_v61  ;;  %v3042_v61 = vshll.u32 %v6812_v37, 16  ;;  %v7466_v8 = vrot.slane %v3191_v35, 1 }
 0x265   : > { %v7378_v24 = vpop.f32.mrf.mxu0  ;;  %3613 = vmatpush.bf16.msrb.mxu1 %v5449_v12  ;;  %v7471_v57 = vpack.c.bf16 %v5546_v38, %v7284_v34  ;;  %v7475_v33 = vpack.c.bf16 %v7049_v47, %v7286_v7  ;;  %vm3398_vm7 = vcmp.ne.s32.totalorder %v3394_v23, %v6324_v0  ;;  %vm3399_vm10 = vcmp.ne.s32.totalorder %v3395_v55, %v6327_v42 }
 0x266   : > { %1482 = vst [vmem:[#allocation3 + $0x70] sm:$0x1] %v1450_v4  ;;  %v3189_v4 = vor.u32 %v3187_v59, %v3177_v3  ;;  %v3366_v3 = vld [vmem:[#allocation3 + $0x10] sm:$0xc0]  ;;  %v7483_v44 = vpack.c.b16 %v3143_v17, %v3141_v53  ;;  %vm7490_vm12 = vcmp.ne.s32.totalorder %v3401_v5, %v6324_v0  ;;  %vm3400_vm4 = vmpackc.low %vm3399_vm10, %vm3398_vm7  ;;  %vm3406_vm5 = vcmp.ne.s32.totalorder %v3402_v40, %v6327_v42 }
 0x267   : > { %v7323_v58 = vpop.f32.mrf.mxu2  ;;  %v3370_v56 = vpack.c.bf16 %v3367_v43, %v3366_v3  ;;  %v3179_v7 = vshrl.u32 %v7398_v31, 16  ;;  %v3044_v16 = vsel %vm7076_vm6, %v3040_v60, %v3042_v61  ;;  %v3422_v36 = vunpack.c.l.b16 %v7290_v2  ;;  %vm3407_vm15 = vmpackc.low %vm3406_vm5, %vm7490_vm12  ;;  %v5471_v61 = vld [vmem:[%s7852_s4 + $0x2f8] sm:$0xff]  ;;  %v5478_v3 = vld [vmem:[%s7852_s4 + $0x330] sm:$0xff] }
 0x268   : > { %v7481_v37 = vsel %vm8026_vm2, %v3189_v4, %v7466_v8  ;;  %v3183_v15 = vshll.u32 %v7483_v44, 16  ;;  %v7510_v50 = vpack.c.b16 %v3488_v22, %v3486_v6  ;;  %v3087_v31 = vunpack.c.l.b16 %v3044_v16  ;;  %v2977_v17 = vld [vmem:[#allocation3 + $0x78] sm:$0x3]  ;;  %vm8030_vm6 = vmmov %vm8023_vm0  ;;  %3891 = vmatpush.bf16.msra.mxu2 %v5471_v61 }
 0x269   : > { %2735 = vmatmul.bf16.gmra.mxu0 %v7301_v48  ;;  %v3444_v13 = vsel %vm3407_vm15, %v7215_v11, 0  ;;  %v3181_v14 = vor.u32 %v3179_v7, %v3165_v52  ;;  %v3423_v59 = vunpack.c.h.b16 %v7290_v2  ;;  %3614 = vmatpush.bf16.msrb.mxu1 %v5448_v46  ;;  %v3088_v23 = vunpack.c.h.b16 %v3044_v16  ;;  %vm8031_vm0 = vmmov %vm8029_vm1  ;;  %v5467_v16 = vld [vmem:[%s7852_s4 + $0x2d8] sm:$0xff] }
 0x26a   : > { %v7513_v53 = vrot.slane %v3183_v15, 1  ;;  %v3484_v35 = vunpack.c.l.b16 %v3444_v13  ;;  %v3485_v28 = vunpack.c.h.b16 %v3444_v13  ;;  %v7517_v5 = vpack.c.b16 %v3489_v29, %v3487_v25  ;;  %3859 = vmatpush.bf16.msra.mxu0 %v5467_v16  ;;  %vm8037_vm5 = vmmov %vm8030_vm6 }
 0x26b   : > { %2924 = vmatmul.bf16.gmra.mxu1 %v7281_v54  ;;  %v7430_v49 = vpop.f32.mrf.mxu3  ;;  %v3506_v40 = vrot.slane %v7510_v50, 3  ;;  %vm3092_vm13 = vcmp.ne.s32.totalorder %v3088_v23, %v6327_v42  ;;  %vm3504_vm2 = vcmask 1044480   ;;  %vm7541_vm10 = vcmp.ne.s32.totalorder %v3422_v36, %v6324_v0  ;;  %v5479_v36 = vld [vmem:[%s7852_s4 + $0x338] sm:$0xff]  ;;  %vm8038_vm15 = vmmov %vm8037_vm5  ;;  %v5465_v50 = vld [vmem:[%s7852_s4 + $0x2c8] sm:$0xff] }
 0x26c   : > { %v7521_v11 = vsel %vm8030_vm6, %v3181_v14, %v7513_v53  ;;  %v3509_v60 = vrot.slane %v7517_v5, 3  ;;  %vm7546_vm12 = vcmp.ne.s32.totalorder %v3423_v59, %v6327_v42  ;;  %v3195_v23 = vshrl.u32 %v7483_v44, 16  ;;  %v5466_v44 = vld [vmem:[%s7852_s4 + $0x2d0] sm:$0xff]  ;;  %vm8039_vm6 = vmmov %vm8031_vm0 }
 0x26d   : > { %4970 = vmatmul.msk.bf16.gmra.mxu3 %vm8022_vm3, %v7340_v39  ;;  %v7442_v48 = vpop.f32.mrf.mxu0  ;;  %v2976_v12 = vld [vmem:[#allocation3 + $0x70] sm:$0x3]  ;;  %vm3091_vm3 = vcmp.ne.s32.totalorder %v3087_v31, %v6324_v0  ;;  %4092 = vmatpush.bf16.msra.mxu1 %v5479_v36  ;;  %v3493_v16 = vunpack.c.h.b16 %v7383_v51 }
 0x26e   : > { %v2984_v21 = vpack.c.bf16 %v2977_v17, %v2976_v12  ;;  %vm3093_vm7 = vmpackc.low %vm3092_vm13, %vm3091_vm3  ;;  %v2792_v14 = vld [vmem:[#allocation3 + $0x70] sm:$0x1]  ;;  %v2793_v12 = vld [vmem:[#allocation3 + $0x78] sm:$0x1]  ;;  %3860 = vmatpush.bf16.msra.mxu0 %v5466_v44 }
 0x26f   : > { %v7418_v32 = vpop.f32.mrf.mxu2 }
 0x270   : > { %v3100_v6 = vsel %vm3093_vm7, %v2984_v21, 0 }
 0x271   : > { %v3146_v38 = vunpack.c.h.b16 %v3100_v6  ;;  %4093 = vmatpush.bf16.msra.mxu1 %v5478_v3 }
 0x272   : > { %3861 = vmatpush.bf16.msra.mxu0 %v5465_v50 }
 0x273   : > { %v7485_v41 = vpop.f32.mrf.mxu3  ;;  %v7568_v46 = vpack.c.b16 %v3146_v38, %v3146_v38 }
 0x274   : > { %5045 = vmatmul.msk.bf16.vlgmr.msrb.gmra.mxu2 %vm8029_vm1, %v3178_v63  ;;  %v3443_v63 = vsel %vm3400_vm4, %v3370_v56, 0  ;;  %vm3428_vm1 = vmpackc.low %vm7546_vm12, %vm7541_vm10 }
 0x275   : > { %v7494_v34 = vpop.f32.mrf.mxu0  ;;  %v3482_v9 = vunpack.c.l.b16 %v3443_v63  ;;  %v3483_v55 = vunpack.c.h.b16 %v3443_v63  ;;  %v3203_v63 = vshrl.u32 %v7444_v26, 16  ;;  %v3207_v13 = vshll.u32 %v7568_v46, 16  ;;  %vm8036_vm4 = vmmov %vm8031_vm0 }
 0x276   : > { %v2800_v26 = vpack.c.bf16 %v2792_v14, %v2792_v14  ;;  %vm8040_vm10 = vmmov %vm8031_vm0 }
 0x277   : > { %v7477_v10 = vpop.f32.mrf.mxu2  ;;  %v3496_v52 = vpack.c.b16 %v3484_v35, %v3482_v9  ;;  %v3497_v2 = vpack.c.b16 %v3485_v28, %v3483_v55  ;;  %v3205_v31 = vor.u32 %v3203_v63, %v7466_v8  ;;  %v3145_v9 = vunpack.c.l.b16 %v3100_v6  ;;  %vm8042_vm12 = vmmov %vm8031_vm0 }
 0x278   : > { %v7502_v20 = vpop.f32.mrf.mxu1  ;;  %v3209_v17 = vrot.slane %v3207_v13, 1  ;;  %v3447_v35 = vsel %vm3428_vm1, %v7305_v30, 0 }
 0x279   : > { %2740 = vmatmul.bf16.gmra.mxu0 %v7229_v19  ;;  %v5483_v19 = vld [vmem:[%s7852_s4 + $0x358] sm:$0xff]  ;;  %v3505_v4 = vrot.slane %v3496_v52, 3  ;;  %v3508_v29 = vrot.slane %v3497_v2, 3  ;;  %v7577_v59 = vpack.c.b16 %v3145_v9, %v3145_v9  ;;  %v2801_v52 = vpack.c.bf16 %v2793_v12, %v2793_v12 }
 0x27a   : > { %4124 = vmatpush.bf16.msra.mxu3 %v5483_v19  ;;  %v3210_v21 = vsel %vm8037_vm5, %v3205_v31, %v3209_v17  ;;  %v3490_v61 = vunpack.c.l.b16 %v3447_v35  ;;  %v3492_v19 = vunpack.c.l.b16 %v7383_v51  ;;  %v3491_v43 = vunpack.c.h.b16 %v3447_v35  ;;  %v5470_v31 = vld [vmem:[%s7852_s4 + $0x2f0] sm:$0xff] }
 0x27b   : > { %2929 = vmatmul.bf16.gmra.mxu1 %v7471_v57  ;;  %v7555_v7 = vsel %vm3504_vm2, %v3505_v4, %v3506_v40  ;;  %v7560_v15 = vsel %vm3504_vm2, %v3508_v29, %v3509_v60  ;;  %v3199_v8 = vshll.u32 %v7577_v59, 16  ;;  %v3197_v4 = vor.u32 %v3195_v23, %v7513_v53  ;;  %v5482_v51 = vld [vmem:[%s7852_s4 + $0x350] sm:$0xff]  ;;  %3892 = vmatpush.bf16.msra.mxu2 %v5470_v31  ;;  %v5469_v31 = vld [vmem:[%s7852_s4 + $0x2e8] sm:$0xff] }
 0x27c   : > { %v7603_v63 = vpack.c.b16 %v3493_v16, %v3491_v43  ;;  %v3436_v35 = vunpack.c.l.b16 %v6750_v18  ;;  %v5476_v43 = vld [vmem:[%s7852_s4 + $0x320] sm:$0xff] }
 0x27d   : > { %4971 = vmatmul.msk.bf16.gmra.mxu3 %vm8031_vm0, %v7475_v33  ;;  %v7536_v25 = vpop.f32.mrf.mxu0  ;;  %v3201_v6 = vrot.slane %v3199_v8, 1 }
 0x27e   : > { %v3513_v9 = vrot.slane %v7603_v63, 3  ;;  %4125 = vmatpush.bf16.msra.mxu3 %v5482_v51  ;;  %vm3440_vm3 = vcmp.ne.s32.totalorder %v3436_v35, %v6324_v0  ;;  %v3731_v0 = vshll.u32 %v7340_v39, 16  ;;  %v5461_v63 = vld [vmem:[%s7852_s4 + $0x2a8] sm:$0xff] }
 0x27f   : > { %v7538_v22 = vpop.f32.mrf.mxu2  ;;  %v2027_v47 = vpop.f32.mrf.mxu3  ;;  %v7598_v53 = vsel %vm8038_vm15, %v3197_v4, %v3201_v6  ;;  %3893 = vmatpush.bf16.msra.mxu2 %v5469_v31  ;;  %vm8048_vm15 = vmmov %vm8031_vm0 }
 0x280   : > { %v7550_v56 = vpop.f32.mrf.mxu1 }
 0x284   : > { %5046 = vmatmul.msk.bf16.gmra.mxu2 %vm8036_vm4, %v7481_v37  ;;  %v7588_v37 = vpack.c.b16 %v3492_v19, %v3490_v61  ;;  %vm8044_vm4 = vmmov %vm8031_vm0 }
 0x286   : > { %v1826_v2 = vpop.f32.mrf.mxu0  ;;  %v3511_v36 = vrot.slane %v7588_v37, 3 }
 0x287   : > { %v2029_v28 = vpop.f32.mrf.mxu3  ;;  %v1855_v29 = vadd.f32 %v7502_v20, %v1826_v2  ;;  %v1999_v38 = vpop.f32.mrf.mxu2 }
 0x288   : > { %v1859_v55 = vpop.f32.mrf.mxu1 }
 0x289   : > { %3311 = vmatmul.bf16.vlgmr.msrb.gmra.mxu0 %v7456_v45  ;;  %v2000_v20 = vadd.f32 %v1999_v38, %v1855_v29  ;;  %v7618_v45 = vsel %vm3504_vm2, %v3506_v40, %v3511_v36  ;;  %v5477_v40 = vld [vmem:[%s7852_s4 + $0x328] sm:$0xff] }
 0x28a   : > { %4094 = vmatpush.bf16.msra.mxu1 %v5477_v40 }
 0x28b   : > { %2934 = vmatmul.bf16.gmra.mxu1 %v2800_v26  ;;  %v7611_v13 = vadd.f32 %v2027_v47, %v2000_v20  ;;  %v7626_v47 = vsel %vm3504_vm2, %v3509_v60, %v3513_v9  ;;  %v3437_v26 = vunpack.c.h.b16 %v6750_v18  ;;  %v3368_v60 = vld [vmem:[#allocation3 + $0x70] sm:$0x7f]  ;;  %v5463_v20 = vld [vmem:[%s7852_s4 + $0x2b8] sm:$0xff] }
 0x28c   : > { %v5464_v18 = vld [vmem:[%s7852_s4 + $0x2c0] sm:$0xff] }
 0x28d   : > { %4972 = vmatmul.msk.bf16.gmra.mxu3 %vm8039_vm6, %v2801_v52  ;;  %v3369_v52 = vld [vmem:[#allocation3 + $0x78] sm:$0x7f]  ;;  %vm3441_vm13 = vcmp.ne.s32.totalorder %v3437_v26, %v6327_v42  ;;  %3862 = vmatpush.bf16.msra.mxu0 %v5464_v18 }
 0x28e   : > { %v1828_v17 = vpop.f32.mrf.mxu0  ;;  %v3371_v61 = vpack.c.bf16 %v3369_v52, %v3368_v60  ;;  %vm3442_vm7 = vmpackc.low %vm3441_vm13, %vm3440_vm3  ;;  %4095 = vmatpush.bf16.msra.mxu1 %v5476_v43 }
 0x28f   : > { %v2032_v12 = vpop.f32.mrf.mxu3  ;;  %v1857_v23 = vadd.f32 %v7550_v56, %v1828_v17  ;;  %v2001_v8 = vpop.f32.mrf.mxu2  ;;  %v3671_v56 = vld [vmem:[#allocation3 + $0x18] sm:$0x80]  ;;  %vm8050_vm3 = vmmov %vm8031_vm0 }
 0x290   : > { %v1861_v14 = vpop.f32.mrf.mxu1  ;;  %v3449_v6 = vsel %vm3442_vm7, %v3371_v61, 0  ;;  %vm8051_vm13 = vmmov %vm8031_vm0 }
 0x291   : > { %v2002_v5 = vadd.f32 %v2001_v8, %v1857_v23  ;;  %v3494_v38 = vunpack.c.l.b16 %v3449_v6  ;;  %v3495_v16 = vunpack.c.h.b16 %v3449_v6  ;;  %v3733_v14 = vrot.slane %v3731_v0, 4  ;;  %3863 = vmatpush.bf16.msra.mxu0 %v5463_v20 }
 0x292   : > { %v3712_v23 = vshrl.u32 %v7281_v54, 16  ;;  %v3715_v8 = vshll.u32 %v7281_v54, 16  ;;  %v3213_v54 = vshrl.u32 %v7568_v46, 16  ;;  %v5460_v46 = vld [vmem:[%s7852_s4 + $0x2a0] sm:$0xff] }
 0x293   : > { %v7637_v2 = vadd.f32 %v2029_v28, %v2002_v5  ;;  %v3728_v28 = vshrl.u32 %v7340_v39, 16  ;;  %v7649_v3 = vpack.c.b16 %v3494_v38, %v3494_v38 }
 0x294   : > { %5047 = vmatmul.msk.bf16.gmra.mxu2 %vm8031_vm0, %v3210_v21  ;;  %v3675_v21 = vpack.c.bf16 %v7198_v27, %v3671_v56  ;;  %v3714_v6 = vrot.slane %v3712_v23, 3 }
 0x295   : > { %v3515_v27 = vrot.slane %v7649_v3, 3  ;;  %v3730_v51 = vrot.slane %v3728_v28, 3 }
 0x296   : > { %v1831_v29 = vpop.f32.mrf.mxu0  ;;  %v3721_v40 = vshrl.u32 %v3675_v21, 16  ;;  %v3724_v35 = vshll.u32 %v3675_v21, 16 }
 0x297   : > { %v2034_v19 = vpop.f32.mrf.mxu3  ;;  %v1860_v44 = vadd.f32 %v1859_v55, %v1831_v29  ;;  %v2004_v42 = vpop.f32.mrf.mxu2  ;;  %v3670_v55 = vld [vmem:[#allocation3 + $0x10] sm:$0x80]  ;;  %v3717_v29 = vrot.slane %v3715_v8, 4 }
 0x298   : > { %v2314_v4 = vpop.f32.mrf.mxu1  ;;  %v3674_v26 = vpack.c.bf16 %v7174_v62, %v3670_v55  ;;  %v5468_v62 = vld [vmem:[%s7852_s4 + $0x2e0] sm:$0xff]  ;;  %v3723_v61 = vrot.slane %v3721_v40, 3  ;;  %v3726_v18 = vrot.slane %v3724_v35, 4  ;;  %v5475_v19 = vld [vmem:[%s7852_s4 + $0x318] sm:$0xff]  ;;  %v3745_v40 = vshrl.u32 %v7475_v33, 16 }
 0x299   : > { %3316 = vmatmul.bf16.gmra.mxu0 %v7521_v11  ;;  %v2005_v39 = vadd.f32 %v2004_v42, %v1860_v44  ;;  %v5481_v11 = vld [vmem:[%s7852_s4 + $0x348] sm:$0xff]  ;;  %3894 = vmatpush.bf16.msra.mxu2 %v5468_v62  ;;  %v3718_v55 = vor.u32 %v3717_v29, %v3714_v6  ;;  %v3748_v35 = vshll.u32 %v7475_v33, 16  ;;  %v3740_v62 = vshll.u32 %v7471_v57, 16 }
 0x29a   : > { %4126 = vmatpush.bf16.msra.mxu3 %v5481_v11  ;;  %4096 = vmatpush.bf16.msra.mxu1 %v5475_v19  ;;  %v3704_v28 = vshrl.u32 %v3674_v26, 16  ;;  %v3707_v0 = vshll.u32 %v3674_v26, 16 }
 0x29b   : > { %3615 = vmatmul.bf16.vlgmr.msrb.gmra.mxu1 %v7555_v7  ;;  %v7661_v7 = vpack.c.b16 %v3495_v16, %v3495_v16  ;;  %v7666_v17 = vadd.f32 %v2032_v12, %v2005_v39  ;;  %v5462_v12 = vld [vmem:[%s7852_s4 + $0x2b0] sm:$0xff]  ;;  %v3742_v29 = vrot.slane %v3740_v62, 4 }
 0x29c   : > { %3864 = vmatpush.bf16.msra.mxu0 %v5462_v12  ;;  %v3706_v44 = vrot.slane %v3704_v28, 3  ;;  %v3709_v42 = vrot.slane %v3707_v0, 4 }
 0x29d   : > { %5121 = vmatmul.msk.bf16.vlgmr.msrb.gmra.mxu3 %vm8040_vm10, %v7560_v15  ;;  %v7676_v15 = vsel %vm3504_vm2, %v3511_v36, %v3515_v27  ;;  %v3517_v50 = vrot.slane %v7661_v7, 3  ;;  %vm8053_vm10 = vmmov %vm8031_vm0 }
 0x29e   : > { %v1833_v60 = vpop.f32.mrf.mxu0  ;;  %v3710_v39 = vor.u32 %v3709_v42, %v3706_v44  ;;  %v3211_v42 = vshrl.u32 %v7577_v59, 16 }
 0x29f   : > { %v7690_v52 = vsel %vm3504_vm2, %v3513_v9, %v3517_v50  ;;  %v2006_v56 = vpop.f32.mrf.mxu2  ;;  %v3727_v9 = vor.u32 %v3726_v18, %v3723_v61  ;;  %vm8041_vm2 = vsmask.f32 4352  ;;  %v5473_v61 = vld [vmem:[%s7852_s4 + $0x308] sm:$0xff] }
 0x2a0   : > { %v2316_v5 = vpop.f32.mrf.mxu1  ;;  %v2342_v37 = vpop.f32.mrf.mxu3  ;;  %3865 = vmatpush.bf16.msra.mxu0 %v5461_v63  ;;  %vm8043_vm1 = vmmov %vm8041_vm2 }
 0x2a1   : > { %v2343_v36 = vadd.f32 %v2342_v37, %v2314_v4  ;;  %v3734_v4 = vor.u32 %v3733_v14, %v3730_v51  ;;  %v5474_v14 = vld [vmem:[%s7852_s4 + $0x310] sm:$0xff]  ;;  %v7713_v11 = vsel %vm8043_vm1, %v3710_v39, %v3718_v55  ;;  %v3750_v37 = vrot.slane %v3748_v35, 4  ;;  %vm8047_vm5 = vmmov %vm8043_vm1 }
 0x2a2   : > { %4097 = vmatpush.bf16.msra.mxu1 %v5474_v14  ;;  %vm8049_vm6 = vmmov %vm8043_vm1 }
 0x2a3   : > { %v3735_v38 = vsel %vm8041_vm2, %v3727_v9, %v3734_v4  ;;  %vm8052_vm7 = vmmov %vm8043_vm1 }
 0x2a4   : > { %5048 = vmatmul.msk.bf16.gmra.mxu2 %vm8042_vm12, %v3213_v54  ;;  %3866 = vmatpush.bf16.msra.mxu0 %v5460_v46  ;;  %v8046_v54 = vld [vmem:[#allocation12_spill] sm:$0xff]  ;;  %vm8054_vm2 = vmmov %vm8031_vm0 }
 0x2a5   : > { %v3984_v19 = vunpack.c.l.b16 %v8046_v54  ;;  %v3985_v28 = vunpack.c.h.b16 %v8046_v54  ;;  %vm8059_vm12 = vmmov %vm8031_vm0 }
 0x2a6   : > { %v1844_v20 = vpop.f32.mrf.mxu0  ;;  %4098 = vmatpush.bf16.msra.mxu1 %v5473_v61 }
 0x2a7   : > { %v1845_v31 = vadd.f32 %v1844_v20, %v7378_v24  ;;  %v2017_v51 = vpop.f32.mrf.mxu2  ;;  %v5480_v24 = vld [vmem:[%s7852_s4 + $0x340] sm:$0xff] }
 0x2a8   : > { %v2319_v21 = vpop.f32.mrf.mxu1  ;;  %v2344_v43 = vpop.f32.mrf.mxu3  ;;  %4127 = vmatpush.bf16.msra.mxu3 %v5480_v24  ;;  %v7756_v24 = vld [vmem:[#allocation3 + $0x78] sm:$0xff] }
 0x2a9   : > { %v2345_v16 = vadd.f32 %v2344_v43, %v2316_v5  ;;  %3321 = vmatmul.bf16.gmra.mxu0 %v7598_v53  ;;  %v1990_v12 = vadd.f32 %v7323_v58, %v1845_v31  ;;  %v3747_v5 = vrot.slane %v3745_v40, 3 }
 0x2ab   : > { %3620 = vmatmul.bf16.gmra.mxu1 %v7618_v45  ;;  %v2018_v45 = vadd.f32 %v2017_v51, %v1990_v12  ;;  %v7732_v18 = vor.u32 %v3750_v37, %v3747_v5 }
 0x2ad   : > { %5122 = vmatmul.msk.bf16.gmra.mxu3 %vm8044_vm4, %v7626_v47  ;;  %v7724_v26 = vadd.f32 %v2343_v36, %v2018_v45  ;;  %v3737_v47 = vshrl.u32 %v7471_v57, 16  ;;  %v8045_v36 = vld [vmem:[#allocation11_spill] sm:$0xff]  ;;  %vm8064_vm4 = vmmov %vm8031_vm0 }
 0x2ae   : > { %v1846_v58 = vpop.f32.mrf.mxu0  ;;  %v3982_v56 = vunpack.c.l.b16 %v8045_v36  ;;  %v3983_v6 = vunpack.c.h.b16 %v8045_v36 }
 0x2af   : > { %v1847_v33 = vadd.f32 %v1846_v58, %v7442_v48  ;;  %v2019_v60 = vpop.f32.mrf.mxu2  ;;  %v3752_v48 = vsel %vm8047_vm5, %v3734_v4, %v7732_v18  ;;  %v3739_v57 = vrot.slane %v3737_v47, 3  ;;  %vm4162_vm5 = vcmask 385024  }
 0x2b0   : > { %v2321_v23 = vpop.f32.mrf.mxu1  ;;  %v2347_v53 = vpop.f32.mrf.mxu3  ;;  %v3997_v31 = vpack.c.b16 %v3985_v28, %v3983_v6 }
 0x2b1   : > { %v2348_v8 = vadd.f32 %v2347_v53, %v2319_v21  ;;  %v1992_v63 = vadd.f32 %v7418_v32, %v1847_v33  ;;  %v5472_v32 = vld [vmem:[%s7852_s4 + $0x300] sm:$0xff]  ;;  %v3996_v21 = vpack.c.b16 %v3984_v19, %v3982_v56  ;;  %v7746_v20 = vor.u32 %v3742_v29, %v3739_v57 }
 0x2b2   : > { %4099 = vmatpush.bf16.msra.mxu1 %v5472_v32 }
 0x2b3   : > { %v2020_v9 = vadd.f32 %v2019_v60, %v1992_v63 }
 0x2b4   : > { %5197 = vmatmul.msk.bf16.vlgmr.msra.gmra.mxu2 %vm8048_vm15, %v3735_v38 }
 0x2b5   : > { %v2362_v0 = vadd.f32 %v2345_v16, %v2020_v9  ;;  %v3744_v16 = vsel %vm8049_vm6, %v3718_v55, %v7746_v20  ;;  %v3927_v9 = vld [vmem:[#allocation3 + $0x48] sm:$0xff] }
 0x2b6   : > { %v1849_v43 = vpop.f32.mrf.mxu0 }
 0x2b7   : > { %v1850_v38 = vadd.f32 %v1849_v43, %v7494_v34  ;;  %v2754_v39 = vpop.f32.mrf.mxu2  ;;  %v3946_v43 = vsel %vm6543_vm9, %v7305_v30, 0  ;;  %vm8058_vm9 = vmmov %vm8043_vm1 }
 0x2b8   : > { %v2324_v46 = vpop.f32.mrf.mxu1  ;;  %v2349_v44 = vpop.f32.mrf.mxu3 }
 0x2b9   : > { %v2350_v4 = vadd.f32 %v2349_v44, %v2321_v23  ;;  %v1995_v59 = vadd.f32 %v7477_v10, %v1850_v38  ;;  %3326 = vmatmul.bf16.gmra.mxu0 %v3211_v42 }
 0x2bb   : > { %3625 = vmatmul.bf16.gmra.mxu1 %v7676_v15  ;;  %v2023_v51 = vadd.f32 %v7430_v49, %v1995_v59 }
 0x2bd   : > { %5123 = vmatmul.msk.bf16.gmra.mxu3 %vm8050_vm3, %v7690_v52  ;;  %v2363_v40 = vadd.f32 %v2348_v8, %v2023_v51  ;;  %v3677_v52 = vpack.c.bf16 %v7756_v24, %v7756_v24 }
 0x2be   : > { %v1851_v35 = vpop.f32.mrf.mxu0 }
 0x2bf   : > { %v1852_v15 = vadd.f32 %v1851_v35, %v7536_v25  ;;  %v2756_v45 = vpop.f32.mrf.mxu2  ;;  %v3763_v58 = vshrl.u32 %v3677_v52, 16  ;;  %v3766_v5 = vshll.u32 %v3677_v52, 16  ;;  %v3989_v35 = vunpack.c.h.b16 %v3946_v43 }
 0x2c0   : > { %v2326_v14 = vpop.f32.mrf.mxu1  ;;  %v2352_v12 = vpop.f32.mrf.mxu3 }
 0x2c1   : > { %v2353_v34 = vadd.f32 %v2352_v12, %v2324_v46  ;;  %v1997_v10 = vadd.f32 %v7538_v22, %v1852_v15  ;;  %v3768_v47 = vrot.slane %v3766_v5, 4  ;;  %v3988_v12 = vunpack.c.l.b16 %v3946_v43  ;;  %v3931_v5 = vld [vmem:[#allocation3 + $0x68] sm:$0xff] }
 0x2c3   : > { %v7760_v55 = vadd.f32 %v2353_v34, %v7611_v13  ;;  %v2025_v49 = vadd.f32 %v7485_v41, %v1997_v10  ;;  %v3765_v41 = vrot.slane %v3763_v58, 3  ;;  %v3930_v58 = vld [vmem:[#allocation3 + $0x60] sm:$0xff] }
 0x2c4   : > { %5198 = vmatmul.msk.bf16.gmra.mxu2 %vm8051_vm13, %v3752_v48  ;;  %v3926_v48 = vld [vmem:[#allocation3 + $0x40] sm:$0xff] }
 0x2c5   : > { %v2364_v8 = vadd.f32 %v2350_v4, %v2025_v49  ;;  %v3769_v36 = vor.u32 %v3768_v47, %v3765_v41 }
 0x2c6   : > { %v2726_v25 = vpop.f32.mrf.mxu0 }
 0x2c7   : > { %v2755_v33 = vadd.f32 %v2754_v39, %v2726_v25  ;;  %v2759_v60 = vpop.f32.mrf.mxu2 }
 0x2c8   : > { %v2329_v23 = vpop.f32.mrf.mxu1  ;;  %v2354_v53 = vpop.f32.mrf.mxu3 }
 0x2c9   : > { %v2355_v37 = vadd.f32 %v2354_v53, %v2326_v14  ;;  %v2773_v22 = vadd.f32 %v2755_v33, %v7724_v26  ;;  %3867 = vmatmul.bf16.vlgmr.msra.gmra.mxu0 %v7713_v11  ;;  %v3770_v11 = vsel %vm8052_vm7, %v7732_v18, %v3769_v36  ;;  %v3672_v26 = vld [vmem:[#allocation3 + $0x70] sm:$0xff] }
 0x2ca   : > { %v3676_v6 = vpack.c.bf16 %v3672_v26, %v3672_v26 }
 0x2cb   : > { %v7768_v13 = vadd.f32 %v2355_v37, %v7637_v2  ;;  %3630 = vmatmul.bf16.gmra.mxu1 %v3515_v27 }
 0x2cc   : > { %v3757_v46 = vshll.u32 %v3676_v6, 16 }
 0x2cd   : > { %5124 = vmatmul.msk.bf16.gmra.mxu3 %vm8031_vm0, %v3517_v50 }
 0x2ce   : > { %v2728_v54 = vpop.f32.mrf.mxu0 }
 0x2cf   : > { %v2757_v2 = vadd.f32 %v2756_v45, %v2728_v54  ;;  %v2761_v19 = vpop.f32.mrf.mxu2 }
 0x2d0   : > { %v2331_v62 = vpop.f32.mrf.mxu1  ;;  %v2357_v61 = vpop.f32.mrf.mxu3 }
 0x2d1   : > { %v2358_v56 = vadd.f32 %v2357_v61, %v2329_v23  ;;  %v2774_v27 = vadd.f32 %v2757_v2, %v2362_v0  ;;  %v3754_v0 = vshrl.u32 %v3676_v6, 16  ;;  %v8061_v61 = vld [vmem:[#allocation16_spill] sm:$0xff] }
 0x2d2   : > { %vm8062_vm1 = vnez %v8061_v61 }
 0x2d3   : > { %v7778_v3 = vadd.f32 %v2358_v56, %v7666_v17  ;;  %v3938_v17 = vpack.c.bf16 %v3927_v9, %v3926_v48  ;;  %v3756_v59 = vrot.slane %v3754_v0, 3 }
 0x2d4   : > { %5199 = vmatmul.msk.bf16.gmra.mxu2 %vm8053_vm10, %v3770_v11 }
 0x2d5   : > { %v3945_v32 = vsel %vm6537_vm8, %v3938_v17, 0  ;;  %vm8057_vm8 = vmmov %vm8031_vm0  ;;  %v3935_v17 = vld [vmem:[#allocation3 + $0x88] sm:$0x1] }
 0x2d6   : > { %v2731_v50 = vpop.f32.mrf.mxu0  ;;  %v3987_v34 = vunpack.c.h.b16 %v3945_v32 }
 0x2d7   : > { %v2760_v57 = vadd.f32 %v2759_v60, %v2731_v50  ;;  %v2764_v29 = vpop.f32.mrf.mxu2  ;;  %v3940_v60 = vpack.c.bf16 %v3931_v5, %v3930_v58 }
 0x2d8   : > { %v2359_v7 = vpop.f32.mrf.mxu3  ;;  %v2920_v63 = vpop.f32.mrf.mxu1  ;;  %v3999_v23 = vpack.c.b16 %v3989_v35, %v3987_v34 }
 0x2d9   : > { %v2775_v28 = vadd.f32 %v2760_v57, %v2363_v40  ;;  %3872 = vmatmul.bf16.gmra.mxu0 %v3744_v16 }
 0x2db   : > { %4100 = vmatmul.bf16.vlgmr.msra.gmra.mxu1 %v3996_v21  ;;  %v3759_v21 = vrot.slane %v3757_v46, 4 }
 0x2dd   : > { %5273 = vmatmul.msk.bf16.vlgmr.msra.gmra.mxu3 %vm8054_vm2, %v3997_v31  ;;  %v3986_v31 = vunpack.c.l.b16 %v3945_v32  ;;  %v3760_v15 = vor.u32 %v3759_v21, %v3756_v59 }
 0x2de   : > { %v2733_v39 = vpop.f32.mrf.mxu0 }
 0x2df   : > { %v2762_v51 = vadd.f32 %v2761_v19, %v2733_v39  ;;  %v2766_v16 = vpop.f32.mrf.mxu2  ;;  %v3998_v45 = vpack.c.b16 %v3988_v12, %v3986_v31  ;;  %v3761_v53 = vsel %vm8058_vm9, %v7746_v20, %v3760_v15  ;;  %v3947_v20 = vsel %vm6620_vm14, %v3940_v60, 0  ;;  %vm8063_vm14 = vmmov %vm8031_vm0 }
 0x2e0   : > { %v2922_v18 = vpop.f32.mrf.mxu1  ;;  %v2948_v44 = vpop.f32.mrf.mxu3 }
 0x2e1   : > { %v2949_v38 = vadd.f32 %v2948_v44, %v2920_v63  ;;  %v2776_v40 = vadd.f32 %v2762_v51, %v2364_v8 }
 0x2e3   : > { %v7789_v14 = vadd.f32 %v2949_v38, %v2773_v22  ;;  %v3941_v22 = vpack.c.bf16 %v7756_v24, %v3672_v26  ;;  %v3991_v24 = vunpack.c.h.b16 %v3947_v20 }
 0x2e4   : > { %5200 = vmatmul.msk.bf16.gmra.mxu2 %vm8057_vm8, %v3765_v41 }
 0x2e5   : > { %v3948_v36 = vsel %vm8062_vm1, %v3941_v22, 0 }
 0x2e6   : > { %v2736_v49 = vpop.f32.mrf.mxu0  ;;  %v3992_v11 = vunpack.c.l.b16 %v3948_v36  ;;  %v3993_v26 = vunpack.c.h.b16 %v3948_v36 }
 0x2e7   : > { %v2765_v37 = vadd.f32 %v2764_v29, %v2736_v49  ;;  %v2769_v25 = vpop.f32.mrf.mxu2  ;;  %v3934_v29 = vld [vmem:[#allocation3 + $0x80] sm:$0x1] }
 0x2e8   : > { %v2925_v10 = vpop.f32.mrf.mxu1  ;;  %v2950_v52 = vpop.f32.mrf.mxu3  ;;  %v4001_v57 = vpack.c.b16 %v3993_v26, %v3991_v24  ;;  %v3942_v44 = vpack.c.bf16 %v3935_v17, %v3934_v29 }
 0x2e9   : > { %v2951_v30 = vadd.f32 %v2950_v52, %v2922_v18  ;;  %v2777_v8 = vadd.f32 %v2765_v37, %v7760_v55  ;;  %3877 = vmatmul.bf16.gmra.mxu0 %v3761_v53  ;;  %v3990_v55 = vunpack.c.l.b16 %v3947_v20 }
 0x2ea   : > { %v3949_v32 = vsel %vm6744_vm11, %v3942_v44, 0  ;;  %vm4155_vm11 = vcmask 392192  }
 0x2eb   : > { %v7794_v33 = vadd.f32 %v2951_v30, %v2774_v27  ;;  %4105 = vmatmul.bf16.gmra.mxu1 %v3998_v45  ;;  %v4000_v63 = vpack.c.b16 %v3992_v11, %v3990_v55  ;;  %v3994_v21 = vunpack.c.l.b16 %v3949_v32  ;;  %v3995_v51 = vunpack.c.h.b16 %v3949_v32 }
 0x2ed   : > { %5274 = vmatmul.msk.bf16.gmra.mxu3 %vm8059_vm12, %v3999_v23 }
 0x2ee   : > { %v2738_v54 = vpop.f32.mrf.mxu0 }
 0x2ef   : > { %v2767_v2 = vadd.f32 %v2766_v16, %v2738_v54  ;;  %v2771_v19 = vpop.f32.mrf.mxu2  ;;  %v4002_v16 = vpack.c.b16 %v3994_v21, %v3994_v21 }
 0x2f0   : > { %v2927_v41 = vpop.f32.mrf.mxu1  ;;  %v2953_v47 = vpop.f32.mrf.mxu3 }
 0x2f1   : > { %v2954_v56 = vadd.f32 %v2953_v47, %v2925_v10  ;;  %v2778_v7 = vadd.f32 %v2767_v2, %v7768_v13 }
 0x2f3   : > { %v2969_v27 = vadd.f32 %v2954_v56, %v2775_v28 }
 0x2f6   : > { %v2741_v6 = vpop.f32.mrf.mxu0 }
 0x2f7   : > { %v2770_v0 = vadd.f32 %v2769_v25, %v2741_v6  ;;  %v3340_v46 = vpop.f32.mrf.mxu2 }
 0x2f8   : > { %v2930_v50 = vpop.f32.mrf.mxu1  ;;  %v2955_v48 = vpop.f32.mrf.mxu3 }
 0x2f9   : > { %v2956_v9 = vadd.f32 %v2955_v48, %v2927_v41  ;;  %v2779_v28 = vadd.f32 %v2770_v0, %v7778_v3  ;;  %3882 = vmatmul.bf16.gmra.mxu0 %v3756_v59  ;;  %v4003_v59 = vpack.c.b16 %v3995_v51, %v3995_v51 }
 0x2fb   : > { %v2970_v18 = vadd.f32 %v2956_v9, %v2776_v40  ;;  %4110 = vmatmul.bf16.gmra.mxu1 %v4000_v63 }
 0x2fd   : > { %5275 = vmatmul.msk.bf16.gmra.mxu3 %vm8063_vm14, %v4001_v57 }
 0x2fe   : > { %v2743_v43 = vpop.f32.mrf.mxu0 }
 0x2ff   : > { %v3342_v38 = vpop.f32.mrf.mxu2 }
 0x300   : > { %v2932_v13 = vpop.f32.mrf.mxu1  ;;  %v2958_v42 = vpop.f32.mrf.mxu3 }
 0x301   : > { %v2959_v4 = vadd.f32 %v2958_v42, %v2930_v50 }
 0x303   : > { %v2971_v39 = vadd.f32 %v2959_v4, %v2777_v8 }
 0x306   : > { %v3312_v3 = vpop.f32.mrf.mxu0 }
 0x307   : > { %v3341_v34 = vadd.f32 %v3340_v46, %v3312_v3  ;;  %v3345_v35 = vpop.f32.mrf.mxu2 }
 0x308   : > { %v2935_v31 = vpop.f32.mrf.mxu1  ;;  %v2960_v12 = vpop.f32.mrf.mxu3 }
 0x309   : > { %v2961_v40 = vadd.f32 %v2960_v12, %v2932_v13  ;;  %v3359_v45 = vadd.f32 %v3341_v34, %v7789_v14 }
 0x30b   : > { %v2972_v15 = vadd.f32 %v2961_v40, %v2778_v7  ;;  %4115 = vmatmul.bf16.gmra.mxu1 %v4002_v16 }
 0x30d   : > { %5276 = vmatmul.msk.bf16.gmra.mxu3 %vm8064_vm4, %v4003_v59 }
 0x30e   : > { %v3314_v30 = vpop.f32.mrf.mxu0 }
 0x30f   : > { %v3343_v49 = vadd.f32 %v3342_v38, %v3314_v30  ;;  %v3347_v23 = vpop.f32.mrf.mxu2 }
 0x310   : > { %v2937_v1 = vpop.f32.mrf.mxu1  ;;  %v2963_v10 = vpop.f32.mrf.mxu3 }
 0x311   : > { %v2964_v52 = vadd.f32 %v2963_v10, %v2935_v31  ;;  %v3360_v58 = vadd.f32 %v3343_v49, %v7794_v33 }
 0x313   : > { %v2973_v53 = vadd.f32 %v2964_v52, %v2779_v28 }
 0x316   : > { %v3317_v25 = vpop.f32.mrf.mxu0 }
 0x317   : > { %v3346_v8 = vadd.f32 %v3345_v35, %v3317_v25  ;;  %v3350_v60 = vpop.f32.mrf.mxu2 }
 0x318   : > { %v2965_v5 = vpop.f32.mrf.mxu3  ;;  %v3616_v37 = vpop.f32.mrf.mxu1 }
 0x319   : > { %v3361_v22 = vadd.f32 %v3346_v8, %v2969_v27 }
 0x31e   : > { %v3319_v62 = vpop.f32.mrf.mxu0 }
 0x31f   : > { %v3348_v20 = vadd.f32 %v3347_v23, %v3319_v62  ;;  %v3352_v61 = vpop.f32.mrf.mxu2 }
 0x320   : > { %v3618_v41 = vpop.f32.mrf.mxu1  ;;  %v3644_v47 = vpop.f32.mrf.mxu3 }
 0x321   : > { %v3645_v14 = vadd.f32 %v3644_v47, %v3616_v37  ;;  %v3362_v56 = vadd.f32 %v3348_v20, %v2970_v18 }
 0x323   : > { %v3663_v36 = vadd.f32 %v3645_v14, %v3359_v45 }
 0x326   : > { %v3322_v55 = vpop.f32.mrf.mxu0 }
 0x327   : > { %v3351_v11 = vadd.f32 %v3350_v60, %v3322_v55  ;;  %v3355_v33 = vpop.f32.mrf.mxu2 }
 0x328   : > { %v3621_v54 = vpop.f32.mrf.mxu1  ;;  %v3646_v2 = vpop.f32.mrf.mxu3 }
 0x329   : > { %v3647_v19 = vadd.f32 %v3646_v2, %v3618_v41  ;;  %v3363_v24 = vadd.f32 %v3351_v11, %v2971_v39 }
 0x32b   : > { %v3664_v7 = vadd.f32 %v3647_v19, %v3360_v58 }
 0x32e   : > { %v3324_v27 = vpop.f32.mrf.mxu0 }
 0x32f   : > { %v3353_v48 = vadd.f32 %v3352_v61, %v3324_v27  ;;  %v3357_v9 = vpop.f32.mrf.mxu2 }
 0x330   : > { %v3623_v26 = vpop.f32.mrf.mxu1  ;;  %v3649_v63 = vpop.f32.mrf.mxu3 }
 0x331   : > { %v3650_v50 = vadd.f32 %v3649_v63, %v3621_v54  ;;  %v3364_v57 = vadd.f32 %v3353_v48, %v2972_v15 }
 0x333   : > { %v3665_v6 = vadd.f32 %v3650_v50, %v3361_v22 }
 0x336   : > { %v3327_v46 = vpop.f32.mrf.mxu0 }
 0x337   : > { %v3356_v18 = vadd.f32 %v3355_v33, %v3327_v46  ;;  %v3896_v28 = vpop.f32.mrf.mxu2 }
 0x338   : > { %v3626_v29 = vpop.f32.mrf.mxu1  ;;  %v3651_v17 = vpop.f32.mrf.mxu3 }
 0x339   : > { %v3652_v0 = vadd.f32 %v3651_v17, %v3623_v26  ;;  %v3365_v13 = vadd.f32 %v3356_v18, %v2973_v53 }
 0x33b   : > { %v3666_v44 = vadd.f32 %v3652_v0, %v3362_v56 }
 0x33e   : > { %v3329_v43 = vpop.f32.mrf.mxu0 }
 0x33f   : > { %v3898_v38 = vpop.f32.mrf.mxu2 }
 0x340   : > { %v3628_v42 = vpop.f32.mrf.mxu1  ;;  %v3654_v32 = vpop.f32.mrf.mxu3 }
 0x341   : > { %v3655_v4 = vadd.f32 %v3654_v32, %v3626_v29 }
 0x343   : > { %v3667_v39 = vadd.f32 %v3655_v4, %v3363_v24 }
 0x346   : > { %v3868_v31 = vpop.f32.mrf.mxu0 }
 0x347   : > { %v3901_v12 = vpop.f32.mrf.mxu2  ;;  %v3897_v49 = vadd.f32 %v3896_v28, %v3868_v31 }
 0x348   : > { %v3631_v21 = vpop.f32.mrf.mxu1  ;;  %v3656_v51 = vpop.f32.mrf.mxu3 }
 0x349   : > { %v3657_v16 = vadd.f32 %v3656_v51, %v3628_v42  ;;  %v3915_v58 = vadd.f32 %v3897_v49, %v3663_v36 }
 0x34b   : > { %v3668_v40 = vadd.f32 %v3657_v16, %v3364_v57 }
 0x34e   : > { %v3870_v35 = vpop.f32.mrf.mxu0 }
 0x34f   : > { %v3903_v15 = vpop.f32.mrf.mxu2  ;;  %v3899_v60 = vadd.f32 %v3898_v38, %v3870_v35 }
 0x350   : > { %v3633_v3 = vpop.f32.mrf.mxu1  ;;  %v3659_v59 = vpop.f32.mrf.mxu3 }
 0x351   : > { %v3660_v34 = vadd.f32 %v3659_v59, %v3631_v21  ;;  %v3916_v47 = vadd.f32 %v3899_v60, %v3664_v7 }
 0x353   : > { %v3669_v45 = vadd.f32 %v3660_v34, %v3365_v13 }
 0x356   : > { %v3873_v52 = vpop.f32.mrf.mxu0 }
 0x357   : > { %v3906_v30 = vpop.f32.mrf.mxu2  ;;  %v3902_v56 = vadd.f32 %v3901_v12, %v3873_v52 }
 0x358   : > { %v3661_v1 = vpop.f32.mrf.mxu3  ;;  %v4101_v10 = vpop.f32.mrf.mxu1 }
 0x359   : > { %v3917_v2 = vadd.f32 %v3902_v56, %v3665_v6 }
 0x35e   : > { %v3875_v37 = vpop.f32.mrf.mxu0 }
 0x35f   : > { %v3908_v25 = vpop.f32.mrf.mxu2  ;;  %v3904_v24 = vadd.f32 %v3903_v15, %v3875_v37 }
 0x360   : > { %v4103_v23 = vpop.f32.mrf.mxu1  ;;  %v4129_v53 = vpop.f32.mrf.mxu3 }
 0x361   : > { %v4130_v5 = vadd.f32 %v4129_v53, %v4101_v10  ;;  %v3918_v63 = vadd.f32 %v3904_v24, %v3666_v44 }
 0x363   : > { %v4148_v8 = vadd.f32 %v4130_v5, %v3915_v58 }
 0x365   : > { %4156 = vst.msk [vmem:[%s7853_s5] sm:$0xff] %vm4155_vm11, %v4148_v8 }
 0x366   : > { %v3878_v62 = vpop.f32.mrf.mxu0 }
 0x367   : > { %v3911_v20 = vpop.f32.mrf.mxu2  ;;  %v3907_v9 = vadd.f32 %v3906_v30, %v3878_v62 }
 0x368   : > { %v4106_v22 = vpop.f32.mrf.mxu1  ;;  %v4131_v41 = vpop.f32.mrf.mxu3 }
 0x369   : > { %v4132_v14 = vadd.f32 %v4131_v41, %v4103_v23  ;;  %v3919_v29 = vadd.f32 %v3907_v9, %v3667_v39 }
 0x36b   : > { %v4149_v61 = vadd.f32 %v4132_v14, %v3916_v47 }
 0x36d   : > { %4157 = vst.msk [vmem:[%s7853_s5 + $0x8] sm:$0xff] %vm4155_vm11, %v4149_v61 }
 0x36e   : > { %v3880_v55 = vpop.f32.mrf.mxu0 }
 0x36f   : > { %v3913_v11 = vpop.f32.mrf.mxu2  ;;  %v3909_v18 = vadd.f32 %v3908_v25, %v3880_v55 }
 0x370   : > { %v4108_v36 = vpop.f32.mrf.mxu1  ;;  %v4134_v54 = vpop.f32.mrf.mxu3 }
 0x371   : > { %v4135_v19 = vadd.f32 %v4134_v54, %v4106_v22  ;;  %v3920_v13 = vadd.f32 %v3909_v18, %v3668_v40 }
 0x373   : > { %v4150_v33 = vadd.f32 %v4135_v19, %v3917_v2 }
 0x375   : > { %4158 = vst.msk [vmem:[%s7853_s5 + $0x10] sm:$0xff] %vm4155_vm11, %v4150_v33 }
 0x376   : > { %v3883_v27 = vpop.f32.mrf.mxu0 }
 0x377   : > { %v3912_v4 = vadd.f32 %v3911_v20, %v3883_v27 }
 0x378   : > { %v4111_v7 = vpop.f32.mrf.mxu1  ;;  %v4136_v26 = vpop.f32.mrf.mxu3 }
 0x379   : > { %v4137_v50 = vadd.f32 %v4136_v26, %v4108_v36  ;;  %v3921_v39 = vadd.f32 %v3912_v4, %v3669_v45 }
 0x37b   : > { %v4151_v48 = vadd.f32 %v4137_v50, %v3918_v63 }
 0x37d   : > { %4159 = vst.msk [vmem:[%s7853_s5 + $0x18] sm:$0xff] %vm4155_vm11, %v4151_v48 }
 0x37e   : > { %v3885_v0 = vpop.f32.mrf.mxu0 }
 0x380   : > { %v4113_v6 = vpop.f32.mrf.mxu1  ;;  %v4139_v57 = vpop.f32.mrf.mxu3 }
 0x381   : > { %v4140_v17 = vadd.f32 %v4139_v57, %v4111_v7 }
 0x383   : > { %v4152_v46 = vadd.f32 %v4140_v17, %v3919_v29 }
 0x385   : > { %4160 = vst.msk [vmem:[%s7853_s5 + $0x20] sm:$0xff] %vm4155_vm11, %v4152_v46 }
 0x388   : > { %v4116_v28 = vpop.f32.mrf.mxu1  ;;  %v4141_v44 = vpop.f32.mrf.mxu3 }
 0x389   : > { %v4142_v42 = vadd.f32 %v4141_v44, %v4113_v6 }
 0x38b   : > { %v4153_v32 = vadd.f32 %v4142_v42, %v3920_v13 }
 0x38d   : > { %4161 = vst.msk [vmem:[%s7853_s5 + $0x28] sm:$0xff] %vm4155_vm11, %v4153_v32 }
 0x390   : > { %v4118_v43 = vpop.f32.mrf.mxu1  ;;  %v4144_v38 = vpop.f32.mrf.mxu3 }
 0x391   : > { %v4145_v21 = vadd.f32 %v4144_v38, %v4116_v28 }
 0x393   : > { %v4154_v51 = vadd.f32 %v4145_v21, %v3921_v39 }
 0x395   : > { %4163 = vst.msk [vmem:[%s7853_s5 + $0x30] sm:$0x1] %vm4162_vm5, %v4154_v51 }
 0x398   : > { %v4146_v16 = vpop.f32.mrf.mxu3 }
 0x399 PF: > { %p12_p11 = scmp.ge.s32.totalorder %s5624_s22, 5   ;;  %s8065_s18 = smov %s5565_s19 }
 0x39a   : > { %s8066_s19 = smov %s5633_s25  ;;  %s8067_s20 = smov %s5624_s22 }
 0x39b   :  { %14 = sbr.rel (!%p12_p11) target bundleno = 2 (0x2), region = 122 }

</bundles_post_ra>
